<compile_context>
chip_gen: v7x
topology: tpu7x:2x2x1
jax: 0.10.0
libtpu: 0.0.40
codegen_flags: <defaults>
</compile_context>

<pallas_src>
import functools
import math

import numpy as np
import jax
import jax.numpy as jnp
from jax.experimental import pallas as pl
from jax.experimental.pallas import tpu as pltpu


# -----------------------------------------------------------------------------
# Synthetic (deterministic) Laplacians — stand-in for get_healpix_laplacians
# -----------------------------------------------------------------------------
def _fibonacci_sphere(n):
    i = np.arange(n, dtype=np.float64)
    phi = np.arccos(1.0 - 2.0 * (i + 0.5) / n)
    theta = np.pi * (1.0 + 5.0 ** 0.5) * i
    x = np.cos(theta) * np.sin(phi)
    y = np.sin(theta) * np.sin(phi)
    z = np.cos(phi)
    return np.stack([x, y, z], axis=1)


def _build_laplacian(n, k=8):
    pts = _fibonacci_sphere(n)
    d2 = ((pts[:, None, :] - pts[None, :, :]) ** 2).sum(-1)
    order = np.argsort(d2, axis=1)[:, 1:k + 1]            # kNN, excluding self
    kept = np.take_along_axis(d2, order, axis=1)
    sigma = kept.mean() + 1e-12
    W = np.zeros((n, n), dtype=np.float64)
    rows = np.repeat(np.arange(n), k)
    W[rows, order.reshape(-1)] = np.exp(-kept.reshape(-1) / (2.0 * sigma))
    W = np.maximum(W, W.T)                                 # symmetrize
    d = W.sum(1)
    dinv = 1.0 / np.sqrt(np.maximum(d, 1e-12))
    L = np.eye(n) - dinv[:, None] * W * dinv[None, :]      # normalized Laplacian
    lmax = float(np.linalg.eigvalsh(L).max()) * 1.02
    L = 2.0 * L / lmax - np.eye(n)                         # rescale to [-1, 1]
    return jnp.asarray(L, jnp.float32)


def get_healpix_laplacians(nodes, depth, k=8):
    # DeepSphere builds laps at nodes // 4**i and returns them reversed
    # (coarsest resolution first).
    laps = [_build_laplacian(nodes // (4 ** i), k=k) for i in range(depth)]
    return laps[::-1]


# -----------------------------------------------------------------------------
# Pallas kernel: fused UNet block =
#   [Chebyshev conv (order K) + bias + InstanceNorm1d + ReLU]  x 2
# channels-first tiles so the matmul output lane dim is N (lane-dense).
# -----------------------------------------------------------------------------
def _cheb_block_kernel(x_ref, l2_ref, w1_ref, b1_ref, w2_ref, b2_ref, o_ref, *, K):
    # x_ref:  (1, Cin_pad, N)     l2_ref: (N, N) holding 2*L (pre-scaled)
    # w1_ref: (Cmid_pad, K*Cin_pad)   b1_ref: (Cmid_pad, 1)
    # w2_ref: (Cout,     K*Cmid_pad)  b2_ref: (Cout, 1)
    # o_ref:  (1, Cout, N)
    L2 = l2_ref[...]

    def conv_in_relu(x0, w_stack, bias):
        # x0: (C, N) channels-first; L is symmetric so L@x (node-first) == x@L here.
        xs = [x0]
        if K > 1:
            x1 = 0.5 * jnp.dot(x0, L2, preferred_element_type=jnp.float32)
            xs.append(x1)
            x_prev, x_cur = x0, x1
            for _ in range(2, K):
                x_next = jnp.dot(x_cur, L2,
                                 preferred_element_type=jnp.float32) - x_prev
                xs.append(x_next)
                x_prev, x_cur = x_cur, x_next
        # Stack the K Chebyshev terms (each C is a multiple of 8 -> aligned
        # sublane concat) and do ONE deep contraction on the MXU.
        x_stack = xs[0] if K == 1 else jnp.concatenate(xs, axis=0)   # (K*C, N)
        acc = jnp.dot(w_stack, x_stack,
                      preferred_element_type=jnp.float32)            # (Cm, N)
        acc = acc + bias                                              # (Cm, 1) bcast

        # One-pass InstanceNorm1d (affine=False, eps=1e-5): per-channel over N.
        inv_n = 1.0 / acc.shape[-1]
        mean = jnp.sum(acc, axis=-1, keepdims=True) * inv_n
        ex2 = jnp.sum(acc * acc, axis=-1, keepdims=True) * inv_n
        var = jnp.maximum(ex2 - mean * mean, 0.0)
        y = (acc - mean) * jax.lax.rsqrt(var + 1e-5)
        return jnp.maximum(y, 0.0)                                    # ReLU

    h = conv_in_relu(x_ref[0], w1_ref[...], b1_ref[...])
    o_ref[0] = conv_in_relu(h, w2_ref[...], b2_ref[...])


def cheb_block(x, l2, w1s, b1, w2s, b2, *, K):
    """x: (B, Cin_pad, N) f32; l2: (N, N) = 2*L; w1s: (Cmid_pad, K*Cin_pad);
    b1: (Cmid_pad, 1); w2s: (Cout, K*Cmid_pad); b2: (Cout, 1)."""
    B, cin_p, N = x.shape
    cmid_p = w1s.shape[0]
    cout = w2s.shape[0]

    # Size the scoped VMEM limit to what the block actually needs (double
    # buffering + live Chebyshev iterates), clamped to be safe on v7x (64 MiB).
    blk_elems = (2 * (cin_p + cout) * N + N * N
                 + w1s.size + w2s.size + b1.size + b2.size)
    live_elems = 2 * (K + 3) * max(cin_p, cmid_p) * N
    vmem_bytes = 4 * (2 * blk_elems + live_elems)
    vmem_limit = int(min(max(vmem_bytes, 16 << 20), 64 << 20))

    kernel = functools.partial(_cheb_block_kernel, K=K)
    return pl.pallas_call(
        kernel,
        out_shape=jax.ShapeDtypeStruct((B, cout, N), jnp.float32),
        grid=(B,),
        in_specs=[
            pl.BlockSpec((1, cin_p, N), lambda b: (b, 0, 0)),
            pl.BlockSpec((N, N), lambda b: (0, 0)),
            pl.BlockSpec((cmid_p, K * cin_p), lambda b: (0, 0)),
            pl.BlockSpec((cmid_p, 1), lambda b: (0, 0)),
            pl.BlockSpec((cout, K * cmid_p), lambda b: (0, 0)),
            pl.BlockSpec((cout, 1), lambda b: (0, 0)),
        ],
        out_specs=pl.BlockSpec((1, cout, N), lambda b: (b, 0, 0)),
        compiler_params=pltpu.CompilerParams(
            dimension_semantics=("parallel",),
            vmem_limit_bytes=vmem_limit),
    )(x, l2, w1s, b1, w2s, b2)


# -----------------------------------------------------------------------------
# HEALPix pooling glue (factor 4, with indices, max-unpool scatter) — XLA ops
# -----------------------------------------------------------------------------
def healpix_max_pool(x):
    B, C, N = x.shape
    xr = x.reshape(B, C, N // 4, 4)
    return jnp.max(xr, axis=-1), jnp.argmax(xr, axis=-1)


def healpix_max_unpool(x, idx):
    B, C, M = x.shape
    sel = jnp.arange(4, dtype=idx.dtype)[None, None, None, :] == idx[..., None]
    return jnp.where(sel, x[..., None], 0.0).reshape(B, C, M * 4)


# -----------------------------------------------------------------------------
# Parameter construction / padding helpers
# -----------------------------------------------------------------------------
def _ceil_to(v, m):
    return ((v + m - 1) // m) * m


def _pad_channels(x, c_pad):
    B, C, N = x.shape
    if C == c_pad:
        return x
    return jnp.pad(x, ((0, 0), (0, c_pad - C), (0, 0)))


def _init_conv(key, c_in, c_out, K):
    # DeepSphere kaiming init: std = sqrt(2 / (c_in * K)), bias = 0.01
    std = math.sqrt(2.0 / (c_in * K))
    w = jax.random.normal(key, (K, c_in, c_out), jnp.float32) * std
    b = jnp.full((c_out,), 0.01, jnp.float32)
    return w, b


def _prep_block_params(w1, b1, w2, b2):
    """Pad channels to multiples of 8 (zero weights) and pre-stack/transpose
    weights into (Cout, K*Cin) form for the in-kernel deep contraction."""
    K, c_in, c_mid = w1.shape
    _, _, c_out = w2.shape
    cin_p = _ceil_to(c_in, 8)
    cmid_p = _ceil_to(c_mid, 8)
    w1p = jnp.zeros((K, cin_p, cmid_p), jnp.float32).at[:, :c_in, :c_mid].set(w1)
    b1p = jnp.zeros((cmid_p, 1), jnp.float32).at[:c_mid, 0].set(b1)
    w2p = jnp.zeros((K, cmid_p, c_out), jnp.float32).at[:, :c_mid, :].set(w2)
    b2p = b2.reshape(c_out, 1)
    w1s = jnp.transpose(w1p, (2, 0, 1)).reshape(cmid_p, K * cin_p)
    w2s = jnp.transpose(w2p, (2, 0, 1)).reshape(c_out, K * cmid_p)
    return w1s, b1p, w2s, b2p, cin_p


def _run_block(x, blk):
    l2, w1s, b1, w2s, b2, cin_p, K = blk
    x = _pad_channels(x, cin_p)            # zero channels, matched by zero weights
    return cheb_block(x, l2, w1s, b1, w2s, b2, K=K)


# -----------------------------------------------------------------------------
# Model construction (shapes mirror SphericalUnet.__init__) + forward
# -----------------------------------------------------------------------------
def build_spherical_unet(key, in_channels, out_channels, subdivision,
                         encoder_depth=5, enc_channels=None, kernel_size=6):
    if np.log2(subdivision) + 1 <= encoder_depth:
        encoder_depth = int(np.log2(subdivision) + 1)
    if enc_channels is None:
        enc_channels = [8, 16, 32, 64, 128][:encoder_depth]

    laps = get_healpix_laplacians(nodes=12 * subdivision ** 2,
                                  depth=encoder_depth, k=8)     # coarse -> fine
    enc_laps = laps[::-1]                                       # fine -> coarse
    dec_laps = laps

    # ---- encoder layer configs ----
    enc_ch = [in_channels] + list(enc_channels)
    encoder_cfg = []
    for counter in range(encoder_depth):
        n_in = enc_ch[counter]
        n_out = enc_ch[counter + 1]
        if counter == 0:
            n_mid = enc_ch[counter + 1] // 2
        elif counter == encoder_depth - 1:
            n_mid = enc_ch[counter + 1]
            n_out = enc_ch[counter]
        else:
            n_mid = n_out
        pooling = None if counter == 0 else 'max'
        encoder_cfg.append((n_in, n_mid, n_out, pooling, enc_laps[counter]))

    # ---- decoder layer configs ----
    dec_channels = list(enc_channels)[::-1][1:]
    dec_depth = encoder_depth - 1
    decoder_cfg = []
    for counter in range(dec_depth):
        n_in = dec_channels[counter] * 2
        n_mid = dec_channels[counter]
        n_out = out_channels if counter == dec_depth - 1 else dec_channels[counter + 1]
        lap = dec_laps[min(counter + 1, encoder_depth - 1)]
        decoder_cfg.append((n_in, n_mid, n_out, lap))

    K = kernel_size
    enc_blocks, dec_blocks = [], []
    for (n_in, n_mid, n_out, pooling, lap) in encoder_cfg:
        key, k1, k2 = jax.random.split(key, 3)
        w1, b1 = _init_conv(k1, n_in, n_mid, K)
        w2, b2 = _init_conv(k2, n_mid, n_out, K)
        w1s, b1p, w2s, b2p, cin_p = _prep_block_params(w1, b1, w2, b2)
        enc_blocks.append((pooling, (2.0 * lap, w1s, b1p, w2s, b2p, cin_p, K)))
    for (n_in, n_mid, n_out, lap) in decoder_cfg:
        key, k1, k2 = jax.random.split(key, 3)
        w1, b1 = _init_conv(k1, n_in, n_mid, K)
        w2, b2 = _init_conv(k2, n_mid, n_out, K)
        w1s, b1p, w2s, b2p, cin_p = _prep_block_params(w1, b1, w2, b2)
        dec_blocks.append((2.0 * lap, w1s, b1p, w2s, b2p, cin_p, K))

    def forward(x_bcn):
        # External and internal layout are both channels-first (B, C, N).
        x = x_bcn.astype(jnp.float32)

        # encoder
        feats, indices = [], []
        for pooling, blk in enc_blocks:
            idx = None
            if pooling == 'max':
                x, idx = healpix_max_pool(x)
            x = _run_block(x, blk)
            feats.append(x)
            indices.append(idx)

        # decoder
        x = feats[-1]
        skips = feats[:-1][::-1]
        idxs = [ix for ix in indices if ix is not None][::-1]
        for counter, blk in enumerate(dec_blocks):
            x = healpix_max_unpool(x, idxs[counter])
            x = jnp.concatenate([x, skips[counter]], axis=1)      # skip concat
            x = _run_block(x, blk)

        return x                                                   # (B, C_out, N)

    return forward


# -----------------------------------------------------------------------------
if __name__ == "__main__":
    key = jax.random.PRNGKey(0)
    key_params, key_x = jax.random.split(key)

    in_channels, out_channels, subdivision = 3, 2, 4          # N = 12*4^2 = 192
    forward = build_spherical_unet(key_params, in_channels, out_channels,
                                   subdivision, encoder_depth=5,
                                   kernel_size=6)

    B, N = 2, 12 * subdivision ** 2
    x = jax.random.normal(key_x, (B, in_channels, N), jnp.float32)

    out = jax.block_until_ready(jax.jit(forward)(x))
    assert out.shape == (B, out_channels, N), out.shape
    assert bool(jnp.all(jnp.isfinite(out)))
    print("KERNEL_OK")
</pallas_src>

<mosaic_0001>
module attributes {stable_mosaic.version = 11 : i64} {
  func.func @_cheb_block_kernel(%arg0: i32, %arg1: memref<1x8x192xf32, #tpu.memory_space<vmem>>, %arg2: memref<192x192xf32, #tpu.memory_space<vmem>>, %arg3: memref<8x48xf32, #tpu.memory_space<vmem>>, %arg4: memref<8x1xf32, #tpu.memory_space<vmem>>, %arg5: memref<8x48xf32, #tpu.memory_space<vmem>>, %arg6: memref<8x1xf32, #tpu.memory_space<vmem>>, %arg7: memref<1x8x192xf32, #tpu.memory_space<vmem>>) attributes {dimension_semantics = [#tpu.dimension_semantics<parallel>], iteration_bounds = array<i64: 2>, scalar_prefetch = 0 : i64, scratch_operands = 0 : i64, tpu.core_type = #tpu.core_type<tc>, window_params = [{transform_indices = @transform_0, window_bounds = array<i64: 1, 8, 192>}, {pipeline_mode = #tpu.pipeline_mode<synchronous>, transform_indices = @transform_1, window_bounds = array<i64: 192, 192>}, {pipeline_mode = #tpu.pipeline_mode<synchronous>, transform_indices = @transform_2, window_bounds = array<i64: 8, 48>}, {pipeline_mode = #tpu.pipeline_mode<synchronous>, transform_indices = @transform_3, window_bounds = array<i64: 8, 1>}, {pipeline_mode = #tpu.pipeline_mode<synchronous>, transform_indices = @transform_4, window_bounds = array<i64: 8, 48>}, {pipeline_mode = #tpu.pipeline_mode<synchronous>, transform_indices = @transform_5, window_bounds = array<i64: 8, 1>}, {transform_indices = @transform_6, window_bounds = array<i64: 1, 8, 192>}]} {
    %c0 = arith.constant 0 : index
    %c0_0 = arith.constant 0 : index
    %0 = vector.load %arg2[%c0, %c0_0] : memref<192x192xf32, #tpu.memory_space<vmem>>, vector<192x192xf32>
    %c0_1 = arith.constant 0 : index
    %c0_2 = arith.constant 0 : index
    %c0_3 = arith.constant 0 : index
    %1 = vector.load %arg1[%c0_1, %c0_2, %c0_3] : memref<1x8x192xf32, #tpu.memory_space<vmem>>, vector<1x8x192xf32>
    %2 = vector.shape_cast %1 : vector<1x8x192xf32> to vector<8x192xf32>
    %c0_4 = arith.constant 0 : index
    %c0_5 = arith.constant 0 : index
    %3 = vector.load %arg3[%c0_4, %c0_5] : memref<8x48xf32, #tpu.memory_space<vmem>>, vector<8x48xf32>
    %c0_6 = arith.constant 0 : index
    %c0_7 = arith.constant 0 : index
    %4 = vector.load %arg4[%c0_6, %c0_7] : memref<8x1xf32, #tpu.memory_space<vmem>>, vector<8x1xf32>
    %cst = arith.constant dense<0.000000e+00> : vector<8x192xf32>
    %5 = tpu.matmul %2, %0, %cst {dimension_numbers = #tpu.dot_dimension_numbers<[1], [0], [0], [1], [0, 0, 1, 1], [], []>} : vector<8x192xf32>, vector<192x192xf32>, vector<8x192xf32> -> vector<8x192xf32>
    %cst_8 = arith.constant 5.000000e-01 : f32
    %6 = vector.broadcast %cst_8 : f32 to vector<8x192xf32>
    %7 = arith.mulf %6, %5 : vector<8x192xf32>
    %cst_9 = arith.constant dense<0.000000e+00> : vector<8x192xf32>
    %8 = tpu.matmul %7, %0, %cst_9 {dimension_numbers = #tpu.dot_dimension_numbers<[1], [0], [0], [1], [0, 0, 1, 1], [], []>} : vector<8x192xf32>, vector<192x192xf32>, vector<8x192xf32> -> vector<8x192xf32>
    %9 = arith.subf %8, %2 : vector<8x192xf32>
    %cst_10 = arith.constant dense<0.000000e+00> : vector<8x192xf32>
    %10 = tpu.matmul %9, %0, %cst_10 {dimension_numbers = #tpu.dot_dimension_numbers<[1], [0], [0], [1], [0, 0, 1, 1], [], []>} : vector<8x192xf32>, vector<192x192xf32>, vector<8x192xf32> -> vector<8x192xf32>
    %11 = arith.subf %10, %7 : vector<8x192xf32>
    %cst_11 = arith.constant dense<0.000000e+00> : vector<8x192xf32>
    %12 = tpu.matmul %11, %0, %cst_11 {dimension_numbers = #tpu.dot_dimension_numbers<[1], [0], [0], [1], [0, 0, 1, 1], [], []>} : vector<8x192xf32>, vector<192x192xf32>, vector<8x192xf32> -> vector<8x192xf32>
    %13 = arith.subf %12, %9 : vector<8x192xf32>
    %cst_12 = arith.constant dense<0.000000e+00> : vector<8x192xf32>
    %14 = tpu.matmul %13, %0, %cst_12 {dimension_numbers = #tpu.dot_dimension_numbers<[1], [0], [0], [1], [0, 0, 1, 1], [], []>} : vector<8x192xf32>, vector<192x192xf32>, vector<8x192xf32> -> vector<8x192xf32>
    %15 = arith.subf %14, %11 : vector<8x192xf32>
    %16 = tpu.concatenate %2, %7, %9, %11, %13, %15 in 0 : vector<8x192xf32>, vector<8x192xf32>, vector<8x192xf32>, vector<8x192xf32>, vector<8x192xf32>, vector<8x192xf32> -> vector<48x192xf32>
    %cst_13 = arith.constant dense<0.000000e+00> : vector<8x192xf32>
    %17 = tpu.matmul %3, %16, %cst_13 {dimension_numbers = #tpu.dot_dimension_numbers<[1], [0], [0], [1], [0, 0, 1, 1], [], []>} : vector<8x48xf32>, vector<48x192xf32>, vector<8x192xf32> -> vector<8x192xf32>
    %18 = vector.broadcast %4 : vector<8x1xf32> to vector<8x192xf32>
    %19 = arith.addf %17, %18 : vector<8x192xf32>
    %cst_14 = arith.constant dense<0.000000e+00> : vector<8xf32>
    %20 = vector.multi_reduction <add>, %19, %cst_14 [1] : vector<8x192xf32> to vector<8xf32>
    %21 = vector.shape_cast %20 : vector<8xf32> to vector<8x1xf32>
    %cst_15 = arith.constant 0.00520833349 : f32
    %22 = vector.broadcast %cst_15 : f32 to vector<8x1xf32>
    %23 = arith.mulf %21, %22 : vector<8x1xf32>
    %24 = arith.mulf %19, %19 : vector<8x192xf32>
    %cst_16 = arith.constant dense<0.000000e+00> : vector<8xf32>
    %25 = vector.multi_reduction <add>, %24, %cst_16 [1] : vector<8x192xf32> to vector<8xf32>
    %26 = vector.shape_cast %25 : vector<8xf32> to vector<8x1xf32>
    %cst_17 = arith.constant 0.00520833349 : f32
    %27 = vector.broadcast %cst_17 : f32 to vector<8x1xf32>
    %28 = arith.mulf %26, %27 : vector<8x1xf32>
    %29 = arith.mulf %23, %23 : vector<8x1xf32>
    %30 = arith.subf %28, %29 : vector<8x1xf32>
    %cst_18 = arith.constant 0.000000e+00 : f32
    %31 = vector.broadcast %cst_18 : f32 to vector<8x1xf32>
    %32 = arith.maximumf %30, %31 : vector<8x1xf32>
    %33 = vector.broadcast %23 : vector<8x1xf32> to vector<8x192xf32>
    %34 = arith.subf %19, %33 : vector<8x192xf32>
    %cst_19 = arith.constant 9.99999974E-6 : f32
    %35 = vector.broadcast %cst_19 : f32 to vector<8x1xf32>
    %36 = arith.addf %32, %35 : vector<8x1xf32>
    %37 = math.rsqrt %36 : vector<8x1xf32>
    %38 = vector.broadcast %37 : vector<8x1xf32> to vector<8x192xf32>
    %39 = arith.mulf %34, %38 : vector<8x192xf32>
    %cst_20 = arith.constant 0.000000e+00 : f32
    %40 = vector.broadcast %cst_20 : f32 to vector<8x192xf32>
    %41 = arith.maximumf %39, %40 : vector<8x192xf32>
    %c0_21 = arith.constant 0 : index
    %c0_22 = arith.constant 0 : index
    %42 = vector.load %arg5[%c0_21, %c0_22] : memref<8x48xf32, #tpu.memory_space<vmem>>, vector<8x48xf32>
    %c0_23 = arith.constant 0 : index
    %c0_24 = arith.constant 0 : index
    %43 = vector.load %arg6[%c0_23, %c0_24] : memref<8x1xf32, #tpu.memory_space<vmem>>, vector<8x1xf32>
    %cst_25 = arith.constant dense<0.000000e+00> : vector<8x192xf32>
    %44 = tpu.matmul %41, %0, %cst_25 {dimension_numbers = #tpu.dot_dimension_numbers<[1], [0], [0], [1], [0, 0, 1, 1], [], []>} : vector<8x192xf32>, vector<192x192xf32>, vector<8x192xf32> -> vector<8x192xf32>
    %cst_26 = arith.constant 5.000000e-01 : f32
    %45 = vector.broadcast %cst_26 : f32 to vector<8x192xf32>
    %46 = arith.mulf %45, %44 : vector<8x192xf32>
    %cst_27 = arith.constant dense<0.000000e+00> : vector<8x192xf32>
    %47 = tpu.matmul %46, %0, %cst_27 {dimension_numbers = #tpu.dot_dimension_numbers<[1], [0], [0], [1], [0, 0, 1, 1], [], []>} : vector<8x192xf32>, vector<192x192xf32>, vector<8x192xf32> -> vector<8x192xf32>
    %48 = arith.subf %47, %41 : vector<8x192xf32>
    %cst_28 = arith.constant dense<0.000000e+00> : vector<8x192xf32>
    %49 = tpu.matmul %48, %0, %cst_28 {dimension_numbers = #tpu.dot_dimension_numbers<[1], [0], [0], [1], [0, 0, 1, 1], [], []>} : vector<8x192xf32>, vector<192x192xf32>, vector<8x192xf32> -> vector<8x192xf32>
    %50 = arith.subf %49, %46 : vector<8x192xf32>
    %cst_29 = arith.constant dense<0.000000e+00> : vector<8x192xf32>
    %51 = tpu.matmul %50, %0, %cst_29 {dimension_numbers = #tpu.dot_dimension_numbers<[1], [0], [0], [1], [0, 0, 1, 1], [], []>} : vector<8x192xf32>, vector<192x192xf32>, vector<8x192xf32> -> vector<8x192xf32>
    %52 = arith.subf %51, %48 : vector<8x192xf32>
    %cst_30 = arith.constant dense<0.000000e+00> : vector<8x192xf32>
    %53 = tpu.matmul %52, %0, %cst_30 {dimension_numbers = #tpu.dot_dimension_numbers<[1], [0], [0], [1], [0, 0, 1, 1], [], []>} : vector<8x192xf32>, vector<192x192xf32>, vector<8x192xf32> -> vector<8x192xf32>
    %54 = arith.subf %53, %50 : vector<8x192xf32>
    %55 = tpu.concatenate %41, %46, %48, %50, %52, %54 in 0 : vector<8x192xf32>, vector<8x192xf32>, vector<8x192xf32>, vector<8x192xf32>, vector<8x192xf32>, vector<8x192xf32> -> vector<48x192xf32>
    %cst_31 = arith.constant dense<0.000000e+00> : vector<8x192xf32>
    %56 = tpu.matmul %42, %55, %cst_31 {dimension_numbers = #tpu.dot_dimension_numbers<[1], [0], [0], [1], [0, 0, 1, 1], [], []>} : vector<8x48xf32>, vector<48x192xf32>, vector<8x192xf32> -> vector<8x192xf32>
    %57 = vector.broadcast %43 : vector<8x1xf32> to vector<8x192xf32>
    %58 = arith.addf %56, %57 : vector<8x192xf32>
    %cst_32 = arith.constant dense<0.000000e+00> : vector<8xf32>
    %59 = vector.multi_reduction <add>, %58, %cst_32 [1] : vector<8x192xf32> to vector<8xf32>
    %60 = vector.shape_cast %59 : vector<8xf32> to vector<8x1xf32>
    %cst_33 = arith.constant 0.00520833349 : f32
    %61 = vector.broadcast %cst_33 : f32 to vector<8x1xf32>
    %62 = arith.mulf %60, %61 : vector<8x1xf32>
    %63 = arith.mulf %58, %58 : vector<8x192xf32>
    %cst_34 = arith.constant dense<0.000000e+00> : vector<8xf32>
    %64 = vector.multi_reduction <add>, %63, %cst_34 [1] : vector<8x192xf32> to vector<8xf32>
    %65 = vector.shape_cast %64 : vector<8xf32> to vector<8x1xf32>
    %cst_35 = arith.constant 0.00520833349 : f32
    %66 = vector.broadcast %cst_35 : f32 to vector<8x1xf32>
    %67 = arith.mulf %65, %66 : vector<8x1xf32>
    %68 = arith.mulf %62, %62 : vector<8x1xf32>
    %69 = arith.subf %67, %68 : vector<8x1xf32>
    %cst_36 = arith.constant 0.000000e+00 : f32
    %70 = vector.broadcast %cst_36 : f32 to vector<8x1xf32>
    %71 = arith.maximumf %69, %70 : vector<8x1xf32>
    %72 = vector.broadcast %62 : vector<8x1xf32> to vector<8x192xf32>
    %73 = arith.subf %58, %72 : vector<8x192xf32>
    %cst_37 = arith.constant 9.99999974E-6 : f32
    %74 = vector.broadcast %cst_37 : f32 to vector<8x1xf32>
    %75 = arith.addf %71, %74 : vector<8x1xf32>
    %76 = math.rsqrt %75 : vector<8x1xf32>
    %77 = vector.broadcast %76 : vector<8x1xf32> to vector<8x192xf32>
    %78 = arith.mulf %73, %77 : vector<8x192xf32>
    %cst_38 = arith.constant 0.000000e+00 : f32
    %79 = vector.broadcast %cst_38 : f32 to vector<8x192xf32>
    %80 = arith.maximumf %78, %79 : vector<8x192xf32>
    %c0_39 = arith.constant 0 : index
    %c0_40 = arith.constant 0 : index
    %c0_41 = arith.constant 0 : index
    %81 = vector.load %arg7[%c0_39, %c0_40, %c0_41] : memref<1x8x192xf32, #tpu.memory_space<vmem>>, vector<1x8x192xf32>
    %82 = vector.shape_cast %81 : vector<1x8x192xf32> to vector<8x192xf32>
    %83 = vector.shape_cast %80 : vector<8x192xf32> to vector<1x8x192xf32>
    tpu.vector_store %arg7[%c0_39, %c0_40, %c0_41], %83 {strides = array<i32>} : memref<1x8x192xf32, #tpu.memory_space<vmem>>, vector<1x8x192xf32>,
    return
  }
  func.func @transform_0(%arg0: i32) -> (i32, i32, i32) {
    %c0_i32 = arith.constant 0 : i32
    %c0_i32_0 = arith.constant 0 : i32
    %c0_i32_1 = arith.constant 0 : i32
    return %arg0, %c0_i32, %c0_i32_0 : i32, i32, i32
  }
  func.func @transform_1(%arg0: i32) -> (i32, i32) {
    %c0_i32 = arith.constant 0 : i32
    %c0_i32_0 = arith.constant 0 : i32
    %c0_i32_1 = arith.constant 0 : i32
    return %c0_i32, %c0_i32_0 : i32, i32
  }
  func.func @transform_2(%arg0: i32) -> (i32, i32) {
    %c0_i32 = arith.constant 0 : i32
    %c0_i32_0 = arith.constant 0 : i32
    %c0_i32_1 = arith.constant 0 : i32
    return %c0_i32, %c0_i32_0 : i32, i32
  }
  func.func @transform_3(%arg0: i32) -> (i32, i32) {
    %c0_i32 = arith.constant 0 : i32
    %c0_i32_0 = arith.constant 0 : i32
    %c0_i32_1 = arith.constant 0 : i32
    return %c0_i32, %c0_i32_0 : i32, i32
  }
  func.func @transform_4(%arg0: i32) -> (i32, i32) {
    %c0_i32 = arith.constant 0 : i32
    %c0_i32_0 = arith.constant 0 : i32
    %c0_i32_1 = arith.constant 0 : i32
    return %c0_i32, %c0_i32_0 : i32, i32
  }
  func.func @transform_5(%arg0: i32) -> (i32, i32) {
    %c0_i32 = arith.constant 0 : i32
    %c0_i32_0 = arith.constant 0 : i32
    %c0_i32_1 = arith.constant 0 : i32
    return %c0_i32, %c0_i32_0 : i32, i32
  }
  func.func @transform_6(%arg0: i32) -> (i32, i32, i32) {
    %c0_i32 = arith.constant 0 : i32
    %c0_i32_0 = arith.constant 0 : i32
    %c0_i32_1 = arith.constant 0 : i32
    return %arg0, %c0_i32, %c0_i32_0 : i32, i32, i32
  }
}

module attributes {stable_mosaic.version = 11 : i64} {
  func.func @_cheb_block_kernel(%arg0: i32, %arg1: memref<1x8x48xf32, #tpu.memory_space<vmem>>, %arg2: memref<48x48xf32, #tpu.memory_space<vmem>>, %arg3: memref<16x48xf32, #tpu.memory_space<vmem>>, %arg4: memref<16x1xf32, #tpu.memory_space<vmem>>, %arg5: memref<16x96xf32, #tpu.memory_space<vmem>>, %arg6: memref<16x1xf32, #tpu.memory_space<vmem>>, %arg7: memref<1x16x48xf32, #tpu.memory_space<vmem>>) attributes {dimension_semantics = [#tpu.dimension_semantics<parallel>], iteration_bounds = array<i64: 2>, scalar_prefetch = 0 : i64, scratch_operands = 0 : i64, tpu.core_type = #tpu.core_type<tc>, window_params = [{transform_indices = @transform_0, window_bounds = array<i64: 1, 8, 48>}, {pipeline_mode = #tpu.pipeline_mode<synchronous>, transform_indices = @transform_1, window_bounds = array<i64: 48, 48>}, {pipeline_mode = #tpu.pipeline_mode<synchronous>, transform_indices = @transform_2, window_bounds = array<i64: 16, 48>}, {pipeline_mode = #tpu.pipeline_mode<synchronous>, transform_indices = @transform_3, window_bounds = array<i64: 16, 1>}, {pipeline_mode = #tpu.pipeline_mode<synchronous>, transform_indices = @transform_4, window_bounds = array<i64: 16, 96>}, {pipeline_mode = #tpu.pipeline_mode<synchronous>, transform_indices = @transform_5, window_bounds = array<i64: 16, 1>}, {transform_indices = @transform_6, window_bounds = array<i64: 1, 16, 48>}]} {
    %c0 = arith.constant 0 : index
    %c0_0 = arith.constant 0 : index
    %0 = vector.load %arg2[%c0, %c0_0] : memref<48x48xf32, #tpu.memory_space<vmem>>, vector<48x48xf32>
    %c0_1 = arith.constant 0 : index
    %c0_2 = arith.constant 0 : index
    %c0_3 = arith.constant 0 : index
    %1 = vector.load %arg1[%c0_1, %c0_2, %c0_3] : memref<1x8x48xf32, #tpu.memory_space<vmem>>, vector<1x8x48xf32>
    %2 = vector.shape_cast %1 : vector<1x8x48xf32> to vector<8x48xf32>
    %c0_4 = arith.constant 0 : index
    %c0_5 = arith.constant 0 : index
    %3 = vector.load %arg3[%c0_4, %c0_5] : memref<16x48xf32, #tpu.memory_space<vmem>>, vector<16x48xf32>
    %c0_6 = arith.constant 0 : index
    %c0_7 = arith.constant 0 : index
    %4 = vector.load %arg4[%c0_6, %c0_7] : memref<16x1xf32, #tpu.memory_space<vmem>>, vector<16x1xf32>
    %cst = arith.constant dense<0.000000e+00> : vector<8x48xf32>
    %5 = tpu.matmul %2, %0, %cst {dimension_numbers = #tpu.dot_dimension_numbers<[1], [0], [0], [1], [0, 0, 1, 1], [], []>} : vector<8x48xf32>, vector<48x48xf32>, vector<8x48xf32> -> vector<8x48xf32>
    %cst_8 = arith.constant 5.000000e-01 : f32
    %6 = vector.broadcast %cst_8 : f32 to vector<8x48xf32>
    %7 = arith.mulf %6, %5 : vector<8x48xf32>
    %cst_9 = arith.constant dense<0.000000e+00> : vector<8x48xf32>
    %8 = tpu.matmul %7, %0, %cst_9 {dimension_numbers = #tpu.dot_dimension_numbers<[1], [0], [0], [1], [0, 0, 1, 1], [], []>} : vector<8x48xf32>, vector<48x48xf32>, vector<8x48xf32> -> vector<8x48xf32>
    %9 = arith.subf %8, %2 : vector<8x48xf32>
    %cst_10 = arith.constant dense<0.000000e+00> : vector<8x48xf32>
    %10 = tpu.matmul %9, %0, %cst_10 {dimension_numbers = #tpu.dot_dimension_numbers<[1], [0], [0], [1], [0, 0, 1, 1], [], []>} : vector<8x48xf32>, vector<48x48xf32>, vector<8x48xf32> -> vector<8x48xf32>
    %11 = arith.subf %10, %7 : vector<8x48xf32>
    %cst_11 = arith.constant dense<0.000000e+00> : vector<8x48xf32>
    %12 = tpu.matmul %11, %0, %cst_11 {dimension_numbers = #tpu.dot_dimension_numbers<[1], [0], [0], [1], [0, 0, 1, 1], [], []>} : vector<8x48xf32>, vector<48x48xf32>, vector<8x48xf32> -> vector<8x48xf32>
    %13 = arith.subf %12, %9 : vector<8x48xf32>
    %cst_12 = arith.constant dense<0.000000e+00> : vector<8x48xf32>
    %14 = tpu.matmul %13, %0, %cst_12 {dimension_numbers = #tpu.dot_dimension_numbers<[1], [0], [0], [1], [0, 0, 1, 1], [], []>} : vector<8x48xf32>, vector<48x48xf32>, vector<8x48xf32> -> vector<8x48xf32>
    %15 = arith.subf %14, %11 : vector<8x48xf32>
    %16 = tpu.concatenate %2, %7, %9, %11, %13, %15 in 0 : vector<8x48xf32>, vector<8x48xf32>, vector<8x48xf32>, vector<8x48xf32>, vector<8x48xf32>, vector<8x48xf32> -> vector<48x48xf32>
    %cst_13 = arith.constant dense<0.000000e+00> : vector<16x48xf32>
    %17 = tpu.matmul %3, %16, %cst_13 {dimension_numbers = #tpu.dot_dimension_numbers<[1], [0], [0], [1], [0, 0, 1, 1], [], []>} : vector<16x48xf32>, vector<48x48xf32>, vector<16x48xf32> -> vector<16x48xf32>
    %18 = vector.broadcast %4 : vector<16x1xf32> to vector<16x48xf32>
    %19 = arith.addf %17, %18 : vector<16x48xf32>
    %cst_14 = arith.constant dense<0.000000e+00> : vector<16xf32>
    %20 = vector.multi_reduction <add>, %19, %cst_14 [1] : vector<16x48xf32> to vector<16xf32>
    %21 = vector.shape_cast %20 : vector<16xf32> to vector<16x1xf32>
    %cst_15 = arith.constant 0.020833334 : f32
    %22 = vector.broadcast %cst_15 : f32 to vector<16x1xf32>
    %23 = arith.mulf %21, %22 : vector<16x1xf32>
    %24 = arith.mulf %19, %19 : vector<16x48xf32>
    %cst_16 = arith.constant dense<0.000000e+00> : vector<16xf32>
    %25 = vector.multi_reduction <add>, %24, %cst_16 [1] : vector<16x48xf32> to vector<16xf32>
    %26 = vector.shape_cast %25 : vector<16xf32> to vector<16x1xf32>
    %cst_17 = arith.constant 0.020833334 : f32
    %27 = vector.broadcast %cst_17 : f32 to vector<16x1xf32>
    %28 = arith.mulf %26, %27 : vector<16x1xf32>
    %29 = arith.mulf %23, %23 : vector<16x1xf32>
    %30 = arith.subf %28, %29 : vector<16x1xf32>
    %cst_18 = arith.constant 0.000000e+00 : f32
    %31 = vector.broadcast %cst_18 : f32 to vector<16x1xf32>
    %32 = arith.maximumf %30, %31 : vector<16x1xf32>
    %33 = vector.broadcast %23 : vector<16x1xf32> to vector<16x48xf32>
    %34 = arith.subf %19, %33 : vector<16x48xf32>
    %cst_19 = arith.constant 9.99999974E-6 : f32
    %35 = vector.broadcast %cst_19 : f32 to vector<16x1xf32>
    %36 = arith.addf %32, %35 : vector<16x1xf32>
    %37 = math.rsqrt %36 : vector<16x1xf32>
    %38 = vector.broadcast %37 : vector<16x1xf32> to vector<16x48xf32>
    %39 = arith.mulf %34, %38 : vector<16x48xf32>
    %cst_20 = arith.constant 0.000000e+00 : f32
    %40 = vector.broadcast %cst_20 : f32 to vector<16x48xf32>
    %41 = arith.maximumf %39, %40 : vector<16x48xf32>
    %c0_21 = arith.constant 0 : index
    %c0_22 = arith.constant 0 : index
    %42 = vector.load %arg5[%c0_21, %c0_22] : memref<16x96xf32, #tpu.memory_space<vmem>>, vector<16x96xf32>
    %c0_23 = arith.constant 0 : index
    %c0_24 = arith.constant 0 : index
    %43 = vector.load %arg6[%c0_23, %c0_24] : memref<16x1xf32, #tpu.memory_space<vmem>>, vector<16x1xf32>
    %cst_25 = arith.constant dense<0.000000e+00> : vector<16x48xf32>
    %44 = tpu.matmul %41, %0, %cst_25 {dimension_numbers = #tpu.dot_dimension_numbers<[1], [0], [0], [1], [0, 0, 1, 1], [], []>} : vector<16x48xf32>, vector<48x48xf32>, vector<16x48xf32> -> vector<16x48xf32>
    %cst_26 = arith.constant 5.000000e-01 : f32
    %45 = vector.broadcast %cst_26 : f32 to vector<16x48xf32>
    %46 = arith.mulf %45, %44 : vector<16x48xf32>
    %cst_27 = arith.constant dense<0.000000e+00> : vector<16x48xf32>
    %47 = tpu.matmul %46, %0, %cst_27 {dimension_numbers = #tpu.dot_dimension_numbers<[1], [0], [0], [1], [0, 0, 1, 1], [], []>} : vector<16x48xf32>, vector<48x48xf32>, vector<16x48xf32> -> vector<16x48xf32>
    %48 = arith.subf %47, %41 : vector<16x48xf32>
    %cst_28 = arith.constant dense<0.000000e+00> : vector<16x48xf32>
    %49 = tpu.matmul %48, %0, %cst_28 {dimension_numbers = #tpu.dot_dimension_numbers<[1], [0], [0], [1], [0, 0, 1, 1], [], []>} : vector<16x48xf32>, vector<48x48xf32>, vector<16x48xf32> -> vector<16x48xf32>
    %50 = arith.subf %49, %46 : vector<16x48xf32>
    %cst_29 = arith.constant dense<0.000000e+00> : vector<16x48xf32>
    %51 = tpu.matmul %50, %0, %cst_29 {dimension_numbers = #tpu.dot_dimension_numbers<[1], [0], [0], [1], [0, 0, 1, 1], [], []>} : vector<16x48xf32>, vector<48x48xf32>, vector<16x48xf32> -> vector<16x48xf32>
    %52 = arith.subf %51, %48 : vector<16x48xf32>
    %cst_30 = arith.constant dense<0.000000e+00> : vector<16x48xf32>
    %53 = tpu.matmul %52, %0, %cst_30 {dimension_numbers = #tpu.dot_dimension_numbers<[1], [0], [0], [1], [0, 0, 1, 1], [], []>} : vector<16x48xf32>, vector<48x48xf32>, vector<16x48xf32> -> vector<16x48xf32>
    %54 = arith.subf %53, %50 : vector<16x48xf32>
    %55 = tpu.concatenate %41, %46, %48, %50, %52, %54 in 0 : vector<16x48xf32>, vector<16x48xf32>, vector<16x48xf32>, vector<16x48xf32>, vector<16x48xf32>, vector<16x48xf32> -> vector<96x48xf32>
    %cst_31 = arith.constant dense<0.000000e+00> : vector<16x48xf32>
    %56 = tpu.matmul %42, %55, %cst_31 {dimension_numbers = #tpu.dot_dimension_numbers<[1], [0], [0], [1], [0, 0, 1, 1], [], []>} : vector<16x96xf32>, vector<96x48xf32>, vector<16x48xf32> -> vector<16x48xf32>
    %57 = vector.broadcast %43 : vector<16x1xf32> to vector<16x48xf32>
    %58 = arith.addf %56, %57 : vector<16x48xf32>
    %cst_32 = arith.constant dense<0.000000e+00> : vector<16xf32>
    %59 = vector.multi_reduction <add>, %58, %cst_32 [1] : vector<16x48xf32> to vector<16xf32>
    %60 = vector.shape_cast %59 : vector<16xf32> to vector<16x1xf32>
    %cst_33 = arith.constant 0.020833334 : f32
    %61 = vector.broadcast %cst_33 : f32 to vector<16x1xf32>
    %62 = arith.mulf %60, %61 : vector<16x1xf32>
    %63 = arith.mulf %58, %58 : vector<16x48xf32>
    %cst_34 = arith.constant dense<0.000000e+00> : vector<16xf32>
    %64 = vector.multi_reduction <add>, %63, %cst_34 [1] : vector<16x48xf32> to vector<16xf32>
    %65 = vector.shape_cast %64 : vector<16xf32> to vector<16x1xf32>
    %cst_35 = arith.constant 0.020833334 : f32
    %66 = vector.broadcast %cst_35 : f32 to vector<16x1xf32>
    %67 = arith.mulf %65, %66 : vector<16x1xf32>
    %68 = arith.mulf %62, %62 : vector<16x1xf32>
    %69 = arith.subf %67, %68 : vector<16x1xf32>
    %cst_36 = arith.constant 0.000000e+00 : f32
    %70 = vector.broadcast %cst_36 : f32 to vector<16x1xf32>
    %71 = arith.maximumf %69, %70 : vector<16x1xf32>
    %72 = vector.broadcast %62 : vector<16x1xf32> to vector<16x48xf32>
    %73 = arith.subf %58, %72 : vector<16x48xf32>
    %cst_37 = arith.constant 9.99999974E-6 : f32
    %74 = vector.broadcast %cst_37 : f32 to vector<16x1xf32>
    %75 = arith.addf %71, %74 : vector<16x1xf32>
    %76 = math.rsqrt %75 : vector<16x1xf32>
    %77 = vector.broadcast %76 : vector<16x1xf32> to vector<16x48xf32>
    %78 = arith.mulf %73, %77 : vector<16x48xf32>
    %cst_38 = arith.constant 0.000000e+00 : f32
    %79 = vector.broadcast %cst_38 : f32 to vector<16x48xf32>
    %80 = arith.maximumf %78, %79 : vector<16x48xf32>
    %c0_39 = arith.constant 0 : index
    %c0_40 = arith.constant 0 : index
    %c0_41 = arith.constant 0 : index
    %81 = vector.load %arg7[%c0_39, %c0_40, %c0_41] : memref<1x16x48xf32, #tpu.memory_space<vmem>>, vector<1x16x48xf32>
    %82 = vector.shape_cast %81 : vector<1x16x48xf32> to vector<16x48xf32>
    %83 = vector.shape_cast %80 : vector<16x48xf32> to vector<1x16x48xf32>
    tpu.vector_store %arg7[%c0_39, %c0_40, %c0_41], %83 {strides = array<i32>} : memref<1x16x48xf32, #tpu.memory_space<vmem>>, vector<1x16x48xf32>,
    return
  }
  func.func @transform_0(%arg0: i32) -> (i32, i32, i32) {
    %c0_i32 = arith.constant 0 : i32
    %c0_i32_0 = arith.constant 0 : i32
    %c0_i32_1 = arith.constant 0 : i32
    return %arg0, %c0_i32, %c0_i32_0 : i32, i32, i32
  }
  func.func @transform_1(%arg0: i32) -> (i32, i32) {
    %c0_i32 = arith.constant 0 : i32
    %c0_i32_0 = arith.constant 0 : i32
    %c0_i32_1 = arith.constant 0 : i32
    return %c0_i32, %c0_i32_0 : i32, i32
  }
  func.func @transform_2(%arg0: i32) -> (i32, i32) {
    %c0_i32 = arith.constant 0 : i32
    %c0_i32_0 = arith.constant 0 : i32
    %c0_i32_1 = arith.constant 0 : i32
    return %c0_i32, %c0_i32_0 : i32, i32
  }
  func.func @transform_3(%arg0: i32) -> (i32, i32) {
    %c0_i32 = arith.constant 0 : i32
    %c0_i32_0 = arith.constant 0 : i32
    %c0_i32_1 = arith.constant 0 : i32
    return %c0_i32, %c0_i32_0 : i32, i32
  }
  func.func @transform_4(%arg0: i32) -> (i32, i32) {
    %c0_i32 = arith.constant 0 : i32
    %c0_i32_0 = arith.constant 0 : i32
    %c0_i32_1 = arith.constant 0 : i32
    return %c0_i32, %c0_i32_0 : i32, i32
  }
  func.func @transform_5(%arg0: i32) -> (i32, i32) {
    %c0_i32 = arith.constant 0 : i32
    %c0_i32_0 = arith.constant 0 : i32
    %c0_i32_1 = arith.constant 0 : i32
    return %c0_i32, %c0_i32_0 : i32, i32
  }
  func.func @transform_6(%arg0: i32) -> (i32, i32, i32) {
    %c0_i32 = arith.constant 0 : i32
    %c0_i32_0 = arith.constant 0 : i32
    %c0_i32_1 = arith.constant 0 : i32
    return %arg0, %c0_i32, %c0_i32_0 : i32, i32, i32
  }
}

module attributes {stable_mosaic.version = 11 : i64} {
  func.func @_cheb_block_kernel(%arg0: i32, %arg1: memref<1x16x12xf32, #tpu.memory_space<vmem>>, %arg2: memref<12x12xf32, #tpu.memory_space<vmem>>, %arg3: memref<32x96xf32, #tpu.memory_space<vmem>>, %arg4: memref<32x1xf32, #tpu.memory_space<vmem>>, %arg5: memref<16x192xf32, #tpu.memory_space<vmem>>, %arg6: memref<16x1xf32, #tpu.memory_space<vmem>>, %arg7: memref<1x16x12xf32, #tpu.memory_space<vmem>>) attributes {dimension_semantics = [#tpu.dimension_semantics<parallel>], iteration_bounds = array<i64: 2>, scalar_prefetch = 0 : i64, scratch_operands = 0 : i64, tpu.core_type = #tpu.core_type<tc>, window_params = [{transform_indices = @transform_0, window_bounds = array<i64: 1, 16, 12>}, {pipeline_mode = #tpu.pipeline_mode<synchronous>, transform_indices = @transform_1, window_bounds = array<i64: 12, 12>}, {pipeline_mode = #tpu.pipeline_mode<synchronous>, transform_indices = @transform_2, window_bounds = array<i64: 32, 96>}, {pipeline_mode = #tpu.pipeline_mode<synchronous>, transform_indices = @transform_3, window_bounds = array<i64: 32, 1>}, {pipeline_mode = #tpu.pipeline_mode<synchronous>, transform_indices = @transform_4, window_bounds = array<i64: 16, 192>}, {pipeline_mode = #tpu.pipeline_mode<synchronous>, transform_indices = @transform_5, window_bounds = array<i64: 16, 1>}, {transform_indices = @transform_6, window_bounds = array<i64: 1, 16, 12>}]} {
    %c0 = arith.constant 0 : index
    %c0_0 = arith.constant 0 : index
    %0 = vector.load %arg2[%c0, %c0_0] : memref<12x12xf32, #tpu.memory_space<vmem>>, vector<12x12xf32>
    %c0_1 = arith.constant 0 : index
    %c0_2 = arith.constant 0 : index
    %c0_3 = arith.constant 0 : index
    %1 = vector.load %arg1[%c0_1, %c0_2, %c0_3] : memref<1x16x12xf32, #tpu.memory_space<vmem>>, vector<1x16x12xf32>
    %2 = vector.shape_cast %1 : vector<1x16x12xf32> to vector<16x12xf32>
    %c0_4 = arith.constant 0 : index
    %c0_5 = arith.constant 0 : index
    %3 = vector.load %arg3[%c0_4, %c0_5] : memref<32x96xf32, #tpu.memory_space<vmem>>, vector<32x96xf32>
    %c0_6 = arith.constant 0 : index
    %c0_7 = arith.constant 0 : index
    %4 = vector.load %arg4[%c0_6, %c0_7] : memref<32x1xf32, #tpu.memory_space<vmem>>, vector<32x1xf32>
    %cst = arith.constant dense<0.000000e+00> : vector<16x12xf32>
    %5 = tpu.matmul %2, %0, %cst {dimension_numbers = #tpu.dot_dimension_numbers<[1], [0], [0], [1], [0, 0, 1, 1], [], []>} : vector<16x12xf32>, vector<12x12xf32>, vector<16x12xf32> -> vector<16x12xf32>
    %cst_8 = arith.constant 5.000000e-01 : f32
    %6 = vector.broadcast %cst_8 : f32 to vector<16x12xf32>
    %7 = arith.mulf %6, %5 : vector<16x12xf32>
    %cst_9 = arith.constant dense<0.000000e+00> : vector<16x12xf32>
    %8 = tpu.matmul %7, %0, %cst_9 {dimension_numbers = #tpu.dot_dimension_numbers<[1], [0], [0], [1], [0, 0, 1, 1], [], []>} : vector<16x12xf32>, vector<12x12xf32>, vector<16x12xf32> -> vector<16x12xf32>
    %9 = arith.subf %8, %2 : vector<16x12xf32>
    %cst_10 = arith.constant dense<0.000000e+00> : vector<16x12xf32>
    %10 = tpu.matmul %9, %0, %cst_10 {dimension_numbers = #tpu.dot_dimension_numbers<[1], [0], [0], [1], [0, 0, 1, 1], [], []>} : vector<16x12xf32>, vector<12x12xf32>, vector<16x12xf32> -> vector<16x12xf32>
    %11 = arith.subf %10, %7 : vector<16x12xf32>
    %cst_11 = arith.constant dense<0.000000e+00> : vector<16x12xf32>
    %12 = tpu.matmul %11, %0, %cst_11 {dimension_numbers = #tpu.dot_dimension_numbers<[1], [0], [0], [1], [0, 0, 1, 1], [], []>} : vector<16x12xf32>, vector<12x12xf32>, vector<16x12xf32> -> vector<16x12xf32>
    %13 = arith.subf %12, %9 : vector<16x12xf32>
    %cst_12 = arith.constant dense<0.000000e+00> : vector<16x12xf32>
    %14 = tpu.matmul %13, %0, %cst_12 {dimension_numbers = #tpu.dot_dimension_numbers<[1], [0], [0], [1], [0, 0, 1, 1], [], []>} : vector<16x12xf32>, vector<12x12xf32>, vector<16x12xf32> -> vector<16x12xf32>
    %15 = arith.subf %14, %11 : vector<16x12xf32>
    %16 = tpu.concatenate %2, %7, %9, %11, %13, %15 in 0 : vector<16x12xf32>, vector<16x12xf32>, vector<16x12xf32>, vector<16x12xf32>, vector<16x12xf32>, vector<16x12xf32> -> vector<96x12xf32>
    %cst_13 = arith.constant dense<0.000000e+00> : vector<32x12xf32>
    %17 = tpu.matmul %3, %16, %cst_13 {dimension_numbers = #tpu.dot_dimension_numbers<[1], [0], [0], [1], [0, 0, 1, 1], [], []>} : vector<32x96xf32>, vector<96x12xf32>, vector<32x12xf32> -> vector<32x12xf32>
    %18 = vector.broadcast %4 : vector<32x1xf32> to vector<32x12xf32>
    %19 = arith.addf %17, %18 : vector<32x12xf32>
    %cst_14 = arith.constant dense<0.000000e+00> : vector<32xf32>
    %20 = vector.multi_reduction <add>, %19, %cst_14 [1] : vector<32x12xf32> to vector<32xf32>
    %21 = vector.shape_cast %20 : vector<32xf32> to vector<32x1xf32>
    %cst_15 = arith.constant 0.0833333358 : f32
    %22 = vector.broadcast %cst_15 : f32 to vector<32x1xf32>
    %23 = arith.mulf %21, %22 : vector<32x1xf32>
    %24 = arith.mulf %19, %19 : vector<32x12xf32>
    %cst_16 = arith.constant dense<0.000000e+00> : vector<32xf32>
    %25 = vector.multi_reduction <add>, %24, %cst_16 [1] : vector<32x12xf32> to vector<32xf32>
    %26 = vector.shape_cast %25 : vector<32xf32> to vector<32x1xf32>
    %cst_17 = arith.constant 0.0833333358 : f32
    %27 = vector.broadcast %cst_17 : f32 to vector<32x1xf32>
    %28 = arith.mulf %26, %27 : vector<32x1xf32>
    %29 = arith.mulf %23, %23 : vector<32x1xf32>
    %30 = arith.subf %28, %29 : vector<32x1xf32>
    %cst_18 = arith.constant 0.000000e+00 : f32
    %31 = vector.broadcast %cst_18 : f32 to vector<32x1xf32>
    %32 = arith.maximumf %30, %31 : vector<32x1xf32>
    %33 = vector.broadcast %23 : vector<32x1xf32> to vector<32x12xf32>
    %34 = arith.subf %19, %33 : vector<32x12xf32>
    %cst_19 = arith.constant 9.99999974E-6 : f32
    %35 = vector.broadcast %cst_19 : f32 to vector<32x1xf32>
    %36 = arith.addf %32, %35 : vector<32x1xf32>
    %37 = math.rsqrt %36 : vector<32x1xf32>
    %38 = vector.broadcast %37 : vector<32x1xf32> to vector<32x12xf32>
    %39 = arith.mulf %34, %38 : vector<32x12xf32>
    %cst_20 = arith.constant 0.000000e+00 : f32
    %40 = vector.broadcast %cst_20 : f32 to vector<32x12xf32>
    %41 = arith.maximumf %39, %40 : vector<32x12xf32>
    %c0_21 = arith.constant 0 : index
    %c0_22 = arith.constant 0 : index
    %42 = vector.load %arg5[%c0_21, %c0_22] : memref<16x192xf32, #tpu.memory_space<vmem>>, vector<16x192xf32>
    %c0_23 = arith.constant 0 : index
    %c0_24 = arith.constant 0 : index
    %43 = vector.load %arg6[%c0_23, %c0_24] : memref<16x1xf32, #tpu.memory_space<vmem>>, vector<16x1xf32>
    %cst_25 = arith.constant dense<0.000000e+00> : vector<32x12xf32>
    %44 = tpu.matmul %41, %0, %cst_25 {dimension_numbers = #tpu.dot_dimension_numbers<[1], [0], [0], [1], [0, 0, 1, 1], [], []>} : vector<32x12xf32>, vector<12x12xf32>, vector<32x12xf32> -> vector<32x12xf32>
    %cst_26 = arith.constant 5.000000e-01 : f32
    %45 = vector.broadcast %cst_26 : f32 to vector<32x12xf32>
    %46 = arith.mulf %45, %44 : vector<32x12xf32>
    %cst_27 = arith.constant dense<0.000000e+00> : vector<32x12xf32>
    %47 = tpu.matmul %46, %0, %cst_27 {dimension_numbers = #tpu.dot_dimension_numbers<[1], [0], [0], [1], [0, 0, 1, 1], [], []>} : vector<32x12xf32>, vector<12x12xf32>, vector<32x12xf32> -> vector<32x12xf32>
    %48 = arith.subf %47, %41 : vector<32x12xf32>
    %cst_28 = arith.constant dense<0.000000e+00> : vector<32x12xf32>
    %49 = tpu.matmul %48, %0, %cst_28 {dimension_numbers = #tpu.dot_dimension_numbers<[1], [0], [0], [1], [0, 0, 1, 1], [], []>} : vector<32x12xf32>, vector<12x12xf32>, vector<32x12xf32> -> vector<32x12xf32>
    %50 = arith.subf %49, %46 : vector<32x12xf32>
    %cst_29 = arith.constant dense<0.000000e+00> : vector<32x12xf32>
    %51 = tpu.matmul %50, %0, %cst_29 {dimension_numbers = #tpu.dot_dimension_numbers<[1], [0], [0], [1], [0, 0, 1, 1], [], []>} : vector<32x12xf32>, vector<12x12xf32>, vector<32x12xf32> -> vector<32x12xf32>
    %52 = arith.subf %51, %48 : vector<32x12xf32>
    %cst_30 = arith.constant dense<0.000000e+00> : vector<32x12xf32>
    %53 = tpu.matmul %52, %0, %cst_30 {dimension_numbers = #tpu.dot_dimension_numbers<[1], [0], [0], [1], [0, 0, 1, 1], [], []>} : vector<32x12xf32>, vector<12x12xf32>, vector<32x12xf32> -> vector<32x12xf32>
    %54 = arith.subf %53, %50 : vector<32x12xf32>
    %55 = tpu.concatenate %41, %46, %48, %50, %52, %54 in 0 : vector<32x12xf32>, vector<32x12xf32>, vector<32x12xf32>, vector<32x12xf32>, vector<32x12xf32>, vector<32x12xf32> -> vector<192x12xf32>
    %cst_31 = arith.constant dense<0.000000e+00> : vector<16x12xf32>
    %56 = tpu.matmul %42, %55, %cst_31 {dimension_numbers = #tpu.dot_dimension_numbers<[1], [0], [0], [1], [0, 0, 1, 1], [], []>} : vector<16x192xf32>, vector<192x12xf32>, vector<16x12xf32> -> vector<16x12xf32>
    %57 = vector.broadcast %43 : vector<16x1xf32> to vector<16x12xf32>
    %58 = arith.addf %56, %57 : vector<16x12xf32>
    %cst_32 = arith.constant dense<0.000000e+00> : vector<16xf32>
    %59 = vector.multi_reduction <add>, %58, %cst_32 [1] : vector<16x12xf32> to vector<16xf32>
    %60 = vector.shape_cast %59 : vector<16xf32> to vector<16x1xf32>
    %cst_33 = arith.constant 0.0833333358 : f32
    %61 = vector.broadcast %cst_33 : f32 to vector<16x1xf32>
    %62 = arith.mulf %60, %61 : vector<16x1xf32>
    %63 = arith.mulf %58, %58 : vector<16x12xf32>
    %cst_34 = arith.constant dense<0.000000e+00> : vector<16xf32>
    %64 = vector.multi_reduction <add>, %63, %cst_34 [1] : vector<16x12xf32> to vector<16xf32>
    %65 = vector.shape_cast %64 : vector<16xf32> to vector<16x1xf32>
    %cst_35 = arith.constant 0.0833333358 : f32
    %66 = vector.broadcast %cst_35 : f32 to vector<16x1xf32>
    %67 = arith.mulf %65, %66 : vector<16x1xf32>
    %68 = arith.mulf %62, %62 : vector<16x1xf32>
    %69 = arith.subf %67, %68 : vector<16x1xf32>
    %cst_36 = arith.constant 0.000000e+00 : f32
    %70 = vector.broadcast %cst_36 : f32 to vector<16x1xf32>
    %71 = arith.maximumf %69, %70 : vector<16x1xf32>
    %72 = vector.broadcast %62 : vector<16x1xf32> to vector<16x12xf32>
    %73 = arith.subf %58, %72 : vector<16x12xf32>
    %cst_37 = arith.constant 9.99999974E-6 : f32
    %74 = vector.broadcast %cst_37 : f32 to vector<16x1xf32>
    %75 = arith.addf %71, %74 : vector<16x1xf32>
    %76 = math.rsqrt %75 : vector<16x1xf32>
    %77 = vector.broadcast %76 : vector<16x1xf32> to vector<16x12xf32>
    %78 = arith.mulf %73, %77 : vector<16x12xf32>
    %cst_38 = arith.constant 0.000000e+00 : f32
    %79 = vector.broadcast %cst_38 : f32 to vector<16x12xf32>
    %80 = arith.maximumf %78, %79 : vector<16x12xf32>
    %c0_39 = arith.constant 0 : index
    %c0_40 = arith.constant 0 : index
    %c0_41 = arith.constant 0 : index
    %81 = vector.load %arg7[%c0_39, %c0_40, %c0_41] : memref<1x16x12xf32, #tpu.memory_space<vmem>>, vector<1x16x12xf32>
    %82 = vector.shape_cast %81 : vector<1x16x12xf32> to vector<16x12xf32>
    %83 = vector.shape_cast %80 : vector<16x12xf32> to vector<1x16x12xf32>
    tpu.vector_store %arg7[%c0_39, %c0_40, %c0_41], %83 {strides = array<i32>} : memref<1x16x12xf32, #tpu.memory_space<vmem>>, vector<1x16x12xf32>,
    return
  }
  func.func @transform_0(%arg0: i32) -> (i32, i32, i32) {
    %c0_i32 = arith.constant 0 : i32
    %c0_i32_0 = arith.constant 0 : i32
    %c0_i32_1 = arith.constant 0 : i32
    return %arg0, %c0_i32, %c0_i32_0 : i32, i32, i32
  }
  func.func @transform_1(%arg0: i32) -> (i32, i32) {
    %c0_i32 = arith.constant 0 : i32
    %c0_i32_0 = arith.constant 0 : i32
    %c0_i32_1 = arith.constant 0 : i32
    return %c0_i32, %c0_i32_0 : i32, i32
  }
  func.func @transform_2(%arg0: i32) -> (i32, i32) {
    %c0_i32 = arith.constant 0 : i32
    %c0_i32_0 = arith.constant 0 : i32
    %c0_i32_1 = arith.constant 0 : i32
    return %c0_i32, %c0_i32_0 : i32, i32
  }
  func.func @transform_3(%arg0: i32) -> (i32, i32) {
    %c0_i32 = arith.constant 0 : i32
    %c0_i32_0 = arith.constant 0 : i32
    %c0_i32_1 = arith.constant 0 : i32
    return %c0_i32, %c0_i32_0 : i32, i32
  }
  func.func @transform_4(%arg0: i32) -> (i32, i32) {
    %c0_i32 = arith.constant 0 : i32
    %c0_i32_0 = arith.constant 0 : i32
    %c0_i32_1 = arith.constant 0 : i32
    return %c0_i32, %c0_i32_0 : i32, i32
  }
  func.func @transform_5(%arg0: i32) -> (i32, i32) {
    %c0_i32 = arith.constant 0 : i32
    %c0_i32_0 = arith.constant 0 : i32
    %c0_i32_1 = arith.constant 0 : i32
    return %c0_i32, %c0_i32_0 : i32, i32
  }
  func.func @transform_6(%arg0: i32) -> (i32, i32, i32) {
    %c0_i32 = arith.constant 0 : i32
    %c0_i32_0 = arith.constant 0 : i32
    %c0_i32_1 = arith.constant 0 : i32
    return %arg0, %c0_i32, %c0_i32_0 : i32, i32, i32
  }
}

module attributes {stable_mosaic.version = 11 : i64} {
  func.func @_cheb_block_kernel(%arg0: i32, %arg1: memref<1x32x48xf32, #tpu.memory_space<vmem>>, %arg2: memref<48x48xf32, #tpu.memory_space<vmem>>, %arg3: memref<16x192xf32, #tpu.memory_space<vmem>>, %arg4: memref<16x1xf32, #tpu.memory_space<vmem>>, %arg5: memref<8x96xf32, #tpu.memory_space<vmem>>, %arg6: memref<8x1xf32, #tpu.memory_space<vmem>>, %arg7: memref<1x8x48xf32, #tpu.memory_space<vmem>>) attributes {dimension_semantics = [#tpu.dimension_semantics<parallel>], iteration_bounds = array<i64: 2>, scalar_prefetch = 0 : i64, scratch_operands = 0 : i64, tpu.core_type = #tpu.core_type<tc>, window_params = [{transform_indices = @transform_0, window_bounds = array<i64: 1, 32, 48>}, {pipeline_mode = #tpu.pipeline_mode<synchronous>, transform_indices = @transform_1, window_bounds = array<i64: 48, 48>}, {pipeline_mode = #tpu.pipeline_mode<synchronous>, transform_indices = @transform_2, window_bounds = array<i64: 16, 192>}, {pipeline_mode = #tpu.pipeline_mode<synchronous>, transform_indices = @transform_3, window_bounds = array<i64: 16, 1>}, {pipeline_mode = #tpu.pipeline_mode<synchronous>, transform_indices = @transform_4, window_bounds = array<i64: 8, 96>}, {pipeline_mode = #tpu.pipeline_mode<synchronous>, transform_indices = @transform_5, window_bounds = array<i64: 8, 1>}, {transform_indices = @transform_6, window_bounds = array<i64: 1, 8, 48>}]} {
    %c0 = arith.constant 0 : index
    %c0_0 = arith.constant 0 : index
    %0 = vector.load %arg2[%c0, %c0_0] : memref<48x48xf32, #tpu.memory_space<vmem>>, vector<48x48xf32>
    %c0_1 = arith.constant 0 : index
    %c0_2 = arith.constant 0 : index
    %c0_3 = arith.constant 0 : index
    %1 = vector.load %arg1[%c0_1, %c0_2, %c0_3] : memref<1x32x48xf32, #tpu.memory_space<vmem>>, vector<1x32x48xf32>
    %2 = vector.shape_cast %1 : vector<1x32x48xf32> to vector<32x48xf32>
    %c0_4 = arith.constant 0 : index
    %c0_5 = arith.constant 0 : index
    %3 = vector.load %arg3[%c0_4, %c0_5] : memref<16x192xf32, #tpu.memory_space<vmem>>, vector<16x192xf32>
    %c0_6 = arith.constant 0 : index
    %c0_7 = arith.constant 0 : index
    %4 = vector.load %arg4[%c0_6, %c0_7] : memref<16x1xf32, #tpu.memory_space<vmem>>, vector<16x1xf32>
    %cst = arith.constant dense<0.000000e+00> : vector<32x48xf32>
    %5 = tpu.matmul %2, %0, %cst {dimension_numbers = #tpu.dot_dimension_numbers<[1], [0], [0], [1], [0, 0, 1, 1], [], []>} : vector<32x48xf32>, vector<48x48xf32>, vector<32x48xf32> -> vector<32x48xf32>
    %cst_8 = arith.constant 5.000000e-01 : f32
    %6 = vector.broadcast %cst_8 : f32 to vector<32x48xf32>
    %7 = arith.mulf %6, %5 : vector<32x48xf32>
    %cst_9 = arith.constant dense<0.000000e+00> : vector<32x48xf32>
    %8 = tpu.matmul %7, %0, %cst_9 {dimension_numbers = #tpu.dot_dimension_numbers<[1], [0], [0], [1], [0, 0, 1, 1], [], []>} : vector<32x48xf32>, vector<48x48xf32>, vector<32x48xf32> -> vector<32x48xf32>
    %9 = arith.subf %8, %2 : vector<32x48xf32>
    %cst_10 = arith.constant dense<0.000000e+00> : vector<32x48xf32>
    %10 = tpu.matmul %9, %0, %cst_10 {dimension_numbers = #tpu.dot_dimension_numbers<[1], [0], [0], [1], [0, 0, 1, 1], [], []>} : vector<32x48xf32>, vector<48x48xf32>, vector<32x48xf32> -> vector<32x48xf32>
    %11 = arith.subf %10, %7 : vector<32x48xf32>
    %cst_11 = arith.constant dense<0.000000e+00> : vector<32x48xf32>
    %12 = tpu.matmul %11, %0, %cst_11 {dimension_numbers = #tpu.dot_dimension_numbers<[1], [0], [0], [1], [0, 0, 1, 1], [], []>} : vector<32x48xf32>, vector<48x48xf32>, vector<32x48xf32> -> vector<32x48xf32>
    %13 = arith.subf %12, %9 : vector<32x48xf32>
    %cst_12 = arith.constant dense<0.000000e+00> : vector<32x48xf32>
    %14 = tpu.matmul %13, %0, %cst_12 {dimension_numbers = #tpu.dot_dimension_numbers<[1], [0], [0], [1], [0, 0, 1, 1], [], []>} : vector<32x48xf32>, vector<48x48xf32>, vector<32x48xf32> -> vector<32x48xf32>
    %15 = arith.subf %14, %11 : vector<32x48xf32>
    %16 = tpu.concatenate %2, %7, %9, %11, %13, %15 in 0 : vector<32x48xf32>, vector<32x48xf32>, vector<32x48xf32>, vector<32x48xf32>, vector<32x48xf32>, vector<32x48xf32> -> vector<192x48xf32>
    %cst_13 = arith.constant dense<0.000000e+00> : vector<16x48xf32>
    %17 = tpu.matmul %3, %16, %cst_13 {dimension_numbers = #tpu.dot_dimension_numbers<[1], [0], [0], [1], [0, 0, 1, 1], [], []>} : vector<16x192xf32>, vector<192x48xf32>, vector<16x48xf32> -> vector<16x48xf32>
    %18 = vector.broadcast %4 : vector<16x1xf32> to vector<16x48xf32>
    %19 = arith.addf %17, %18 : vector<16x48xf32>
    %cst_14 = arith.constant dense<0.000000e+00> : vector<16xf32>
    %20 = vector.multi_reduction <add>, %19, %cst_14 [1] : vector<16x48xf32> to vector<16xf32>
    %21 = vector.shape_cast %20 : vector<16xf32> to vector<16x1xf32>
    %cst_15 = arith.constant 0.020833334 : f32
    %22 = vector.broadcast %cst_15 : f32 to vector<16x1xf32>
    %23 = arith.mulf %21, %22 : vector<16x1xf32>
    %24 = arith.mulf %19, %19 : vector<16x48xf32>
    %cst_16 = arith.constant dense<0.000000e+00> : vector<16xf32>
    %25 = vector.multi_reduction <add>, %24, %cst_16 [1] : vector<16x48xf32> to vector<16xf32>
    %26 = vector.shape_cast %25 : vector<16xf32> to vector<16x1xf32>
    %cst_17 = arith.constant 0.020833334 : f32
    %27 = vector.broadcast %cst_17 : f32 to vector<16x1xf32>
    %28 = arith.mulf %26, %27 : vector<16x1xf32>
    %29 = arith.mulf %23, %23 : vector<16x1xf32>
    %30 = arith.subf %28, %29 : vector<16x1xf32>
    %cst_18 = arith.constant 0.000000e+00 : f32
    %31 = vector.broadcast %cst_18 : f32 to vector<16x1xf32>
    %32 = arith.maximumf %30, %31 : vector<16x1xf32>
    %33 = vector.broadcast %23 : vector<16x1xf32> to vector<16x48xf32>
    %34 = arith.subf %19, %33 : vector<16x48xf32>
    %cst_19 = arith.constant 9.99999974E-6 : f32
    %35 = vector.broadcast %cst_19 : f32 to vector<16x1xf32>
    %36 = arith.addf %32, %35 : vector<16x1xf32>
    %37 = math.rsqrt %36 : vector<16x1xf32>
    %38 = vector.broadcast %37 : vector<16x1xf32> to vector<16x48xf32>
    %39 = arith.mulf %34, %38 : vector<16x48xf32>
    %cst_20 = arith.constant 0.000000e+00 : f32
    %40 = vector.broadcast %cst_20 : f32 to vector<16x48xf32>
    %41 = arith.maximumf %39, %40 : vector<16x48xf32>
    %c0_21 = arith.constant 0 : index
    %c0_22 = arith.constant 0 : index
    %42 = vector.load %arg5[%c0_21, %c0_22] : memref<8x96xf32, #tpu.memory_space<vmem>>, vector<8x96xf32>
    %c0_23 = arith.constant 0 : index
    %c0_24 = arith.constant 0 : index
    %43 = vector.load %arg6[%c0_23, %c0_24] : memref<8x1xf32, #tpu.memory_space<vmem>>, vector<8x1xf32>
    %cst_25 = arith.constant dense<0.000000e+00> : vector<16x48xf32>
    %44 = tpu.matmul %41, %0, %cst_25 {dimension_numbers = #tpu.dot_dimension_numbers<[1], [0], [0], [1], [0, 0, 1, 1], [], []>} : vector<16x48xf32>, vector<48x48xf32>, vector<16x48xf32> -> vector<16x48xf32>
    %cst_26 = arith.constant 5.000000e-01 : f32
    %45 = vector.broadcast %cst_26 : f32 to vector<16x48xf32>
    %46 = arith.mulf %45, %44 : vector<16x48xf32>
    %cst_27 = arith.constant dense<0.000000e+00> : vector<16x48xf32>
    %47 = tpu.matmul %46, %0, %cst_27 {dimension_numbers = #tpu.dot_dimension_numbers<[1], [0], [0], [1], [0, 0, 1, 1], [], []>} : vector<16x48xf32>, vector<48x48xf32>, vector<16x48xf32> -> vector<16x48xf32>
    %48 = arith.subf %47, %41 : vector<16x48xf32>
    %cst_28 = arith.constant dense<0.000000e+00> : vector<16x48xf32>
    %49 = tpu.matmul %48, %0, %cst_28 {dimension_numbers = #tpu.dot_dimension_numbers<[1], [0], [0], [1], [0, 0, 1, 1], [], []>} : vector<16x48xf32>, vector<48x48xf32>, vector<16x48xf32> -> vector<16x48xf32>
    %50 = arith.subf %49, %46 : vector<16x48xf32>
    %cst_29 = arith.constant dense<0.000000e+00> : vector<16x48xf32>
    %51 = tpu.matmul %50, %0, %cst_29 {dimension_numbers = #tpu.dot_dimension_numbers<[1], [0], [0], [1], [0, 0, 1, 1], [], []>} : vector<16x48xf32>, vector<48x48xf32>, vector<16x48xf32> -> vector<16x48xf32>
    %52 = arith.subf %51, %48 : vector<16x48xf32>
    %cst_30 = arith.constant dense<0.000000e+00> : vector<16x48xf32>
    %53 = tpu.matmul %52, %0, %cst_30 {dimension_numbers = #tpu.dot_dimension_numbers<[1], [0], [0], [1], [0, 0, 1, 1], [], []>} : vector<16x48xf32>, vector<48x48xf32>, vector<16x48xf32> -> vector<16x48xf32>
    %54 = arith.subf %53, %50 : vector<16x48xf32>
    %55 = tpu.concatenate %41, %46, %48, %50, %52, %54 in 0 : vector<16x48xf32>, vector<16x48xf32>, vector<16x48xf32>, vector<16x48xf32>, vector<16x48xf32>, vector<16x48xf32> -> vector<96x48xf32>
    %cst_31 = arith.constant dense<0.000000e+00> : vector<8x48xf32>
    %56 = tpu.matmul %42, %55, %cst_31 {dimension_numbers = #tpu.dot_dimension_numbers<[1], [0], [0], [1], [0, 0, 1, 1], [], []>} : vector<8x96xf32>, vector<96x48xf32>, vector<8x48xf32> -> vector<8x48xf32>
    %57 = vector.broadcast %43 : vector<8x1xf32> to vector<8x48xf32>
    %58 = arith.addf %56, %57 : vector<8x48xf32>
    %cst_32 = arith.constant dense<0.000000e+00> : vector<8xf32>
    %59 = vector.multi_reduction <add>, %58, %cst_32 [1] : vector<8x48xf32> to vector<8xf32>
    %60 = vector.shape_cast %59 : vector<8xf32> to vector<8x1xf32>
    %cst_33 = arith.constant 0.020833334 : f32
    %61 = vector.broadcast %cst_33 : f32 to vector<8x1xf32>
    %62 = arith.mulf %60, %61 : vector<8x1xf32>
    %63 = arith.mulf %58, %58 : vector<8x48xf32>
    %cst_34 = arith.constant dense<0.000000e+00> : vector<8xf32>
    %64 = vector.multi_reduction <add>, %63, %cst_34 [1] : vector<8x48xf32> to vector<8xf32>
    %65 = vector.shape_cast %64 : vector<8xf32> to vector<8x1xf32>
    %cst_35 = arith.constant 0.020833334 : f32
    %66 = vector.broadcast %cst_35 : f32 to vector<8x1xf32>
    %67 = arith.mulf %65, %66 : vector<8x1xf32>
    %68 = arith.mulf %62, %62 : vector<8x1xf32>
    %69 = arith.subf %67, %68 : vector<8x1xf32>
    %cst_36 = arith.constant 0.000000e+00 : f32
    %70 = vector.broadcast %cst_36 : f32 to vector<8x1xf32>
    %71 = arith.maximumf %69, %70 : vector<8x1xf32>
    %72 = vector.broadcast %62 : vector<8x1xf32> to vector<8x48xf32>
    %73 = arith.subf %58, %72 : vector<8x48xf32>
    %cst_37 = arith.constant 9.99999974E-6 : f32
    %74 = vector.broadcast %cst_37 : f32 to vector<8x1xf32>
    %75 = arith.addf %71, %74 : vector<8x1xf32>
    %76 = math.rsqrt %75 : vector<8x1xf32>
    %77 = vector.broadcast %76 : vector<8x1xf32> to vector<8x48xf32>
    %78 = arith.mulf %73, %77 : vector<8x48xf32>
    %cst_38 = arith.constant 0.000000e+00 : f32
    %79 = vector.broadcast %cst_38 : f32 to vector<8x48xf32>
    %80 = arith.maximumf %78, %79 : vector<8x48xf32>
    %c0_39 = arith.constant 0 : index
    %c0_40 = arith.constant 0 : index
    %c0_41 = arith.constant 0 : index
    %81 = vector.load %arg7[%c0_39, %c0_40, %c0_41] : memref<1x8x48xf32, #tpu.memory_space<vmem>>, vector<1x8x48xf32>
    %82 = vector.shape_cast %81 : vector<1x8x48xf32> to vector<8x48xf32>
    %83 = vector.shape_cast %80 : vector<8x48xf32> to vector<1x8x48xf32>
    tpu.vector_store %arg7[%c0_39, %c0_40, %c0_41], %83 {strides = array<i32>} : memref<1x8x48xf32, #tpu.memory_space<vmem>>, vector<1x8x48xf32>,
    return
  }
  func.func @transform_0(%arg0: i32) -> (i32, i32, i32) {
    %c0_i32 = arith.constant 0 : i32
    %c0_i32_0 = arith.constant 0 : i32
    %c0_i32_1 = arith.constant 0 : i32
    return %arg0, %c0_i32, %c0_i32_0 : i32, i32, i32
  }
  func.func @transform_1(%arg0: i32) -> (i32, i32) {
    %c0_i32 = arith.constant 0 : i32
    %c0_i32_0 = arith.constant 0 : i32
    %c0_i32_1 = arith.constant 0 : i32
    return %c0_i32, %c0_i32_0 : i32, i32
  }
  func.func @transform_2(%arg0: i32) -> (i32, i32) {
    %c0_i32 = arith.constant 0 : i32
    %c0_i32_0 = arith.constant 0 : i32
    %c0_i32_1 = arith.constant 0 : i32
    return %c0_i32, %c0_i32_0 : i32, i32
  }
  func.func @transform_3(%arg0: i32) -> (i32, i32) {
    %c0_i32 = arith.constant 0 : i32
    %c0_i32_0 = arith.constant 0 : i32
    %c0_i32_1 = arith.constant 0 : i32
    return %c0_i32, %c0_i32_0 : i32, i32
  }
  func.func @transform_4(%arg0: i32) -> (i32, i32) {
    %c0_i32 = arith.constant 0 : i32
    %c0_i32_0 = arith.constant 0 : i32
    %c0_i32_1 = arith.constant 0 : i32
    return %c0_i32, %c0_i32_0 : i32, i32
  }
  func.func @transform_5(%arg0: i32) -> (i32, i32) {
    %c0_i32 = arith.constant 0 : i32
    %c0_i32_0 = arith.constant 0 : i32
    %c0_i32_1 = arith.constant 0 : i32
    return %c0_i32, %c0_i32_0 : i32, i32
  }
  func.func @transform_6(%arg0: i32) -> (i32, i32, i32) {
    %c0_i32 = arith.constant 0 : i32
    %c0_i32_0 = arith.constant 0 : i32
    %c0_i32_1 = arith.constant 0 : i32
    return %arg0, %c0_i32, %c0_i32_0 : i32, i32, i32
  }
}

module attributes {stable_mosaic.version = 11 : i64} {
  func.func @_cheb_block_kernel(%arg0: i32, %arg1: memref<1x16x192xf32, #tpu.memory_space<vmem>>, %arg2: memref<192x192xf32, #tpu.memory_space<vmem>>, %arg3: memref<8x96xf32, #tpu.memory_space<vmem>>, %arg4: memref<8x1xf32, #tpu.memory_space<vmem>>, %arg5: memref<2x48xf32, #tpu.memory_space<vmem>>, %arg6: memref<2x1xf32, #tpu.memory_space<vmem>>, %arg7: memref<1x2x192xf32, #tpu.memory_space<vmem>>) attributes {dimension_semantics = [#tpu.dimension_semantics<parallel>], iteration_bounds = array<i64: 2>, scalar_prefetch = 0 : i64, scratch_operands = 0 : i64, tpu.core_type = #tpu.core_type<tc>, window_params = [{transform_indices = @transform_0, window_bounds = array<i64: 1, 16, 192>}, {pipeline_mode = #tpu.pipeline_mode<synchronous>, transform_indices = @transform_1, window_bounds = array<i64: 192, 192>}, {pipeline_mode = #tpu.pipeline_mode<synchronous>, transform_indices = @transform_2, window_bounds = array<i64: 8, 96>}, {pipeline_mode = #tpu.pipeline_mode<synchronous>, transform_indices = @transform_3, window_bounds = array<i64: 8, 1>}, {pipeline_mode = #tpu.pipeline_mode<synchronous>, transform_indices = @transform_4, window_bounds = array<i64: 2, 48>}, {pipeline_mode = #tpu.pipeline_mode<synchronous>, transform_indices = @transform_5, window_bounds = array<i64: 2, 1>}, {transform_indices = @transform_6, window_bounds = array<i64: 1, 2, 192>}]} {
    %c0 = arith.constant 0 : index
    %c0_0 = arith.constant 0 : index
    %0 = vector.load %arg2[%c0, %c0_0] : memref<192x192xf32, #tpu.memory_space<vmem>>, vector<192x192xf32>
    %c0_1 = arith.constant 0 : index
    %c0_2 = arith.constant 0 : index
    %c0_3 = arith.constant 0 : index
    %1 = vector.load %arg1[%c0_1, %c0_2, %c0_3] : memref<1x16x192xf32, #tpu.memory_space<vmem>>, vector<1x16x192xf32>
    %2 = vector.shape_cast %1 : vector<1x16x192xf32> to vector<16x192xf32>
    %c0_4 = arith.constant 0 : index
    %c0_5 = arith.constant 0 : index
    %3 = vector.load %arg3[%c0_4, %c0_5] : memref<8x96xf32, #tpu.memory_space<vmem>>, vector<8x96xf32>
    %c0_6 = arith.constant 0 : index
    %c0_7 = arith.constant 0 : index
    %4 = vector.load %arg4[%c0_6, %c0_7] : memref<8x1xf32, #tpu.memory_space<vmem>>, vector<8x1xf32>
    %cst = arith.constant dense<0.000000e+00> : vector<16x192xf32>
    %5 = tpu.matmul %2, %0, %cst {dimension_numbers = #tpu.dot_dimension_numbers<[1], [0], [0], [1], [0, 0, 1, 1], [], []>} : vector<16x192xf32>, vector<192x192xf32>, vector<16x192xf32> -> vector<16x192xf32>
    %cst_8 = arith.constant 5.000000e-01 : f32
    %6 = vector.broadcast %cst_8 : f32 to vector<16x192xf32>
    %7 = arith.mulf %6, %5 : vector<16x192xf32>
    %cst_9 = arith.constant dense<0.000000e+00> : vector<16x192xf32>
    %8 = tpu.matmul %7, %0, %cst_9 {dimension_numbers = #tpu.dot_dimension_numbers<[1], [0], [0], [1], [0, 0, 1, 1], [], []>} : vector<16x192xf32>, vector<192x192xf32>, vector<16x192xf32> -> vector<16x192xf32>
    %9 = arith.subf %8, %2 : vector<16x192xf32>
    %cst_10 = arith.constant dense<0.000000e+00> : vector<16x192xf32>
    %10 = tpu.matmul %9, %0, %cst_10 {dimension_numbers = #tpu.dot_dimension_numbers<[1], [0], [0], [1], [0, 0, 1, 1], [], []>} : vector<16x192xf32>, vector<192x192xf32>, vector<16x192xf32> -> vector<16x192xf32>
    %11 = arith.subf %10, %7 : vector<16x192xf32>
    %cst_11 = arith.constant dense<0.000000e+00> : vector<16x192xf32>
    %12 = tpu.matmul %11, %0, %cst_11 {dimension_numbers = #tpu.dot_dimension_numbers<[1], [0], [0], [1], [0, 0, 1, 1], [], []>} : vector<16x192xf32>, vector<192x192xf32>, vector<16x192xf32> -> vector<16x192xf32>
    %13 = arith.subf %12, %9 : vector<16x192xf32>
    %cst_12 = arith.constant dense<0.000000e+00> : vector<16x192xf32>
    %14 = tpu.matmul %13, %0, %cst_12 {dimension_numbers = #tpu.dot_dimension_numbers<[1], [0], [0], [1], [0, 0, 1, 1], [], []>} : vector<16x192xf32>, vector<192x192xf32>, vector<16x192xf32> -> vector<16x192xf32>
    %15 = arith.subf %14, %11 : vector<16x192xf32>
    %16 = tpu.concatenate %2, %7, %9, %11, %13, %15 in 0 : vector<16x192xf32>, vector<16x192xf32>, vector<16x192xf32>, vector<16x192xf32>, vector<16x192xf32>, vector<16x192xf32> -> vector<96x192xf32>
    %cst_13 = arith.constant dense<0.000000e+00> : vector<8x192xf32>
    %17 = tpu.matmul %3, %16, %cst_13 {dimension_numbers = #tpu.dot_dimension_numbers<[1], [0], [0], [1], [0, 0, 1, 1], [], []>} : vector<8x96xf32>, vector<96x192xf32>, vector<8x192xf32> -> vector<8x192xf32>
    %18 = vector.broadcast %4 : vector<8x1xf32> to vector<8x192xf32>
    %19 = arith.addf %17, %18 : vector<8x192xf32>
    %cst_14 = arith.constant dense<0.000000e+00> : vector<8xf32>
    %20 = vector.multi_reduction <add>, %19, %cst_14 [1] : vector<8x192xf32> to vector<8xf32>
    %21 = vector.shape_cast %20 : vector<8xf32> to vector<8x1xf32>
    %cst_15 = arith.constant 0.00520833349 : f32
    %22 = vector.broadcast %cst_15 : f32 to vector<8x1xf32>
    %23 = arith.mulf %21, %22 : vector<8x1xf32>
    %24 = arith.mulf %19, %19 : vector<8x192xf32>
    %cst_16 = arith.constant dense<0.000000e+00> : vector<8xf32>
    %25 = vector.multi_reduction <add>, %24, %cst_16 [1] : vector<8x192xf32> to vector<8xf32>
    %26 = vector.shape_cast %25 : vector<8xf32> to vector<8x1xf32>
    %cst_17 = arith.constant 0.00520833349 : f32
    %27 = vector.broadcast %cst_17 : f32 to vector<8x1xf32>
    %28 = arith.mulf %26, %27 : vector<8x1xf32>
    %29 = arith.mulf %23, %23 : vector<8x1xf32>
    %30 = arith.subf %28, %29 : vector<8x1xf32>
    %cst_18 = arith.constant 0.000000e+00 : f32
    %31 = vector.broadcast %cst_18 : f32 to vector<8x1xf32>
    %32 = arith.maximumf %30, %31 : vector<8x1xf32>
    %33 = vector.broadcast %23 : vector<8x1xf32> to vector<8x192xf32>
    %34 = arith.subf %19, %33 : vector<8x192xf32>
    %cst_19 = arith.constant 9.99999974E-6 : f32
    %35 = vector.broadcast %cst_19 : f32 to vector<8x1xf32>
    %36 = arith.addf %32, %35 : vector<8x1xf32>
    %37 = math.rsqrt %36 : vector<8x1xf32>
    %38 = vector.broadcast %37 : vector<8x1xf32> to vector<8x192xf32>
    %39 = arith.mulf %34, %38 : vector<8x192xf32>
    %cst_20 = arith.constant 0.000000e+00 : f32
    %40 = vector.broadcast %cst_20 : f32 to vector<8x192xf32>
    %41 = arith.maximumf %39, %40 : vector<8x192xf32>
    %c0_21 = arith.constant 0 : index
    %c0_22 = arith.constant 0 : index
    %42 = vector.load %arg5[%c0_21, %c0_22] : memref<2x48xf32, #tpu.memory_space<vmem>>, vector<2x48xf32>
    %c0_23 = arith.constant 0 : index
    %c0_24 = arith.constant 0 : index
    %43 = vector.load %arg6[%c0_23, %c0_24] : memref<2x1xf32, #tpu.memory_space<vmem>>, vector<2x1xf32>
    %cst_25 = arith.constant dense<0.000000e+00> : vector<8x192xf32>
    %44 = tpu.matmul %41, %0, %cst_25 {dimension_numbers = #tpu.dot_dimension_numbers<[1], [0], [0], [1], [0, 0, 1, 1], [], []>} : vector<8x192xf32>, vector<192x192xf32>, vector<8x192xf32> -> vector<8x192xf32>
    %cst_26 = arith.constant 5.000000e-01 : f32
    %45 = vector.broadcast %cst_26 : f32 to vector<8x192xf32>
    %46 = arith.mulf %45, %44 : vector<8x192xf32>
    %cst_27 = arith.constant dense<0.000000e+00> : vector<8x192xf32>
    %47 = tpu.matmul %46, %0, %cst_27 {dimension_numbers = #tpu.dot_dimension_numbers<[1], [0], [0], [1], [0, 0, 1, 1], [], []>} : vector<8x192xf32>, vector<192x192xf32>, vector<8x192xf32> -> vector<8x192xf32>
    %48 = arith.subf %47, %41 : vector<8x192xf32>
    %cst_28 = arith.constant dense<0.000000e+00> : vector<8x192xf32>
    %49 = tpu.matmul %48, %0, %cst_28 {dimension_numbers = #tpu.dot_dimension_numbers<[1], [0], [0], [1], [0, 0, 1, 1], [], []>} : vector<8x192xf32>, vector<192x192xf32>, vector<8x192xf32> -> vector<8x192xf32>
    %50 = arith.subf %49, %46 : vector<8x192xf32>
    %cst_29 = arith.constant dense<0.000000e+00> : vector<8x192xf32>
    %51 = tpu.matmul %50, %0, %cst_29 {dimension_numbers = #tpu.dot_dimension_numbers<[1], [0], [0], [1], [0, 0, 1, 1], [], []>} : vector<8x192xf32>, vector<192x192xf32>, vector<8x192xf32> -> vector<8x192xf32>
    %52 = arith.subf %51, %48 : vector<8x192xf32>
    %cst_30 = arith.constant dense<0.000000e+00> : vector<8x192xf32>
    %53 = tpu.matmul %52, %0, %cst_30 {dimension_numbers = #tpu.dot_dimension_numbers<[1], [0], [0], [1], [0, 0, 1, 1], [], []>} : vector<8x192xf32>, vector<192x192xf32>, vector<8x192xf32> -> vector<8x192xf32>
    %54 = arith.subf %53, %50 : vector<8x192xf32>
    %55 = tpu.concatenate %41, %46, %48, %50, %52, %54 in 0 : vector<8x192xf32>, vector<8x192xf32>, vector<8x192xf32>, vector<8x192xf32>, vector<8x192xf32>, vector<8x192xf32> -> vector<48x192xf32>
    %cst_31 = arith.constant dense<0.000000e+00> : vector<2x192xf32>
    %56 = tpu.matmul %42, %55, %cst_31 {dimension_numbers = #tpu.dot_dimension_numbers<[1], [0], [0], [1], [0, 0, 1, 1], [], []>} : vector<2x48xf32>, vector<48x192xf32>, vector<2x192xf32> -> vector<2x192xf32>
    %57 = vector.broadcast %43 : vector<2x1xf32> to vector<2x192xf32>
    %58 = arith.addf %56, %57 : vector<2x192xf32>
    %cst_32 = arith.constant dense<0.000000e+00> : vector<2xf32>
    %59 = vector.multi_reduction <add>, %58, %cst_32 [1] : vector<2x192xf32> to vector<2xf32>
    %60 = vector.shape_cast %59 : vector<2xf32> to vector<2x1xf32>
    %cst_33 = arith.constant 0.00520833349 : f32
    %61 = vector.broadcast %cst_33 : f32 to vector<2x1xf32>
    %62 = arith.mulf %60, %61 : vector<2x1xf32>
    %63 = arith.mulf %58, %58 : vector<2x192xf32>
    %cst_34 = arith.constant dense<0.000000e+00> : vector<2xf32>
    %64 = vector.multi_reduction <add>, %63, %cst_34 [1] : vector<2x192xf32> to vector<2xf32>
    %65 = vector.shape_cast %64 : vector<2xf32> to vector<2x1xf32>
    %cst_35 = arith.constant 0.00520833349 : f32
    %66 = vector.broadcast %cst_35 : f32 to vector<2x1xf32>
    %67 = arith.mulf %65, %66 : vector<2x1xf32>
    %68 = arith.mulf %62, %62 : vector<2x1xf32>
    %69 = arith.subf %67, %68 : vector<2x1xf32>
    %cst_36 = arith.constant 0.000000e+00 : f32
    %70 = vector.broadcast %cst_36 : f32 to vector<2x1xf32>
    %71 = arith.maximumf %69, %70 : vector<2x1xf32>
    %72 = vector.broadcast %62 : vector<2x1xf32> to vector<2x192xf32>
    %73 = arith.subf %58, %72 : vector<2x192xf32>
    %cst_37 = arith.constant 9.99999974E-6 : f32
    %74 = vector.broadcast %cst_37 : f32 to vector<2x1xf32>
    %75 = arith.addf %71, %74 : vector<2x1xf32>
    %76 = math.rsqrt %75 : vector<2x1xf32>
    %77 = vector.broadcast %76 : vector<2x1xf32> to vector<2x192xf32>
    %78 = arith.mulf %73, %77 : vector<2x192xf32>
    %cst_38 = arith.constant 0.000000e+00 : f32
    %79 = vector.broadcast %cst_38 : f32 to vector<2x192xf32>
    %80 = arith.maximumf %78, %79 : vector<2x192xf32>
    %c0_39 = arith.constant 0 : index
    %c0_40 = arith.constant 0 : index
    %c0_41 = arith.constant 0 : index
    %81 = vector.load %arg7[%c0_39, %c0_40, %c0_41] : memref<1x2x192xf32, #tpu.memory_space<vmem>>, vector<1x2x192xf32>
    %82 = vector.shape_cast %81 : vector<1x2x192xf32> to vector<2x192xf32>
    %83 = vector.shape_cast %80 : vector<2x192xf32> to vector<1x2x192xf32>
    tpu.vector_store %arg7[%c0_39, %c0_40, %c0_41], %83 {strides = array<i32>} : memref<1x2x192xf32, #tpu.memory_space<vmem>>, vector<1x2x192xf32>,
    return
  }
  func.func @transform_0(%arg0: i32) -> (i32, i32, i32) {
    %c0_i32 = arith.constant 0 : i32
    %c0_i32_0 = arith.constant 0 : i32
    %c0_i32_1 = arith.constant 0 : i32
    return %arg0, %c0_i32, %c0_i32_0 : i32, i32, i32
  }
  func.func @transform_1(%arg0: i32) -> (i32, i32) {
    %c0_i32 = arith.constant 0 : i32
    %c0_i32_0 = arith.constant 0 : i32
    %c0_i32_1 = arith.constant 0 : i32
    return %c0_i32, %c0_i32_0 : i32, i32
  }
  func.func @transform_2(%arg0: i32) -> (i32, i32) {
    %c0_i32 = arith.constant 0 : i32
    %c0_i32_0 = arith.constant 0 : i32
    %c0_i32_1 = arith.constant 0 : i32
    return %c0_i32, %c0_i32_0 : i32, i32
  }
  func.func @transform_3(%arg0: i32) -> (i32, i32) {
    %c0_i32 = arith.constant 0 : i32
    %c0_i32_0 = arith.constant 0 : i32
    %c0_i32_1 = arith.constant 0 : i32
    return %c0_i32, %c0_i32_0 : i32, i32
  }
  func.func @transform_4(%arg0: i32) -> (i32, i32) {
    %c0_i32 = arith.constant 0 : i32
    %c0_i32_0 = arith.constant 0 : i32
    %c0_i32_1 = arith.constant 0 : i32
    return %c0_i32, %c0_i32_0 : i32, i32
  }
  func.func @transform_5(%arg0: i32) -> (i32, i32) {
    %c0_i32 = arith.constant 0 : i32
    %c0_i32_0 = arith.constant 0 : i32
    %c0_i32_1 = arith.constant 0 : i32
    return %c0_i32, %c0_i32_0 : i32, i32
  }
  func.func @transform_6(%arg0: i32) -> (i32, i32, i32) {
    %c0_i32 = arith.constant 0 : i32
    %c0_i32_0 = arith.constant 0 : i32
    %c0_i32_1 = arith.constant 0 : i32
    return %arg0, %c0_i32, %c0_i32_0 : i32, i32, i32
  }
}

</mosaic_0001>

<bundles_post_ra>
// kernel: forward.5
= control target key start
LH: loop header
LB: loop body
LE: loop exit
PB: predicated region body
PF: predicated region fallthrough
CT: control target
= control target key end

     0   :  { %11 = vsyncpa [#allocation3], 0  ;;  %s1996_s21 = smov 0   ;;  %s2409_s0 = inlined_call_operand.vmem [shape: f32[2,8,192], index: 0, kind: input, shape index: {}]   ;;  %s2410_s1 = inlined_call_operand.hbm [shape: f32[192,192], index: 1, kind: input, shape index: {}]   ;;  %s2411_s2 = inlined_call_operand.vmem [shape: f32[8,48], index: 2, kind: input, shape index: {}]   ;;  %s2412_s3 = inlined_call_operand.vmem [shape: f32[8,1], index: 3, kind: input, shape index: {}]   ;;  %s2413_s4 = inlined_call_operand.vmem [shape: f32[8,48], index: 4, kind: input, shape index: {}]   ;;  %s2414_s5 = inlined_call_operand.vmem [shape: f32[8,1], index: 5, kind: input, shape index: {}]   ;;  %s2415_s6 = inlined_call_operand.vmem [shape: f32[2,8,192], index: 6, kind: output, shape index: {}]  }
   0x1 LB: > { %s2002_s22 = sadd.s32 4294967295, %s1954_s21   ;;  %p1358_p0 = scmp.ge.s32.totalorder %s1954_s21, 1  ;;  %s1954_s21 = sphi %s1996_s21, %s17_s21  }
   0x2   : > { %p179_p1 = scmp.lt.s32.totalorder %s1954_s21, 3  ;;  %s1956_s23 = smov [#allocation2]  }
   0x3   : > { %s191_s24 = sshll.u32 %s1956_s23, 4  ;;  %p2416_p3 = scmp.eq.s32.totalorder %s2002_s22, 0  ;;  %s192_s24 = int_to_ptr.vmem [resolvable:$true] %s191_s24 }
   0x4   : > { %p2006_p2 = pnand %p1358_p0, %p179_p1  ;;  %s1916_s29 = scalar_lea.hbm %s2410_s1, 6144 }
   0x5   : > { %p1917_p6 = scmp.ne.s32.totalorder %s2410_s1, %s1916_s29  ;;  %p1923_p10 = scmp.lt.u32.totalorder %s1916_s29, %s2410_s1 }
   0x6   : > { %s2418_s25 = scalar_select %p2006_p2, 1, 0 }
   0x7   : > { %p1891_p4 = pneg %p2006_p2 }
   0x9   : > { %p2015_p5 = pnand %p2416_p3, %p1891_p4 }
   0xb   : > { %p1918_p7 = pneg %p2015_p5 }
   0xd   : > { %p1919_p8 = pnand %p1918_p7, %p1917_p6 }
   0xf   : > { %p1920_p9 = pneg %p1919_p8 }
  0x11   : > { %p1925_p11 = pnand %p1923_p10, %p1920_p9 }
  0x13   : > { %1928 = shalt.err (!%p1925_p11)
}
  0x14   : > { %s1929_s10 = scalar_lea.vmem %s192_s24, 6144  ;;  %p1937_p1 = scmp.lt.s32.totalorder %s192_s24, %s192_s24 }
  0x15   : > { %p1930_p12 = scmp.ne.s32.totalorder %s192_s24, %s1929_s10  ;;  %p1938_p4 = scmp.lt.s32.totalorder %s1929_s10, %s1929_s10 }
  0x17   : > { %p1932_p13 = pnand %p1930_p12, %p1918_p7  ;;  %p1939_p3 = por %p1938_p4, %p1937_p1 }
  0x19   : > { %p1933_p0 = pneg %p1932_p13 }
  0x1b   : > { %p1940_p2 = pnand %p1939_p3, %p1933_p0 }
  0x1d   : > { %1943 = shalt.err (!%p1940_p2)
}
  0x1e   : > { %s1957_s11 = smov 256   ;;  %s1958_s12 = smov 16  }
  0x1f   : > { %1894 = dma.hbm_to_vmem [thread:$0]  (!%p2015_p5), %s2410_s1, 6144, %s192_s24, [#allocation3], %s1957_s11, %s1957_s11, %s1958_s12  }
  0x20   : > { %p2420_p6 = scmp.ne.s32.totalorder %s2418_s25, 0 }
  0x21   : > { %p2421_p8 = scmp.eq.s32.totalorder (!%p2420_p6), %s2002_s22, 0 }
  0x22   : > { %227 = sbr.rel (%p2420_p6) target bundleno = 3035 (0xbdb), region = 44 }
  0x29   : > { %1949 = dma.done.wait (%p2421_p8), [#allocation3], 6144   ;;  %p2422_p7 = pmov %p2421_p8 }
  0x2a   : > { %v268_v0 = vld [vmem:[#allocation2 + $0x8] sm:$0xff]  ;;  %v270_v1 = vld [vmem:[#allocation2 + $0x18] sm:$0xff]  ;;  %v267_v2 = vld [vmem:[#allocation2] sm:$0xff]  ;;  %p257_p2 = scmp.lt.s32.totalorder %s2002_s22, 1  ;;  %vm319_vm0 = vcmask 523264   ;;  %vm705_vm1 = vcmask 392192  }
  0x2b   : > { %1951 = vsyncadd (%p2422_p7), [#allocation3], 4294961152  ;;  %v2041_v3 = vpack.c.bf16 %v270_v1, %v268_v0  ;;  %v269_v4 = vld [vmem:[#allocation2 + $0x10] sm:$0xff]  ;;  %v272_v5 = vld [vmem:[#allocation2 + $0x28] sm:$0xff] }
  0x2c   : > { %v274_v6 = vld [vmem:[#allocation2 + $0x38] sm:$0xff]  ;;  %v2043_v7 = vpack.c.bf16 %v269_v4, %v267_v2  ;;  %v271_v9 = vld [vmem:[#allocation2 + $0x20] sm:$0xff]  ;;  %v273_v10 = vld [vmem:[#allocation2 + $0x30] sm:$0xff]  ;;  %s2424_s22 = smov (!%p257_p2, %s2002_s22), 1 }
  0x2d   : > { %v2045_v8 = vpack.c.bf16 %v274_v6, %v272_v5  ;;  %v276_v11 = vld [vmem:[#allocation2 + $0x48] sm:$0xff]  ;;  %1384 = vmatprep.subr.bf16.mxu0 %v2041_v3  ;;  %v278_v12 = vld [vmem:[#allocation2 + $0x58] sm:$0xff]  ;;  %1432 = vmatprep.subr.bf16.mxu1 %v2041_v3  ;;  %v2051_v13 = vpack.c.bf16 %v273_v10, %v271_v9  ;;  %v275_v15 = vld [vmem:[#allocation2 + $0x40] sm:$0xff]  ;;  %s1381_s15 = sshll.u32 %s2424_s22, 4 }
  0x2e   : > { %1386 = vmatpush1.bf16.msra.mxu0 %v2043_v7  ;;  %1434 = vmatpush1.bf16.msra.mxu1 %v2043_v7  ;;  %v2055_v14 = vpack.c.bf16 %v278_v12, %v276_v11  ;;  %v277_v16 = vld [vmem:[#allocation2 + $0x50] sm:$0xff]  ;;  %v280_v17 = vld [vmem:[#allocation2 + $0x68] sm:$0xff]  ;;  %v282_v18 = vld [vmem:[#allocation2 + $0x78] sm:$0xff]  ;;  %s2084_s18 = scalar_lea.vmem %s2409_s0, %s1381_s15  ;;  %s266_s7 = scalar_lea.vmem %s2415_s6, %s1381_s15 }
  0x2f   : > { %1388 = vmatprep.subr.bf16.mxu0 %v2045_v8  ;;  %1436 = vmatprep.subr.bf16.mxu1 %v2045_v8  ;;  %v2064_v19 = vpack.c.bf16 %v277_v16, %v275_v15  ;;  %v2068_v20 = vpack.c.bf16 %v282_v18, %v280_v17  ;;  %v279_v21 = vld [vmem:[#allocation2 + $0x60] sm:$0xff]  ;;  %v281_v22 = vld [vmem:[#allocation2 + $0x70] sm:$0xff]  ;;  %v284_v23 = vld [vmem:[#allocation2 + $0x88] sm:$0xff] }
  0x30   : > { %v286_v24 = vld [vmem:[#allocation2 + $0x98] sm:$0xff]  ;;  %v2073_v25 = vpack.c.bf16 %v281_v22, %v279_v21  ;;  %v283_v27 = vld [vmem:[#allocation2 + $0x80] sm:$0xff]  ;;  %v285_v28 = vld [vmem:[#allocation2 + $0x90] sm:$0xff] }
  0x31   : > { %v2077_v26 = vpack.c.bf16 %v286_v24, %v284_v23  ;;  %v288_v29 = vld [vmem:[#allocation2 + $0xa8] sm:$0xff]  ;;  %v290_v30 = vld [vmem:[#allocation2 + $0xb8] sm:$0xff]  ;;  %v2088_v31 = vpack.c.bf16 %v285_v28, %v283_v27  ;;  %v2091_v32 = vld [vmem:[%s2084_s18 + $0x8] sm:$0xff] }
  0x32   : > { %1390 = vmatpush1.bf16.msra.mxu0 %v2051_v13  ;;  %1438 = vmatpush1.bf16.msra.mxu1 %v2051_v13  ;;  %v2095_v33 = vpack.c.bf16 %v290_v30, %v288_v29  ;;  %v287_v34 = vld [vmem:[#allocation2 + $0xa0] sm:$0xff]  ;;  %v289_v35 = vld [vmem:[#allocation2 + $0xb0] sm:$0xff]  ;;  %v292_v36 = vld [vmem:[#allocation2 + $0xc8] sm:$0xff] }
  0x33   : > { %1392 = vmatprep.subr.bf16.mxu0 %v2055_v14  ;;  %1440 = vmatprep.subr.bf16.mxu1 %v2055_v14  ;;  %v294_v37 = vld [vmem:[#allocation2 + $0xd8] sm:$0xff]  ;;  %v2101_v38 = vpack.c.bf16 %v289_v35, %v287_v34  ;;  %v291_v40 = vld [vmem:[#allocation2 + $0xc0] sm:$0xff]  ;;  %v293_v41 = vld [vmem:[#allocation2 + $0xd0] sm:$0xff] }
  0x34   : > { %1367 = vmatprep.mubr.msk.f32.mxu0 %vm319_vm0, %v2091_v32  ;;  %v2105_v39 = vpack.c.bf16 %v294_v37, %v292_v36  ;;  %v296_v42 = vld [vmem:[#allocation2 + $0xe8] sm:$0xff]  ;;  %v298_v43 = vld [vmem:[#allocation2 + $0xf8] sm:$0xff]  ;;  %v2109_v44 = vpack.c.bf16 %v293_v41, %v291_v40  ;;  %v295_v46 = vld [vmem:[#allocation2 + $0xe0] sm:$0xff] }
  0x35   : > { %v2113_v45 = vpack.c.bf16 %v298_v43, %v296_v42  ;;  %v297_v47 = vld [vmem:[#allocation2 + $0xf0] sm:$0xff]  ;;  %v300_v48 = vld [vmem:[#allocation2 + $0x108] sm:$0xff]  ;;  %v302_v49 = vld [vmem:[#allocation2 + $0x118] sm:$0xff]  ;;  %v1959_v43 = vmov 0.0  }
  0x36   : > { %1394 = vmatpush1.bf16.msra.mxu0 %v2064_v19  ;;  %1442 = vmatpush1.bf16.msra.mxu1 %v2064_v19  ;;  %v2117_v50 = vpack.c.bf16 %v297_v47, %v295_v46  ;;  %v2121_v51 = vpack.c.bf16 %v302_v49, %v300_v48  ;;  %v299_v52 = vld [vmem:[#allocation2 + $0x100] sm:$0xff]  ;;  %v301_v53 = vld [vmem:[#allocation2 + $0x110] sm:$0xff]  ;;  %v304_v54 = vld [vmem:[#allocation2 + $0x128] sm:$0xff]  ;;  %v1960_v47 = vmov 0  }
  0x37   : > { %1396 = vmatprep.subr.bf16.mxu0 %v2068_v20  ;;  %1444 = vmatprep.subr.bf16.mxu1 %v2068_v20  ;;  %v306_v55 = vld [vmem:[#allocation2 + $0x138] sm:$0xff]  ;;  %v2125_v56 = vpack.c.bf16 %v301_v53, %v299_v52  ;;  %v303_v58 = vld [vmem:[#allocation2 + $0x120] sm:$0xff]  ;;  %v305_v59 = vld [vmem:[#allocation2 + $0x130] sm:$0xff] }
  0x38   : > { %v2129_v57 = vpack.c.bf16 %v306_v55, %v304_v54  ;;  %v308_v60 = vld [vmem:[#allocation2 + $0x148] sm:$0xff]  ;;  %v310_v61 = vld [vmem:[#allocation2 + $0x158] sm:$0xff]  ;;  %v2133_v62 = vpack.c.bf16 %v305_v59, %v303_v58  ;;  %v307_v0 = vld [vmem:[#allocation2 + $0x140] sm:$0xff]  ;;  %1910 = vset.pattern.permute.xlu0 %v1960_v47  ;;  %1911 = vset.pattern.permute.xlu1 %v1960_v47 }
  0x39   : > { %v2137_v63 = vpack.c.bf16 %v310_v61, %v308_v60  ;;  %v309_v1 = vld [vmem:[#allocation2 + $0x150] sm:$0xff]  ;;  %v312_v2 = vld [vmem:[#allocation2 + $0x168] sm:$0xff]  ;;  %v314_v4 = vld [vmem:[#allocation2 + $0x178] sm:$0xff] }
  0x3a   : > { %1398 = vmatpush1.bf16.msra.mxu0 %v2073_v25  ;;  %1446 = vmatpush1.bf16.msra.mxu1 %v2073_v25  ;;  %v2141_v5 = vpack.c.bf16 %v309_v1, %v307_v0  ;;  %v2145_v6 = vpack.c.bf16 %v314_v4, %v312_v2  ;;  %v311_v9 = vld [vmem:[#allocation2 + $0x160] sm:$0xff]  ;;  %v313_v10 = vld [vmem:[#allocation2 + $0x170] sm:$0xff]  ;;  %v2156_v12 = vld [vmem:[%s2084_s18] sm:$0xff] }
  0x3b   : > { %1400 = vmatprep.subr.bf16.mxu0 %v2077_v26  ;;  %1448 = vmatprep.subr.bf16.mxu1 %v2077_v26  ;;  %v2149_v11 = vpack.c.bf16 %v313_v10, %v311_v9  ;;  %v318_v46 = vld [vmem:[%s2412_s3] sm:$0xff] }
  0x3c   : > { %702 = vperm.xlu0 %1910, %v318_v46   ;;  %v317_v58 = vld [vmem:[%s2411_s2] sm:$0xff] }
  0x3e   : > { %1402 = vmatpush1.bf16.msra.mxu0 %v2088_v31  ;;  %1450 = vmatpush1.bf16.msra.mxu1 %v2088_v31 }
  0x3f   : > { %1404 = vmatprep.subr.bf16.mxu0 %v2095_v33  ;;  %1452 = vmatprep.subr.bf16.mxu1 %v2095_v33 }
  0x42   : > { %1406 = vmatpush1.bf16.msra.mxu0 %v2101_v38  ;;  %1454 = vmatpush1.bf16.msra.mxu1 %v2101_v38 }
  0x43   : > { %1408 = vmatprep.subr.bf16.mxu0 %v2105_v39  ;;  %1456 = vmatprep.subr.bf16.mxu1 %v2105_v39 }
  0x46   : > { %1410 = vmatpush1.bf16.msra.mxu0 %v2109_v44  ;;  %1458 = vmatpush1.bf16.msra.mxu1 %v2109_v44 }
  0x47   : > { %1412 = vmatprep.subr.bf16.mxu0 %v2113_v45  ;;  %1460 = vmatprep.subr.bf16.mxu1 %v2113_v45 }
  0x4a   : > { %1414 = vmatpush1.bf16.msra.mxu0 %v2117_v50  ;;  %1462 = vmatpush1.bf16.msra.mxu1 %v2117_v50 }
  0x4b   : > { %1416 = vmatprep.subr.bf16.mxu0 %v2121_v51  ;;  %1464 = vmatprep.subr.bf16.mxu1 %v2121_v51 }
  0x4e   : > { %1418 = vmatpush1.bf16.msra.mxu0 %v2125_v56  ;;  %1466 = vmatpush1.bf16.msra.mxu1 %v2125_v56 }
  0x4f   : > { %1420 = vmatprep.subr.bf16.mxu0 %v2129_v57  ;;  %1468 = vmatprep.subr.bf16.mxu1 %v2129_v57 }
  0x52   : > { %1422 = vmatpush1.bf16.msra.mxu0 %v2133_v62  ;;  %1470 = vmatpush1.bf16.msra.mxu1 %v2133_v62 }
  0x53   : > { %1424 = vmatprep.subr.bf16.mxu0 %v2137_v63  ;;  %1472 = vmatprep.subr.bf16.mxu1 %v2137_v63 }
  0x56   : > { %1426 = vmatpush1.bf16.msra.mxu0 %v2141_v5  ;;  %1474 = vmatpush1.bf16.msra.mxu1 %v2141_v5 }
  0x57   : > { %1428 = vmatprep.subr.bf16.mxu0 %v2145_v6  ;;  %1476 = vmatprep.subr.bf16.mxu1 %v2145_v6 }
  0x5a   : > { %1430 = vmatpush1.bf16.msra.mxu0 %v2149_v11  ;;  %1478 = vmatpush1.bf16.msra.mxu1 %v2149_v11 }
  0x5b   : > { %1528 = vmatprep.subr.bf16.mxu1 %v2041_v3  ;;  %1480 = vmatprep.subr.bf16.mxu0 %v2041_v3 }
  0x5d   : > { %388 = vmatmul.mubr.f32.vlgmr.msra.gmra.mrb[0].mxu0 %v2156_v12 }
  0x5e   : > { %1482 = vmatpush1.bf16.msra.mxu0 %v2043_v7 }
  0x5f   : > { %1484 = vmatprep.subr.bf16.mxu0 %v2045_v8 }
  0x62   : > { %1486 = vmatpush1.bf16.msra.mxu0 %v2051_v13 }
  0x63   : > { %1488 = vmatprep.subr.bf16.mxu0 %v2055_v14 }
  0x66   : > { %1490 = vmatpush1.bf16.msra.mxu0 %v2064_v19 }
  0x67   : > { %1492 = vmatprep.subr.bf16.mxu0 %v2068_v20 }
  0x6a   : > { %1494 = vmatpush1.bf16.msra.mxu0 %v2073_v25 }
  0x6b   : > { %1496 = vmatprep.subr.bf16.mxu0 %v2077_v26 }
  0x6e   : > { %1498 = vmatpush1.bf16.msra.mxu0 %v2088_v31 }
  0x6f   : > { %1500 = vmatprep.subr.bf16.mxu0 %v2095_v33 }
  0x72   : > { %1502 = vmatpush1.bf16.msra.mxu0 %v2101_v38 }
  0x73   : > { %1504 = vmatprep.subr.bf16.mxu0 %v2105_v39 }
  0x76   : > { %1506 = vmatpush1.bf16.msra.mxu0 %v2109_v44 }
  0x77   : > { %1508 = vmatprep.subr.bf16.mxu0 %v2113_v45 }
  0x7a   : > { %1510 = vmatpush1.bf16.msra.mxu0 %v2117_v50 }
  0x7b   : > { %1512 = vmatprep.subr.bf16.mxu0 %v2121_v51 }
  0x7e   : > { %1514 = vmatpush1.bf16.msra.mxu0 %v2125_v56 }
  0x7f   : > { %1516 = vmatprep.subr.bf16.mxu0 %v2129_v57 }
  0x82   : > { %1518 = vmatpush1.bf16.msra.mxu0 %v2133_v62 }
  0x83   : > { %1520 = vmatprep.subr.bf16.mxu0 %v2137_v63 }
  0x86   : > { %1522 = vmatpush1.bf16.msra.mxu0 %v2141_v5 }
  0x87   : > { %1524 = vmatprep.subr.bf16.mxu0 %v2145_v6 }
  0x8a   : > { %1526 = vmatpush1.bf16.msra.mxu0 %v2149_v11 }
  0x8b   : > { %1576 = vmatprep.subr.bf16.mxu0 %v2041_v3 }
  0xbb   : > { %v703_v59 = vpop.permute.xlu0 %702 }
 0x130   : > { %v389_v15 = vpop.f32.mrb[0].mxu0 }
 0x131   : > { %v391_v16 = vpop.f32.mrb[1].mxu0  ;;  %v2186_v18 = vmul.f32 0.5, %v389_v15 }
 0x132   : > { %v395_v17 = vmul.f32 0.5, %v391_v16 }
 0x133   : > { %v1625_v34 = vpack.c.bf16 %v2186_v18, %v2156_v12 }
 0x134   : > { %1368 = vmatprep.mubr.msk.f32.mxu1 %vm319_vm0, %v395_v17  ;;  %v1623_v21 = vpack.c.bf16 %v395_v17, %v2091_v32 }
 0x135   : > { %464 = vmatmul.mubr.f32.vlgmr.msra.gmra.mrb[0].mxu1 %v2186_v18 }
 0x136   : > { %1530 = vmatpush1.bf16.msra.mxu1 %v2043_v7 }
 0x137   : > { %1532 = vmatprep.subr.bf16.mxu1 %v2045_v8 }
 0x13a   : > { %1534 = vmatpush1.bf16.msra.mxu1 %v2051_v13 }
 0x13b   : > { %1536 = vmatprep.subr.bf16.mxu1 %v2055_v14 }
 0x13e   : > { %1538 = vmatpush1.bf16.msra.mxu1 %v2064_v19 }
 0x13f   : > { %1540 = vmatprep.subr.bf16.mxu1 %v2068_v20 }
 0x142   : > { %1542 = vmatpush1.bf16.msra.mxu1 %v2073_v25 }
 0x143   : > { %1544 = vmatprep.subr.bf16.mxu1 %v2077_v26 }
 0x146   : > { %1546 = vmatpush1.bf16.msra.mxu1 %v2088_v31 }
 0x147   : > { %1548 = vmatprep.subr.bf16.mxu1 %v2095_v33 }
 0x14a   : > { %1550 = vmatpush1.bf16.msra.mxu1 %v2101_v38 }
 0x14b   : > { %1552 = vmatprep.subr.bf16.mxu1 %v2105_v39 }
 0x14e   : > { %1554 = vmatpush1.bf16.msra.mxu1 %v2109_v44 }
 0x14f   : > { %1556 = vmatprep.subr.bf16.mxu1 %v2113_v45 }
 0x152   : > { %1558 = vmatpush1.bf16.msra.mxu1 %v2117_v50 }
 0x153   : > { %1560 = vmatprep.subr.bf16.mxu1 %v2121_v51 }
 0x156   : > { %1562 = vmatpush1.bf16.msra.mxu1 %v2125_v56 }
 0x157   : > { %1564 = vmatprep.subr.bf16.mxu1 %v2129_v57 }
 0x15a   : > { %1566 = vmatpush1.bf16.msra.mxu1 %v2133_v62 }
 0x15b   : > { %1568 = vmatprep.subr.bf16.mxu1 %v2137_v63 }
 0x15e   : > { %1570 = vmatpush1.bf16.msra.mxu1 %v2141_v5 }
 0x15f   : > { %1572 = vmatprep.subr.bf16.mxu1 %v2145_v6 }
 0x162   : > { %1574 = vmatpush1.bf16.msra.mxu1 %v2149_v11 }
 0x163   : > { %1624 = vmatprep.subr.bf16.mxu1 %v1623_v21 }
 0x208   : > { %v465_v22 = vpop.f32.mrb[0].mxu1 }
 0x209   : > { %v467_v23 = vpop.f32.mrb[1].mxu1  ;;  %v470_v27 = vsub.f32 %v465_v22, %v2156_v12 }
 0x20a   : > { %v471_v24 = vsub.f32 %v467_v23, %v2091_v32 }
 0x20c   : > { %1369 = vmatprep.mubr.msk.f32.mxu0 %vm319_vm0, %v471_v24 }
 0x20d   : > { %540 = vmatmul.mubr.f32.vlgmr.msra.gmra.mrb[2].mxu0 %v470_v27 }
 0x20e   : > { %1578 = vmatpush1.bf16.msra.mxu0 %v2043_v7 }
 0x20f   : > { %1580 = vmatprep.subr.bf16.mxu0 %v2045_v8 }
 0x212   : > { %1582 = vmatpush1.bf16.msra.mxu0 %v2051_v13 }
 0x213   : > { %1584 = vmatprep.subr.bf16.mxu0 %v2055_v14 }
 0x216   : > { %1586 = vmatpush1.bf16.msra.mxu0 %v2064_v19 }
 0x217   : > { %1588 = vmatprep.subr.bf16.mxu0 %v2068_v20 }
 0x21a   : > { %1590 = vmatpush1.bf16.msra.mxu0 %v2073_v25 }
 0x21b   : > { %1592 = vmatprep.subr.bf16.mxu0 %v2077_v26 }
 0x21e   : > { %1594 = vmatpush1.bf16.msra.mxu0 %v2088_v31 }
 0x21f   : > { %1596 = vmatprep.subr.bf16.mxu0 %v2095_v33 }
 0x222   : > { %1598 = vmatpush1.bf16.msra.mxu0 %v2101_v38 }
 0x223   : > { %1600 = vmatprep.subr.bf16.mxu0 %v2105_v39 }
 0x226   : > { %1602 = vmatpush1.bf16.msra.mxu0 %v2109_v44 }
 0x227   : > { %1604 = vmatprep.subr.bf16.mxu0 %v2113_v45 }
 0x22a   : > { %1606 = vmatpush1.bf16.msra.mxu0 %v2117_v50 }
 0x22b   : > { %1608 = vmatprep.subr.bf16.mxu0 %v2121_v51 }
 0x22e   : > { %1610 = vmatpush1.bf16.msra.mxu0 %v2125_v56 }
 0x22f   : > { %1612 = vmatprep.subr.bf16.mxu0 %v2129_v57 }
 0x232   : > { %1614 = vmatpush1.bf16.msra.mxu0 %v2133_v62 }
 0x233   : > { %1616 = vmatprep.subr.bf16.mxu0 %v2137_v63 }
 0x236   : > { %1618 = vmatpush1.bf16.msra.mxu0 %v2141_v5 }
 0x237   : > { %1620 = vmatprep.subr.bf16.mxu0 %v2145_v6 }
 0x23a   : > { %1622 = vmatpush1.bf16.msra.mxu0 %v2149_v11 }
 0x23b   : > { %1684 = vmatprep.subr.bf16.mxu0 %v2041_v3 }
 0x2e0   : > { %v541_v28 = vpop.f32.mrb[2].mxu0 }
 0x2e1   : > { %v543_v29 = vpop.f32.mrb[3].mxu0  ;;  %v546_v32 = vsub.f32 %v541_v28, %v2186_v18 }
 0x2e2   : > { %v547_v30 = vsub.f32 %v543_v29, %v395_v17 }
 0x2e3   : > { %v1629_v36 = vpack.c.bf16 %v546_v32, %v470_v27 }
 0x2e4   : > { %1370 = vmatprep.mubr.msk.f32.mxu1 %vm319_vm0, %v547_v30  ;;  %v1627_v35 = vpack.c.bf16 %v547_v30, %v471_v24 }
 0x2e5   : > { %616 = vmatmul.mubr.f32.vlgmr.msra.gmra.mrb[2].mxu1 %v546_v32 }
 0x2e6   : > { %1626 = vmatpush1.bf16.msra.mxu1 %v1625_v34  ;;  %773 = vmatprep.mubr.f32.mxu1 %v1959_v43 }
 0x2e7   : > { %1628 = vmatprep.subr.bf16.mxu1 %v1627_v35 }
 0x2ea   : > { %1630 = vmatpush1.bf16.msra.mxu1 %v1629_v36 }
 0x3b8   : > { %v617_v37 = vpop.f32.mrb[2].mxu1 }
 0x3b9   : > { %v619_v40 = vpop.f32.mrb[3].mxu1  ;;  %v622_v42 = vsub.f32 %v617_v37, %v470_v27 }
 0x3ba   : > { %v623_v41 = vsub.f32 %v619_v40, %v471_v24 }
 0x3bc   : > { %1371 = vmatprep.mubr.msk.f32.mxu0 %vm319_vm0, %v623_v41 }
 0x3bd   : > { %692 = vmatmul.mubr.f32.vlgmr.msra.gmra.mrb[4].mxu0 %v622_v42 }
 0x3be   : > { %1686 = vmatpush1.bf16.msra.mxu0 %v2043_v7 }
 0x3bf   : > { %1688 = vmatprep.subr.bf16.mxu0 %v2045_v8 }
 0x3c2   : > { %1690 = vmatpush1.bf16.msra.mxu0 %v2051_v13 }
 0x3c3   : > { %1692 = vmatprep.subr.bf16.mxu0 %v2055_v14 }
 0x3c6   : > { %1694 = vmatpush1.bf16.msra.mxu0 %v2064_v19 }
 0x3c7   : > { %1696 = vmatprep.subr.bf16.mxu0 %v2068_v20 }
 0x3ca   : > { %1698 = vmatpush1.bf16.msra.mxu0 %v2073_v25 }
 0x3cb   : > { %1700 = vmatprep.subr.bf16.mxu0 %v2077_v26 }
 0x3ce   : > { %1702 = vmatpush1.bf16.msra.mxu0 %v2088_v31 }
 0x3cf   : > { %1704 = vmatprep.subr.bf16.mxu0 %v2095_v33 }
 0x3d2   : > { %1706 = vmatpush1.bf16.msra.mxu0 %v2101_v38 }
 0x3d3   : > { %1708 = vmatprep.subr.bf16.mxu0 %v2105_v39 }
 0x3d6   : > { %1710 = vmatpush1.bf16.msra.mxu0 %v2109_v44 }
 0x3d7   : > { %1712 = vmatprep.subr.bf16.mxu0 %v2113_v45 }
 0x3da   : > { %1714 = vmatpush1.bf16.msra.mxu0 %v2117_v50 }
 0x3db   : > { %1716 = vmatprep.subr.bf16.mxu0 %v2121_v51 }
 0x3de   : > { %1718 = vmatpush1.bf16.msra.mxu0 %v2125_v56 }
 0x3df   : > { %1720 = vmatprep.subr.bf16.mxu0 %v2129_v57 }
 0x3e2   : > { %1722 = vmatpush1.bf16.msra.mxu0 %v2133_v62 }
 0x3e3   : > { %1724 = vmatprep.subr.bf16.mxu0 %v2137_v63 }
 0x3e6   : > { %1726 = vmatpush1.bf16.msra.mxu0 %v2141_v5 }
 0x3e7   : > { %1728 = vmatprep.subr.bf16.mxu0 %v2145_v6 }
 0x3ea   : > { %1730 = vmatpush1.bf16.msra.mxu0 %v2149_v11 }
 0x3eb   : > { %1780 = vmatprep.subr.bf16.mxu0 %v2041_v3 }
 0x490   : > { %v693_v48 = vpop.f32.mrb[4].mxu0 }
 0x491   : > { %v698_v49 = vsub.f32 %v693_v48, %v546_v32  ;;  %v695_v52 = vpop.f32.mrb[5].mxu0 }
 0x492   : > { %v699_v53 = vsub.f32 %v695_v52, %v547_v30 }
 0x493   : > { %v1633_v55 = vpack.c.bf16 %v698_v49, %v622_v42 }
 0x494   : > { %v1631_v54 = vpack.c.bf16 %v699_v53, %v623_v41 }
 0x496   : > { %1632 = vmatprep.subr.bf16.mxu1 %v1631_v54 }
 0x497   : > { %1634 = vmatpush1.bf16.msra.mxu1 %v1633_v55 }
 0x498   : > { %1636 = vmatprep.subr.bf16.mxu1 %v2041_v3 }
 0x49a   : > { %1372 = vmatmul.mubr.msk.f32.vlgmr.msra.gmra.mrb[4].mxu1 %vm705_vm1, %v317_v58 }
 0x49b   : > { %1638 = vmatpush1.bf16.msra.mxu1 %v2043_v7 }
 0x49c   : > { %1640 = vmatprep.subr.bf16.mxu1 %v2045_v8 }
 0x49f   : > { %1642 = vmatpush1.bf16.msra.mxu1 %v2051_v13 }
 0x4a0   : > { %1644 = vmatprep.subr.bf16.mxu1 %v2055_v14 }
 0x4a3   : > { %1646 = vmatpush1.bf16.msra.mxu1 %v2064_v19 }
 0x4a4   : > { %1648 = vmatprep.subr.bf16.mxu1 %v2068_v20 }
 0x4a7   : > { %1650 = vmatpush1.bf16.msra.mxu1 %v2073_v25 }
 0x4a8   : > { %1652 = vmatprep.subr.bf16.mxu1 %v2077_v26 }
 0x4ab   : > { %1654 = vmatpush1.bf16.msra.mxu1 %v2088_v31 }
 0x4ac   : > { %1656 = vmatprep.subr.bf16.mxu1 %v2095_v33 }
 0x4af   : > { %1658 = vmatpush1.bf16.msra.mxu1 %v2101_v38 }
 0x4b0   : > { %1660 = vmatprep.subr.bf16.mxu1 %v2105_v39 }
 0x4b3   : > { %1662 = vmatpush1.bf16.msra.mxu1 %v2109_v44 }
 0x4b4   : > { %1664 = vmatprep.subr.bf16.mxu1 %v2113_v45 }
 0x4b7   : > { %1666 = vmatpush1.bf16.msra.mxu1 %v2117_v50 }
 0x4b8   : > { %1668 = vmatprep.subr.bf16.mxu1 %v2121_v51 }
 0x4bb   : > { %1670 = vmatpush1.bf16.msra.mxu1 %v2125_v56 }
 0x4bc   : > { %1672 = vmatprep.subr.bf16.mxu1 %v2129_v57 }
 0x4bf   : > { %1674 = vmatpush1.bf16.msra.mxu1 %v2133_v62 }
 0x4c0   : > { %1676 = vmatprep.subr.bf16.mxu1 %v2137_v63 }
 0x4c3   : > { %1678 = vmatpush1.bf16.msra.mxu1 %v2141_v5 }
 0x4c4   : > { %1680 = vmatprep.subr.bf16.mxu1 %v2145_v6 }
 0x4c7   : > { %1682 = vmatpush1.bf16.msra.mxu1 %v2149_v11 }
 0x4c8   : > { %1732 = vmatprep.subr.bf16.mxu1 %v2041_v3 }
 0x56d   : > { %v775_v60 = vpop.f32.mrb[4].mxu1 }
 0x56e   : > { %v776_v61 = vadd.f32 %v775_v60, %v703_v59  ;;  %v777_v0 = vpop.f32.mrb[5].mxu1 }
 0x56f   : > { %v778_v1 = vadd.f32 %v777_v0, %v703_v59 }
 0x570   : > { %v785_v10 = vmul.f32 %v776_v61, %v776_v61 }
 0x571   : > { %v780_v2 = vsel %vm319_vm0, %v778_v1, 0.0  ;;  %v786_v4 = vmul.f32 %v778_v1, %v778_v1 }
 0x572   : > { %v781_v9 = vadd.f32 %v780_v2, %v776_v61 }
 0x573   : > { %v787_v12 = vsel %vm319_vm0, %v786_v4, 0.0 }
 0x574   : > { %782 = vadd.xlane.f32.xlu0 %v781_v9  ;;  %v788_v15 = vadd.f32 %v787_v12, %v785_v10 }
 0x576   : > { %789 = vadd.xlane.f32.xlu1 %v788_v15 }
 0x601   : > { %v783_v16 = vpop.xlane.xlu0 %782 }
 0x602   : > { %v784_v17 = vmul.f32 0.0052083335, %v783_v16 }
 0x603   : > { %v790_v18 = vpop.xlane.xlu1 %789 }
 0x604   : > { %v791_v21 = vmul.f32 0.0052083335, %v790_v18  ;;  %v792_v22 = vmul.f32 %v784_v17, %v784_v17  ;;  %v795_v28 = vsub.f32 %v776_v61, %v784_v17  ;;  %v796_v29 = vsub.f32 %v778_v1, %v784_v17 }
 0x606   : > { %v793_v23 = vsub.f32 %v791_v21, %v792_v22 }
 0x608   : > { %v794_v24 = vmax.f32 %v793_v23, 0.0 }
 0x60a   : > { %v797_v27 = vadd.f32 1e-05, %v794_v24 }
 0x60c   : > { %1912 = vrsqrt.f32 %v797_v27 }
 0x616   : > { %v1913_v30 = vpop.eup %1912 }
 0x617   : > { %v800_v32 = vmul.f32 %v1913_v30, %v796_v29  ;;  %v799_v34 = vmul.f32 %v1913_v30, %v795_v28 }
 0x619   : > { %v802_v35 = vmax.f32 %v800_v32, 0.0  ;;  %v2305_v36 = vmax.f32 %v799_v34, 0.0 }
 0x61b   : > { %1373 = vmatprep.mubr.msk.f32.mxu1 %vm319_vm0, %v802_v35 }
 0x61c   : > { %873 = vmatmul.mubr.f32.vlgmr.msra.gmra.mrb[6].mxu1 %v2305_v36 }
 0x61d   : > { %1734 = vmatpush1.bf16.msra.mxu1 %v2043_v7 }
 0x61e   : > { %1736 = vmatprep.subr.bf16.mxu1 %v2045_v8 }
 0x621   : > { %1738 = vmatpush1.bf16.msra.mxu1 %v2051_v13 }
 0x622   : > { %1740 = vmatprep.subr.bf16.mxu1 %v2055_v14 }
 0x625   : > { %1742 = vmatpush1.bf16.msra.mxu1 %v2064_v19 }
 0x626   : > { %1744 = vmatprep.subr.bf16.mxu1 %v2068_v20 }
 0x629   : > { %1746 = vmatpush1.bf16.msra.mxu1 %v2073_v25 }
 0x62a   : > { %1748 = vmatprep.subr.bf16.mxu1 %v2077_v26 }
 0x62d   : > { %1750 = vmatpush1.bf16.msra.mxu1 %v2088_v31 }
 0x62e   : > { %1752 = vmatprep.subr.bf16.mxu1 %v2095_v33 }
 0x631   : > { %1754 = vmatpush1.bf16.msra.mxu1 %v2101_v38 }
 0x632   : > { %1756 = vmatprep.subr.bf16.mxu1 %v2105_v39 }
 0x635   : > { %1758 = vmatpush1.bf16.msra.mxu1 %v2109_v44 }
 0x636   : > { %1760 = vmatprep.subr.bf16.mxu1 %v2113_v45 }
 0x639   : > { %1762 = vmatpush1.bf16.msra.mxu1 %v2117_v50 }
 0x63a   : > { %1764 = vmatprep.subr.bf16.mxu1 %v2121_v51 }
 0x63d   : > { %1766 = vmatpush1.bf16.msra.mxu1 %v2125_v56 }
 0x63e   : > { %1768 = vmatprep.subr.bf16.mxu1 %v2129_v57 }
 0x641   : > { %1770 = vmatpush1.bf16.msra.mxu1 %v2133_v62 }
 0x642   : > { %1772 = vmatprep.subr.bf16.mxu1 %v2137_v63 }
 0x645   : > { %1774 = vmatpush1.bf16.msra.mxu1 %v2141_v5 }
 0x646   : > { %1776 = vmatprep.subr.bf16.mxu1 %v2145_v6 }
 0x649   : > { %1778 = vmatpush1.bf16.msra.mxu1 %v2149_v11 }
 0x64a   : > { %1828 = vmatprep.subr.bf16.mxu1 %v2041_v3 }
 0x6ef   : > { %v874_v37 = vpop.f32.mrb[6].mxu1 }
 0x6f0   : > { %v876_v40 = vpop.f32.mrb[7].mxu1  ;;  %v2333_v42 = vmul.f32 0.5, %v874_v37 }
 0x6f1   : > { %v880_v41 = vmul.f32 0.5, %v876_v40 }
 0x6f3   : > { %1374 = vmatprep.mubr.msk.f32.mxu0 %vm319_vm0, %v880_v41  ;;  %v1875_v3 = vpack.c.bf16 %v880_v41, %v802_v35 }
 0x6f4   : > { %949 = vmatmul.mubr.f32.vlgmr.msra.gmra.mrb[6].mxu0 %v2333_v42 }
 0x6f5   : > { %1782 = vmatpush1.bf16.msra.mxu0 %v2043_v7 }
 0x6f6   : > { %1784 = vmatprep.subr.bf16.mxu0 %v2045_v8 }
 0x6f9   : > { %1786 = vmatpush1.bf16.msra.mxu0 %v2051_v13 }
 0x6fa   : > { %1788 = vmatprep.subr.bf16.mxu0 %v2055_v14 }
 0x6fd   : > { %1790 = vmatpush1.bf16.msra.mxu0 %v2064_v19 }
 0x6fe   : > { %1792 = vmatprep.subr.bf16.mxu0 %v2068_v20 }
 0x701   : > { %1794 = vmatpush1.bf16.msra.mxu0 %v2073_v25 }
 0x702   : > { %1796 = vmatprep.subr.bf16.mxu0 %v2077_v26 }
 0x705   : > { %1798 = vmatpush1.bf16.msra.mxu0 %v2088_v31 }
 0x706   : > { %1800 = vmatprep.subr.bf16.mxu0 %v2095_v33 }
 0x709   : > { %1802 = vmatpush1.bf16.msra.mxu0 %v2101_v38 }
 0x70a   : > { %1804 = vmatprep.subr.bf16.mxu0 %v2105_v39 }
 0x70d   : > { %1806 = vmatpush1.bf16.msra.mxu0 %v2109_v44 }
 0x70e   : > { %1808 = vmatprep.subr.bf16.mxu0 %v2113_v45 }
 0x711   : > { %1810 = vmatpush1.bf16.msra.mxu0 %v2117_v50 }
 0x712   : > { %1812 = vmatprep.subr.bf16.mxu0 %v2121_v51 }
 0x715   : > { %1814 = vmatpush1.bf16.msra.mxu0 %v2125_v56 }
 0x716   : > { %1816 = vmatprep.subr.bf16.mxu0 %v2129_v57 }
 0x719   : > { %1818 = vmatpush1.bf16.msra.mxu0 %v2133_v62 }
 0x71a   : > { %1820 = vmatprep.subr.bf16.mxu0 %v2137_v63 }
 0x71d   : > { %1822 = vmatpush1.bf16.msra.mxu0 %v2141_v5 }
 0x71e   : > { %1824 = vmatprep.subr.bf16.mxu0 %v2145_v6 }
 0x721   : > { %1826 = vmatpush1.bf16.msra.mxu0 %v2149_v11 }
 0x722   : > { %1876 = vmatprep.subr.bf16.mxu0 %v1875_v3 }
 0x7c7   : > { %v950_v46 = vpop.f32.mrb[6].mxu0 }
 0x7c8   : > { %v952_v47 = vpop.f32.mrb[7].mxu0  ;;  %v955_v49 = vsub.f32 %v950_v46, %v2305_v36 }
 0x7c9   : > { %v956_v48 = vsub.f32 %v952_v47, %v802_v35 }
 0x7cb   : > { %1375 = vmatprep.mubr.msk.f32.mxu1 %vm319_vm0, %v956_v48 }
 0x7cc   : > { %1025 = vmatmul.mubr.f32.vlgmr.msra.gmra.mrb[8].mxu1 %v955_v49 }
 0x7cd   : > { %1830 = vmatpush1.bf16.msra.mxu1 %v2043_v7 }
 0x7ce   : > { %1832 = vmatprep.subr.bf16.mxu1 %v2045_v8 }
 0x7d1   : > { %1834 = vmatpush1.bf16.msra.mxu1 %v2051_v13 }
 0x7d2   : > { %1836 = vmatprep.subr.bf16.mxu1 %v2055_v14 }
 0x7d5   : > { %1838 = vmatpush1.bf16.msra.mxu1 %v2064_v19  ;;  %v1877_v19 = vpack.c.bf16 %v2333_v42, %v2305_v36 }
 0x7d6   : > { %1840 = vmatprep.subr.bf16.mxu1 %v2068_v20 }
 0x7d9   : > { %1842 = vmatpush1.bf16.msra.mxu1 %v2073_v25 }
 0x7da   : > { %1844 = vmatprep.subr.bf16.mxu1 %v2077_v26 }
 0x7dd   : > { %1846 = vmatpush1.bf16.msra.mxu1 %v2088_v31 }
 0x7de   : > { %1848 = vmatprep.subr.bf16.mxu1 %v2095_v33 }
 0x7e1   : > { %1850 = vmatpush1.bf16.msra.mxu1 %v2101_v38 }
 0x7e2   : > { %1852 = vmatprep.subr.bf16.mxu1 %v2105_v39  ;;  %v804_v39 = vld [vmem:[%s2414_s5] sm:$0xff] }
 0x7e3   : > { %1187 = vperm.xlu1 %1911, %v804_v39  }
 0x7e5   : > { %1854 = vmatpush1.bf16.msra.mxu1 %v2109_v44 }
 0x7e6   : > { %1856 = vmatprep.subr.bf16.mxu1 %v2113_v45 }
 0x7e9   : > { %1858 = vmatpush1.bf16.msra.mxu1 %v2117_v50 }
 0x7ea   : > { %1860 = vmatprep.subr.bf16.mxu1 %v2121_v51 }
 0x7ed   : > { %1862 = vmatpush1.bf16.msra.mxu1 %v2125_v56 }
 0x7ee   : > { %1864 = vmatprep.subr.bf16.mxu1 %v2129_v57 }
 0x7f1   : > { %1866 = vmatpush1.bf16.msra.mxu1 %v2133_v62  ;;  %v803_v62 = vld [vmem:[%s2413_s4] sm:$0xff] }
 0x7f2   : > { %1868 = vmatprep.subr.bf16.mxu1 %v2137_v63 }
 0x7f5   : > { %1870 = vmatpush1.bf16.msra.mxu1 %v2141_v5 }
 0x7f6   : > { %1872 = vmatprep.subr.bf16.mxu1 %v2145_v6 }
 0x7f9   : > { %1874 = vmatpush1.bf16.msra.mxu1 %v2149_v11 }
 0x862   : > { %v1188_v63 = vpop.permute.xlu1 %1187 }
 0x89f   : > { %v1026_v7 = vpop.f32.mrb[8].mxu1 }
 0x8a0   : > { %v1028_v8 = vpop.f32.mrb[9].mxu1  ;;  %v1031_v14 = vsub.f32 %v1026_v7, %v2333_v42 }
 0x8a1   : > { %v1032_v13 = vsub.f32 %v1028_v8, %v880_v41 }
 0x8a2   : > { %v1881_v25 = vpack.c.bf16 %v1031_v14, %v955_v49 }
 0x8a3   : > { %1376 = vmatprep.mubr.msk.f32.mxu0 %vm319_vm0, %v1032_v13  ;;  %v1879_v20 = vpack.c.bf16 %v1032_v13, %v956_v48 }
 0x8a4   : > { %1101 = vmatmul.mubr.f32.vlgmr.msra.gmra.mrb[8].mxu0 %v1031_v14 }
 0x8a5   : > { %1878 = vmatpush1.bf16.msra.mxu0 %v1877_v19  ;;  %1257 = vmatprep.mubr.f32.mxu0 %v1959_v43 }
 0x8a6   : > { %1880 = vmatprep.subr.bf16.mxu0 %v1879_v20 }
 0x8a9   : > { %1882 = vmatpush1.bf16.msra.mxu0 %v1881_v25 }
 0x977   : > { %v1102_v26 = vpop.f32.mrb[8].mxu0 }
 0x978   : > { %v1104_v31 = vpop.f32.mrb[9].mxu0  ;;  %v1107_v38 = vsub.f32 %v1102_v26, %v955_v49 }
 0x979   : > { %v1108_v33 = vsub.f32 %v1104_v31, %v956_v48 }
 0x97b   : > { %1377 = vmatprep.mubr.msk.f32.mxu1 %vm319_vm0, %v1108_v33 }
 0x97c   : > { %1177 = vmatmul.mubr.f32.vlgmr.msra.gmra.mrb[10].mxu1 %v1107_v38 }
 0xa4f   : > { %v1178_v44 = vpop.f32.mrb[10].mxu1 }
 0xa50   : > { %v1183_v45 = vsub.f32 %v1178_v44, %v1031_v14  ;;  %v1180_v50 = vpop.f32.mrb[11].mxu1 }
 0xa51   : > { %v1184_v51 = vsub.f32 %v1180_v50, %v1032_v13 }
 0xa52   : > { %v1885_v57 = vpack.c.bf16 %v1183_v45, %v1107_v38 }
 0xa53   : > { %v1883_v56 = vpack.c.bf16 %v1184_v51, %v1108_v33 }
 0xa55   : > { %1884 = vmatprep.subr.bf16.mxu0 %v1883_v56 }
 0xa56   : > { %1886 = vmatpush1.bf16.msra.mxu0 %v1885_v57 }
 0xa59   : > { %1378 = vmatmul.mubr.msk.f32.vlgmr.msra.gmra.mrb[10].mxu0 %vm705_vm1, %v803_v62 }
 0xb2c   : > { %v1259_v5 = vpop.f32.mrb[10].mxu0 }
 0xb2d   : > { %v1260_v6 = vadd.f32 %v1259_v5, %v1188_v63  ;;  %v1261_v11 = vpop.f32.mrb[11].mxu0 }
 0xb2e   : > { %v1262_v43 = vadd.f32 %v1261_v11, %v1188_v63 }
 0xb2f   : > { %v1269_v55 = vmul.f32 %v1260_v6, %v1260_v6 }
 0xb30   : > { %v1264_v52 = vsel %vm319_vm0, %v1262_v43, 0.0  ;;  %v1270_v53 = vmul.f32 %v1262_v43, %v1262_v43 }
 0xb31   : > { %v1265_v54 = vadd.f32 %v1264_v52, %v1260_v6 }
 0xb32   : > { %v1271_v58 = vsel %vm319_vm0, %v1270_v53, 0.0 }
 0xb33   : > { %1266 = vadd.xlane.f32.xlu1 %v1265_v54  ;;  %v1272_v59 = vadd.f32 %v1271_v58, %v1269_v55 }
 0xb35   : > { %1273 = vadd.xlane.f32.xlu0 %v1272_v59 }
 0xbc0   : > { %v1267_v60 = vpop.xlane.xlu1 %1266 }
 0xbc1   : > { %v1268_v61 = vmul.f32 0.0052083335, %v1267_v60 }
 0xbc2   : > { %v1274_v0 = vpop.xlane.xlu0 %1273 }
 0xbc3   : > { %v1275_v1 = vmul.f32 0.0052083335, %v1274_v0  ;;  %v1276_v2 = vmul.f32 %v1268_v61, %v1268_v61  ;;  %v1279_v12 = vsub.f32 %v1260_v6, %v1268_v61  ;;  %v1280_v15 = vsub.f32 %v1262_v43, %v1268_v61 }
 0xbc5   : > { %v1277_v4 = vsub.f32 %v1275_v1, %v1276_v2 }
 0xbc7   : > { %v1278_v9 = vmax.f32 %v1277_v4, 0.0 }
 0xbc9   : > { %v1281_v10 = vadd.f32 1e-05, %v1278_v9 }
 0xbcb   : > { %1914 = vrsqrt.f32 %v1281_v10 }
 0xbd5   : > { %v1915_v16 = vpop.eup %1914 }
 0xbd6   : > { %v1283_v17 = vmul.f32 %v1915_v16, %v1279_v12  ;;  %v1284_v18 = vmul.f32 %v1915_v16, %v1280_v15 }
 0xbd8   : > { %v1285_v21 = vmax.f32 %v1283_v17, 0.0  ;;  %v1286_v22 = vmax.f32 %v1284_v18, 0.0 }
 0xbda   : > { %1287 = vst [vmem:[%s266_s7] sm:$0xff] %v1285_v21  ;;  %1288 = vst.msk [vmem:[%s266_s7 + $0x8] sm:$0xff] %vm319_vm0, %v1286_v22 }
 0xbdb PF: > { %s17_s21 = sadd.s32 1, %s1954_s21  }
 0xbdc   : > { %p14_p3 = scmp.ge.s32.totalorder %s17_s21, 4  }
 0xbde   :  { %16 = sbr.rel (!%p14_p3) target bundleno = 1 (0x1), region = 79 }
 0xbe5   :  { %1310 = vsyncpa [#allocation3], 1 }
 0xbe6   :  { %1312 = vsyncpa [#allocation3 + $0x1], 1 }

// kernel: forward.6
= control target key start
LH: loop header
LB: loop body
LE: loop exit
PB: predicated region body
PF: predicated region fallthrough
CT: control target
= control target key end

     0   :  { %s1887_s21 = smov 0   ;;  %s2033_s0 = inlined_call_operand.vmem [shape: f32[2,8,48], index: 0, kind: input, shape index: {}]   ;;  %s2034_s1 = inlined_call_operand.vmem [shape: f32[48,48], index: 1, kind: input, shape index: {}]   ;;  %s2035_s2 = inlined_call_operand.vmem [shape: f32[16,48], index: 2, kind: input, shape index: {}]   ;;  %s2036_s3 = inlined_call_operand.vmem [shape: f32[16,1], index: 3, kind: input, shape index: {}, may-alias: {3,5}]   ;;  %s2037_s4 = inlined_call_operand.vmem [shape: f32[16,96], index: 4, kind: input, shape index: {}]   ;;  %s2038_s5 = inlined_call_operand.vmem [shape: f32[16,1], index: 5, kind: input, shape index: {}, may-alias: {3,5}]   ;;  %s2039_s6 = inlined_call_operand.vmem [shape: f32[2,16,48], index: 6, kind: output, shape index: {}]  }
   0x1 LB: > { %s1358_s22 = sadd.s32 4294967295, %s1846_s21   ;;  %p1362_p0 = scmp.ge.s32.totalorder %s1846_s21, 1  ;;  %s1846_s21 = sphi %s1887_s21, %s16_s21  }
   0x2   : > { %p211_p1 = scmp.lt.s32.totalorder %s1846_s21, 3 }
   0x4   : > { %p212_p2 = pnand %p1362_p0, %p211_p1 }
   0x5   : > { %v249_v0 = vld [vmem:[%s2034_s1] sm:$0xff] (!%p212_p2)  ;;  %v250_v1 = vld [vmem:[%s2034_s1 + $0x8] sm:$0xff] (!%p212_p2)  ;;  %v251_v2 = vld [vmem:[%s2034_s1 + $0x10] sm:$0xff] (!%p212_p2)  ;;  %v1848_v3 = vmov (!%p212_p2), 0.0|0.0   ;;  %vm1849_vm0 = vmmov (!%p212_p2), 0   ;;  %v1850_v6 = vmov (!%p212_p2), 0.0  }
   0x6   : > { %215 = sbr.rel (%p212_p2) target bundleno = 2957 (0xb8d), region = 44  ;;  %1677 = vmatprep.subr.bf16.mxu0 (!%p212_p2), %v1848_v3  ;;  %v1904_v4 = vpack.c.bf16 (!%p212_p2), %v250_v1, %v249_v0  ;;  %v252_v5 = vld [vmem:[%s2034_s1 + $0x18] sm:$0xff] (!%p212_p2)  ;;  %1497 = vmatprep.mubr.msk.f32.mxu0 (!%p212_p2), %vm1849_vm0, %v1850_v6  ;;  %p240_p3 = scmp.lt.s32.totalorder (!%p212_p2), %s1358_s22, 1  ;;  %v253_v8 = vld [vmem:[%s2034_s1 + $0x20] sm:$0xff] (!%p212_p2)  ;;  %v254_v9 = vld [vmem:[%s2034_s1 + $0x28] sm:$0xff] (!%p212_p2)  ;;  %vm260_vm1 = vcmask (!%p212_p2), 392192  }
   0x7   : > { %1686 = vmatprep.subr.bf16.mxu1 (!%p212_p2), %v1848_v3  ;;  %1512 = vmatprep.mubr.msk.f32.mxu1 (!%p212_p2), %vm1849_vm0, %v1850_v6  ;;  %v1912_v7 = vpack.c.bf16 (!%p212_p2), %v252_v5, %v251_v2  ;;  %v1925_v10 = vpack.c.bf16 (!%p212_p2), %v254_v9, %v253_v8  ;;  %v256_v26 = vld [vmem:[%s2035_s2] sm:$0xff] (!%p212_p2)  ;;  %v1851_v28 = vmov (!%p212_p2), 0   ;;  %v259_v29 = vld [vmem:[%s2036_s3 + $0x8] sm:$0xff] (!%p212_p2)  ;;  %vm1185_vm2 = vcmask (!%p212_p2), 785408  }
   0x8   : > { %1679 = vmatpush3.bf16.msra.mxu0 (!%p212_p2), %v1904_v4  ;;  %1688 = vmatpush3.bf16.msra.mxu1 (!%p212_p2), %v1904_v4  ;;  %v258_v27 = vld [vmem:[%s2036_s3] sm:$0xff] (!%p212_p2)  ;;  %v257_v34 = vld [vmem:[%s2035_s2 + $0x8] sm:$0xff] (!%p212_p2) }
   0x9   : > { %1680 = vmatprep.subr.bf16.mxu0 (!%p212_p2), %v1848_v3  ;;  %1689 = vmatprep.subr.bf16.mxu1 (!%p212_p2), %v1848_v3 }
   0xa   : > { %1830 = vset.pattern.permute.xlu0 (!%p212_p2), %v1851_v28  ;;  %1831 = vset.pattern.permute.xlu1 (!%p212_p2), %v1851_v28  ;;  %v756_v28 = vld [vmem:[%s2037_s4] sm:$0xff] (!%p212_p2) }
   0xb   : > { %633 = vperm.xlu0 (!%p212_p2), %1830, %v258_v27  }
   0xc   : > { %1682 = vmatpush3.bf16.msra.mxu0 (!%p212_p2), %v1912_v7  ;;  %1691 = vmatpush3.bf16.msra.mxu1 (!%p212_p2), %v1912_v7 }
   0xd   : > { %s2041_s22 = smov (!%p240_p3, %s1358_s22), 1  ;;  %1683 = vmatprep.subr.bf16.mxu0 %v1848_v3  ;;  %1692 = vmatprep.subr.bf16.mxu1 %v1848_v3 }
   0xe   : > { %s1363_s11 = sshll.u32 %s2041_s22, 3  ;;  %s1387_s9 = sshll.u32 %s2041_s22, 4 }
   0xf   : > { %s243_s14 = scalar_lea.vmem %s2033_s0, %s1363_s11  ;;  %638 = vperm.xlu0 %1830, %v259_v29   ;;  %v758_v29 = vld [vmem:[%s2038_s5] sm:$0xff]  ;;  %s248_s12 = scalar_lea.vmem %s2039_s6, %s1387_s9 }
  0x10   : > { %1685 = vmatpush3.bf16.msra.mxu0 %v1925_v10  ;;  %v255_v11 = vld [vmem:[%s243_s14] sm:$0xff]  ;;  %1694 = vmatpush3.bf16.msra.mxu1 %v1925_v10 }
  0x11   : > { %1704 = vmatprep.subr.bf16.mxu1 %v1848_v3  ;;  %1695 = vmatprep.subr.bf16.mxu0 %v1848_v3 }
  0x13   : > { %1498 = vmatmul.mubr.msk.f32.vlgmr.msra.gmra.mrb[0].mxu0 %vm260_vm1, %v255_v11 }
  0x14   : > { %1697 = vmatpush3.bf16.msra.mxu0 %v1904_v4  ;;  %1527 = vmatprep.mubr.msk.f32.mxu0 %vm1849_vm0, %v1850_v6 }
  0x15   : > { %1698 = vmatprep.subr.bf16.mxu0 %v1848_v3 }
  0x18   : > { %1700 = vmatpush3.bf16.msra.mxu0 %v1912_v7 }
  0x19   : > { %1701 = vmatprep.subr.bf16.mxu0 %v1848_v3 }
  0x1c   : > { %1703 = vmatpush3.bf16.msra.mxu0 %v1925_v10 }
  0x1d   : > { %1713 = vmatprep.subr.bf16.mxu0 %v1848_v3 }
  0x8a   : > { %v634_v35 = vpop.permute.xlu0 %633 }
  0x8e   : > { %v639_v36 = vpop.permute.xlu0 %638 }
  0xe6   : > { %v330_v12 = vpop.f32.mrb[0].mxu0 }
  0xe7   : > { %v334_v13 = vmul.f32 0.5, %v330_v12  ;;  %v1499_v14 = vpop.f32.mrb[1].mxu0 }
  0xe9   : > { %1513 = vmatmul.mubr.msk.f32.vlgmr.msra.gmra.mrb[0].mxu1 %vm260_vm1, %v334_v13  ;;  %v1722_v15 = vpack.c.bf16 %v334_v13, %v255_v11 }
  0xea   : > { %1706 = vmatpush3.bf16.msra.mxu1 %v1904_v4  ;;  %1542 = vmatprep.mubr.msk.f32.mxu1 %vm1849_vm0, %v1850_v6 }
  0xeb   : > { %1707 = vmatprep.subr.bf16.mxu1 %v1848_v3 }
  0xee   : > { %1709 = vmatpush3.bf16.msra.mxu1 %v1912_v7 }
  0xef   : > { %1710 = vmatprep.subr.bf16.mxu1 %v1848_v3 }
  0xf2   : > { %1712 = vmatpush3.bf16.msra.mxu1 %v1925_v10 }
  0xf3   : > { %1723 = vmatprep.subr.bf16.mxu1 %v1722_v15 }
 0x1bc   : > { %v404_v16 = vpop.f32.mrb[0].mxu1 }
 0x1bd   : > { %v408_v17 = vsub.f32 %v404_v16, %v255_v11  ;;  %v1514_v18 = vpop.f32.mrb[1].mxu1 }
 0x1bf   : > { %1528 = vmatmul.mubr.msk.f32.vlgmr.msra.gmra.mrb[2].mxu0 %vm260_vm1, %v408_v17 }
 0x1c0   : > { %1715 = vmatpush3.bf16.msra.mxu0 %v1904_v4  ;;  %1557 = vmatprep.mubr.msk.f32.mxu0 %vm1849_vm0, %v1850_v6 }
 0x1c1   : > { %1716 = vmatprep.subr.bf16.mxu0 %v1848_v3 }
 0x1c4   : > { %1718 = vmatpush3.bf16.msra.mxu0 %v1912_v7 }
 0x1c5   : > { %1719 = vmatprep.subr.bf16.mxu0 %v1848_v3 }
 0x1c8   : > { %1721 = vmatpush3.bf16.msra.mxu0 %v1925_v10 }
 0x1c9   : > { %1735 = vmatprep.subr.bf16.mxu0 %v1904_v4 }
 0x292   : > { %v478_v19 = vpop.f32.mrb[2].mxu0 }
 0x293   : > { %v482_v20 = vsub.f32 %v478_v19, %v334_v13  ;;  %v1529_v21 = vpop.f32.mrb[3].mxu0 }
 0x295   : > { %1543 = vmatmul.mubr.msk.f32.vlgmr.msra.gmra.mrb[2].mxu1 %vm260_vm1, %v482_v20  ;;  %v1726_v22 = vpack.c.bf16 %v482_v20, %v408_v17 }
 0x296   : > { %1725 = vmatpush3.bf16.msra.mxu1 %v1722_v15  ;;  %1572 = vmatprep.mubr.msk.f32.mxu1 %vm260_vm1, %v256_v26 }
 0x297   : > { %1727 = vmatprep.subr.bf16.mxu1 %v1726_v22 }
 0x29a   : > { %1729 = vmatpush3.bf16.msra.mxu1 %v1726_v22 }
 0x368   : > { %v552_v23 = vpop.f32.mrb[2].mxu1 }
 0x369   : > { %v556_v24 = vsub.f32 %v552_v23, %v408_v17  ;;  %v1544_v25 = vpop.f32.mrb[3].mxu1 }
 0x36b   : > { %1558 = vmatmul.mubr.msk.f32.vlgmr.msra.gmra.mrb[4].mxu0 %vm260_vm1, %v556_v24 }
 0x36c   : > { %1737 = vmatpush3.bf16.msra.mxu0 %v1904_v4 }
 0x36d   : > { %1739 = vmatprep.subr.bf16.mxu0 %v1912_v7 }
 0x370   : > { %1741 = vmatpush3.bf16.msra.mxu0 %v1912_v7 }
 0x371   : > { %1743 = vmatprep.subr.bf16.mxu0 %v1925_v10 }
 0x374   : > { %1745 = vmatpush3.bf16.msra.mxu0 %v1925_v10 }
 0x375   : > { %1759 = vmatprep.subr.bf16.mxu0 %v1904_v4 }
 0x43e   : > { %v626_v30 = vpop.f32.mrb[4].mxu0 }
 0x43f   : > { %v630_v31 = vsub.f32 %v626_v30, %v482_v20  ;;  %v1559_v32 = vpop.f32.mrb[5].mxu0  ;;  %v759_v30 = vld [vmem:[%s2038_s5 + $0x8] sm:$0xff] }
 0x441   : > { %v1730_v33 = vpack.c.bf16 %v630_v31, %v556_v24 }
 0x443   : > { %1731 = vmatprep.subr.bf16.mxu1 %v1730_v33 }
 0x444   : > { %1733 = vmatpush3.bf16.msra.mxu1 %v1730_v33 }
 0x445   : > { %1747 = vmatprep.subr.bf16.mxu1 %v1904_v4 }
 0x447   : > { %1573 = vmatmul.mubr.msk.f32.vlgmr.msra.gmra.mrb[4].mxu1 %vm260_vm1, %v257_v34 }
 0x448   : > { %1749 = vmatpush3.bf16.msra.mxu1 %v1904_v4 }
 0x449   : > { %1751 = vmatprep.subr.bf16.mxu1 %v1912_v7 }
 0x44c   : > { %1753 = vmatpush3.bf16.msra.mxu1 %v1912_v7 }
 0x44d   : > { %1755 = vmatprep.subr.bf16.mxu1 %v1925_v10 }
 0x450   : > { %1757 = vmatpush3.bf16.msra.mxu1 %v1925_v10 }
 0x451   : > { %1771 = vmatprep.subr.bf16.mxu1 %v1904_v4 }
 0x51a   : > { %v1574_v37 = vpop.f32.mrb[4].mxu1 }
 0x51b   : > { %v719_v38 = vadd.f32 %v1574_v37, %v639_v36  ;;  %v713_v39 = vpop.f32.mrb[5].mxu1  ;;  %v757_v36 = vld [vmem:[%s2037_s4 + $0x8] sm:$0xff] }
 0x51c   : > { %v714_v40 = vadd.f32 %v713_v39, %v634_v35 }
 0x51d   : > { %v725_v41 = vsel %vm260_vm1, %v719_v38, 0.0  ;;  %v731_v45 = vmul.f32 %v719_v38, %v719_v38 }
 0x51e   : > { %726 = vadd.xlane.f32.xlu1 %v725_v41  ;;  %v730_v42 = vmul.f32 %v714_v40, %v714_v40  ;;  %v722_v44 = vsel %vm260_vm1, %v714_v40, 0.0 }
 0x51f   : > { %v735_v46 = vsel %vm260_vm1, %v731_v45, 0.0 }
 0x520   : > { %v732_v43 = vsel %vm260_vm1, %v730_v42, 0.0 }
 0x521   : > { %733 = vadd.xlane.f32.xlu0 %v732_v43 }
 0x522   : > { %723 = vadd.xlane.f32.xlu1 %v722_v44 }
 0x526   : > { %736 = vadd.xlane.f32.xlu1 %v735_v46 }
 0x537   : > { %1177 = vperm.xlu1 %1831, %v758_v29  }
 0x53b   : > { %1182 = vperm.xlu1 %1831, %v759_v30  }
 0x5ab   : > { %v727_v47 = vpop.xlane.xlu1 %726 }
 0x5ac   : > { %v729_v50 = vmul.f32 0.020833334, %v727_v47 }
 0x5ae   : > { %v734_v48 = vpop.xlane.xlu0 %733  ;;  %v741_v55 = vmul.f32 %v729_v50, %v729_v50  ;;  %v747_v1 = vsub.f32 %v719_v38, %v729_v50 }
 0x5af   : > { %v724_v49 = vpop.xlane.xlu1 %723  ;;  %v738_v52 = vmul.f32 0.020833334, %v734_v48 }
 0x5b0   : > { %v728_v51 = vmul.f32 0.020833334, %v724_v49 }
 0x5b2   : > { %v740_v53 = vmul.f32 %v728_v51, %v728_v51  ;;  %v746_v63 = vsub.f32 %v714_v40, %v728_v51 }
 0x5b3   : > { %v737_v54 = vpop.xlane.xlu1 %736 }
 0x5b4   : > { %v742_v56 = vsub.f32 %v738_v52, %v740_v53  ;;  %v739_v57 = vmul.f32 0.020833334, %v737_v54 }
 0x5b6   : > { %v744_v58 = vmax.f32 %v742_v56, 0.0  ;;  %v743_v59 = vsub.f32 %v739_v57, %v741_v55 }
 0x5b7   : > { %v1178_v37 = vpop.permute.xlu1 %1177 }
 0x5b8   : > { %v748_v60 = vadd.f32 1e-05, %v744_v58  ;;  %v745_v61 = vmax.f32 %v743_v59, 0.0 }
 0x5ba   : > { %1832 = vrsqrt.f32 %v748_v60  ;;  %v749_v62 = vadd.f32 1e-05, %v745_v61 }
 0x5bb   : > { %v1183_v38 = vpop.permute.xlu1 %1182 }
 0x5bc   : > { %1834 = vrsqrt.f32 %v749_v62 }
 0x5c4   : > { %v1833_v0 = vpop.eup %1832 }
 0x5c5   : > { %v752_v2 = vmul.f32 %v1833_v0, %v746_v63 }
 0x5c6   : > { %v1835_v3 = vpop.eup %1834 }
 0x5c7   : > { %v754_v5 = vmax.f32 %v752_v2, 0.0  ;;  %v753_v6 = vmul.f32 %v1835_v3, %v747_v1 }
 0x5c9   : > { %1587 = vmatprep.mubr.msk.f32.mxu0 %vm260_vm1, %v754_v5  ;;  %v755_v8 = vmax.f32 %v753_v6, 0.0 }
 0x5cb   : > { %1588 = vmatmul.mubr.msk.f32.vlgmr.msra.gmra.mrb[6].mxu0 %vm260_vm1, %v755_v8  ;;  %v1794_v14 = vpack.c.bf16 %v755_v8, %v754_v5 }
 0x5cc   : > { %1761 = vmatpush3.bf16.msra.mxu0 %v1904_v4 }
 0x5cd   : > { %1763 = vmatprep.subr.bf16.mxu0 %v1912_v7 }
 0x5d0   : > { %1765 = vmatpush3.bf16.msra.mxu0 %v1912_v7 }
 0x5d1   : > { %1767 = vmatprep.subr.bf16.mxu0 %v1925_v10 }
 0x5d4   : > { %1769 = vmatpush3.bf16.msra.mxu0 %v1925_v10 }
 0x5d5   : > { %1783 = vmatprep.subr.bf16.mxu0 %v1904_v4 }
 0x69e   : > { %v1589_v9 = vpop.f32.mrb[6].mxu0 }
 0x69f   : > { %v832_v11 = vpop.f32.mrb[7].mxu0  ;;  %v842_v13 = vmul.f32 0.5, %v1589_v9 }
 0x6a0   : > { %v841_v12 = vmul.f32 0.5, %v832_v11 }
 0x6a2   : > { %1602 = vmatprep.mubr.msk.f32.mxu1 %vm260_vm1, %v841_v12  ;;  %v1798_v23 = vpack.c.bf16 %v842_v13, %v841_v12 }
 0x6a3   : > { %1603 = vmatmul.mubr.msk.f32.vlgmr.msra.gmra.mrb[6].mxu1 %vm260_vm1, %v842_v13 }
 0x6a4   : > { %1773 = vmatpush3.bf16.msra.mxu1 %v1904_v4 }
 0x6a5   : > { %1775 = vmatprep.subr.bf16.mxu1 %v1912_v7 }
 0x6a8   : > { %1777 = vmatpush3.bf16.msra.mxu1 %v1912_v7 }
 0x6a9   : > { %1779 = vmatprep.subr.bf16.mxu1 %v1925_v10 }
 0x6ac   : > { %1781 = vmatpush3.bf16.msra.mxu1 %v1925_v10 }
 0x6ad   : > { %1795 = vmatprep.subr.bf16.mxu1 %v1794_v14 }
 0x776   : > { %v1604_v15 = vpop.f32.mrb[6].mxu1 }
 0x777   : > { %v915_v16 = vpop.f32.mrb[7].mxu1  ;;  %v925_v18 = vsub.f32 %v1604_v15, %v755_v8 }
 0x778   : > { %v924_v17 = vsub.f32 %v915_v16, %v754_v5 }
 0x77a   : > { %1617 = vmatprep.mubr.msk.f32.mxu0 %vm260_vm1, %v924_v17 }
 0x77b   : > { %1618 = vmatmul.mubr.msk.f32.vlgmr.msra.gmra.mrb[8].mxu0 %vm260_vm1, %v925_v18 }
 0x77c   : > { %1785 = vmatpush3.bf16.msra.mxu0 %v1904_v4  ;;  %v1802_v4 = vpack.c.bf16 %v925_v18, %v924_v17 }
 0x77d   : > { %1787 = vmatprep.subr.bf16.mxu0 %v1912_v7 }
 0x780   : > { %1789 = vmatpush3.bf16.msra.mxu0 %v1912_v7 }
 0x781   : > { %1791 = vmatprep.subr.bf16.mxu0 %v1925_v10 }
 0x784   : > { %1793 = vmatpush3.bf16.msra.mxu0 %v1925_v10 }
 0x84e   : > { %v1619_v19 = vpop.f32.mrb[8].mxu0 }
 0x84f   : > { %v998_v20 = vpop.f32.mrb[9].mxu0  ;;  %v1008_v22 = vsub.f32 %v1619_v19, %v842_v13 }
 0x850   : > { %v1007_v21 = vsub.f32 %v998_v20, %v841_v12 }
 0x852   : > { %1632 = vmatprep.mubr.msk.f32.mxu1 %vm260_vm1, %v1007_v21  ;;  %v1806_v24 = vpack.c.bf16 %v1008_v22, %v1007_v21 }
 0x853   : > { %1633 = vmatmul.mubr.msk.f32.vlgmr.msra.gmra.mrb[8].mxu1 %vm260_vm1, %v1008_v22 }
 0x854   : > { %1797 = vmatpush3.bf16.msra.mxu1 %v1794_v14  ;;  %1674 = vmatprep.mubr.msk.f32.mxu1 %vm1185_vm2, %v756_v28 }
 0x855   : > { %1799 = vmatprep.subr.bf16.mxu1 %v1798_v23 }
 0x858   : > { %1801 = vmatpush3.bf16.msra.mxu1 %v1798_v23 }
 0x859   : > { %1803 = vmatprep.subr.bf16.mxu1 %v1802_v4 }
 0x85c   : > { %1805 = vmatpush3.bf16.msra.mxu1 %v1802_v4 }
 0x85d   : > { %1807 = vmatprep.subr.bf16.mxu1 %v1806_v24 }
 0x860   : > { %1809 = vmatpush3.bf16.msra.mxu1 %v1806_v24 }
 0x926   : > { %v1634_v7 = vpop.f32.mrb[8].mxu1 }
 0x927   : > { %v1091_v10 = vsub.f32 %v1634_v7, %v925_v18  ;;  %v1081_v25 = vpop.f32.mrb[9].mxu1 }
 0x928   : > { %v1090_v26 = vsub.f32 %v1081_v25, %v924_v17 }
 0x92a   : > { %v1810_v27 = vpack.c.bf16 %v1091_v10, %v1090_v26  ;;  %1647 = vmatprep.mubr.msk.f32.mxu0 %vm260_vm1, %v1090_v26 }
 0x92b   : > { %1648 = vmatmul.mubr.msk.f32.vlgmr.msra.gmra.mrb[10].mxu0 %vm260_vm1, %v1091_v10 }
 0x92c   : > { %1811 = vmatprep.subr.bf16.mxu1 %v1810_v27 }
 0x92d   : > { %1813 = vmatpush3.bf16.msra.mxu1 %v1810_v27 }
 0x9fe   : > { %v1649_v31 = vpop.f32.mrb[10].mxu0 }
 0x9ff   : > { %v1174_v32 = vsub.f32 %v1649_v31, %v1008_v22  ;;  %v1164_v33 = vpop.f32.mrb[11].mxu0 }
 0xa00   : > { %v1173_v34 = vsub.f32 %v1164_v33, %v1007_v21 }
 0xa02   : > { %v1814_v35 = vpack.c.bf16 %v1174_v32, %v1173_v34 }
 0xa04   : > { %1815 = vmatprep.subr.bf16.mxu1 %v1814_v35 }
 0xa05   : > { %1817 = vmatpush3.bf16.msra.mxu1 %v1814_v35 }
 0xa08   : > { %1675 = vmatmul.mubr.msk.f32.vlgmr.msra.gmra.mrb[10].mxu1 %vm1185_vm2, %v757_v36 }
 0xadb   : > { %v1676_v39 = vpop.f32.mrb[10].mxu1 }
 0xadc   : > { %v1264_v40 = vadd.f32 %v1676_v39, %v1183_v38  ;;  %v1258_v41 = vpop.f32.mrb[11].mxu1 }
 0xadd   : > { %v1259_v42 = vadd.f32 %v1258_v41, %v1178_v37 }
 0xade   : > { %v1270_v43 = vsel %vm260_vm1, %v1264_v40, 0.0  ;;  %v1276_v47 = vmul.f32 %v1264_v40, %v1264_v40 }
 0xadf   : > { %1271 = vadd.xlane.f32.xlu0 %v1270_v43  ;;  %v1267_v44 = vsel %vm260_vm1, %v1259_v42, 0.0  ;;  %v1275_v45 = vmul.f32 %v1259_v42, %v1259_v42 }
 0xae0   : > { %1268 = vadd.xlane.f32.xlu1 %v1267_v44  ;;  %v1280_v48 = vsel %vm260_vm1, %v1276_v47, 0.0 }
 0xae1   : > { %v1277_v46 = vsel %vm260_vm1, %v1275_v45, 0.0 }
 0xae3   : > { %1278 = vadd.xlane.f32.xlu0 %v1277_v46 }
 0xae7   : > { %1281 = vadd.xlane.f32.xlu0 %v1280_v48 }
 0xb6c   : > { %v1272_v49 = vpop.xlane.xlu0 %1271 }
 0xb6d   : > { %v1269_v50 = vpop.xlane.xlu1 %1268  ;;  %v1274_v54 = vmul.f32 0.020833334, %v1272_v49 }
 0xb6e   : > { %v1273_v51 = vmul.f32 0.020833334, %v1269_v50 }
 0xb6f   : > { %v1286_v58 = vmul.f32 %v1274_v54, %v1274_v54  ;;  %v1292_v5 = vsub.f32 %v1264_v40, %v1274_v54 }
 0xb70   : > { %v1285_v52 = vmul.f32 %v1273_v51, %v1273_v51  ;;  %v1279_v53 = vpop.xlane.xlu0 %1278  ;;  %v1291_v1 = vsub.f32 %v1259_v42, %v1273_v51 }
 0xb71   : > { %v1283_v55 = vmul.f32 0.020833334, %v1279_v53 }
 0xb73   : > { %v1287_v56 = vsub.f32 %v1283_v55, %v1285_v52 }
 0xb74   : > { %v1282_v57 = vpop.xlane.xlu0 %1281 }
 0xb75   : > { %v1289_v59 = vmax.f32 %v1287_v56, 0.0  ;;  %v1284_v60 = vmul.f32 0.020833334, %v1282_v57 }
 0xb77   : > { %v1293_v61 = vadd.f32 1e-05, %v1289_v59  ;;  %v1288_v62 = vsub.f32 %v1284_v60, %v1286_v58 }
 0xb79   : > { %1836 = vrsqrt.f32 %v1293_v61  ;;  %v1290_v63 = vmax.f32 %v1288_v62, 0.0 }
 0xb7b   : > { %v1294_v0 = vadd.f32 1e-05, %v1290_v63 }
 0xb7d   : > { %1838 = vrsqrt.f32 %v1294_v0 }
 0xb83   : > { %v1837_v2 = vpop.eup %1836 }
 0xb84   : > { %v1297_v3 = vmul.f32 %v1837_v2, %v1291_v1 }
 0xb86   : > { %v1299_v6 = vmax.f32 %v1297_v3, 0.0 }
 0xb87   : > { %v1839_v8 = vpop.eup %1838 }
 0xb88   : > { %1301 = vst.msk [vmem:[%s248_s12] sm:$0xff] %vm260_vm1, %v1299_v6  ;;  %v1298_v9 = vmul.f32 %v1839_v8, %v1292_v5 }
 0xb8a   : > { %v1300_v11 = vmax.f32 %v1298_v9, 0.0 }
 0xb8c   : > { %1302 = vst.msk [vmem:[%s248_s12 + $0x8] sm:$0xff] %vm260_vm1, %v1300_v11 }
 0xb8d PF: > { %s16_s21 = sadd.s32 1, %s1846_s21  }
 0xb8e   : > { %p13_p4 = scmp.ge.s32.totalorder %s16_s21, 4  }
 0xb90   :  { %15 = sbr.rel (!%p13_p4) target bundleno = 1 (0x1), region = 74 }

// kernel: forward.7
= control target key start
LH: loop header
LB: loop body
LE: loop exit
PB: predicated region body
PF: predicated region fallthrough
CT: control target
= control target key end

     0   :  { %s1995_s21 = smov 0   ;;  %s2219_s0 = inlined_call_operand.vmem [shape: f32[2,16,12], index: 0, kind: input, shape index: {}]   ;;  %s2220_s1 = inlined_call_operand.vmem [shape: f32[12,12], index: 1, kind: input, shape index: {}]   ;;  %s2221_s2 = inlined_call_operand.vmem [shape: f32[32,96], index: 2, kind: input, shape index: {}]   ;;  %s2222_s3 = inlined_call_operand.vmem [shape: f32[32,1], index: 3, kind: input, shape index: {}]   ;;  %s2223_s4 = inlined_call_operand.vmem [shape: f32[16,192], index: 4, kind: input, shape index: {}]   ;;  %s2224_s5 = inlined_call_operand.vmem [shape: f32[16,1], index: 5, kind: input, shape index: {}]   ;;  %s2225_s6 = inlined_call_operand.vmem [shape: f32[2,16,12], index: 6, kind: output, shape index: {}]  }
   0x1 LB: > { %s1564_s22 = sadd.s32 4294967295, %s1955_s21   ;;  %p1568_p0 = scmp.ge.s32.totalorder %s1955_s21, 1  ;;  %s1955_s21 = sphi %s1995_s21, %s16_s21  }
   0x2   : > { %p212_p1 = scmp.lt.s32.totalorder %s1955_s21, 3 }
   0x4   : > { %p213_p2 = pnand %p1568_p0, %p212_p1 }
   0x5   : > { %v252_v0 = vld [vmem:[%s2220_s1] sm:$0xff] (!%p213_p2)  ;;  %v253_v1 = vld [vmem:[%s2220_s1 + $0x8] sm:$0xf] (!%p213_p2)  ;;  %vm271_vm0 = vcmask (!%p213_p2), 1043456   ;;  %p242_p3 = scmp.lt.s32.totalorder (!%p213_p2), %s1564_s22, 1  ;;  %vm1957_vm1 = vmmov (!%p213_p2), 1  }
   0x6   : > { %216 = sbr.rel (%p213_p2) target bundleno = 2973 (0xb9d), region = 44  ;;  %v2009_v2 = vpack.c.bf16 (!%p213_p2), %v253_v1, %v252_v0  ;;  %vm2011_vm2 = vmpackc.low (!%p213_p2), %vm271_vm0, %vm1957_vm1  ;;  %vm264_vm3 = vcmask (!%p213_p2), 97280   ;;  %v256_v27 = vld [vmem:[%s2221_s2] sm:$0xff] (!%p213_p2)  ;;  %vm704_vm4 = vcmask (!%p213_p2), 785408   ;;  %v262_v29 = vld [vmem:[%s2222_s3 + $0x10] sm:$0xff] (!%p213_p2)  ;;  %v1958_v30 = vmov (!%p213_p2), 0  }
   0x7   : > { %v260_v28 = vld [vmem:[%s2222_s3] sm:$0xff] (!%p213_p2)  ;;  %1935 = vset.pattern.permute.xlu0 (!%p213_p2), %v1958_v30  ;;  %1936 = vset.pattern.permute.xlu1 (!%p213_p2), %v1958_v30  ;;  %v261_v31 = vld [vmem:[%s2222_s3 + $0x8] sm:$0xff] (!%p213_p2)  ;;  %v263_v32 = vld [vmem:[%s2222_s3 + $0x18] sm:$0xff] (!%p213_p2)  ;;  %vm1391_vm5 = vcmask (!%p213_p2), 523264  }
   0x8   : > { %1806 = vmatprep.subr.msk.bf16.mxu0 (!%p213_p2), %vm2011_vm2, %v2009_v2  ;;  %1812 = vmatprep.subr.msk.bf16.mxu1 (!%p213_p2), %vm2011_vm2, %v2009_v2  ;;  %v257_v38 = vld [vmem:[%s2221_s2 + $0x8] sm:$0xff] (!%p213_p2)  ;;  %v258_v39 = vld [vmem:[%s2221_s2 + $0x10] sm:$0xff] (!%p213_p2)  ;;  %v259_v40 = vld [vmem:[%s2221_s2 + $0x18] sm:$0xff] (!%p213_p2) }
   0x9   : > { %1809 = vmatpush3.bf16.msk.msra.mxu0 (!%p213_p2), %vm2011_vm2, %v2009_v2  ;;  %1815 = vmatpush3.bf16.msk.msra.mxu1 (!%p213_p2), %vm2011_vm2, %v2009_v2  ;;  %v874_v1 = vld [vmem:[%s2224_s5] sm:$0xff] (!%p213_p2) }
   0xa   : > { %1818 = vmatprep.subr.msk.bf16.mxu0 (!%p213_p2), %vm2011_vm2, %v2009_v2  ;;  %1824 = vmatprep.subr.msk.bf16.mxu1 (!%p213_p2), %vm2011_vm2, %v2009_v2 }
   0xb   : > { %686 = vperm.xlu0 (!%p213_p2), %1935, %v260_v28   ;;  %696 = vperm.xlu1 (!%p213_p2), %1936, %v262_v29  }
   0xd   : > { %s2229_s22 = smov (!%p242_p3, %s1564_s22), 1 }
   0xe   : > { %s1621_s27 = sshll.u32 %s2229_s22, 4 }
   0xf   : > { %s246_s30 = scalar_lea.vmem %s2219_s0, %s1621_s27  ;;  %691 = vperm.xlu0 %1935, %v261_v31   ;;  %701 = vperm.xlu1 %1936, %v263_v32   ;;  %s251_s16 = scalar_lea.vmem %s2225_s6, %s1621_s27 }
  0x10   : > { %v254_v4 = vld [vmem:[%s246_s30] sm:$0xff]  ;;  %v255_v5 = vld [vmem:[%s246_s30 + $0x8] sm:$0xff] }
  0x11   : > { %1693 = vmatprep.mubr.msk.f32.mxu0 %vm264_vm3, %v254_v4  ;;  %v1834_v14 = vpack.c.bf16 %v255_v5, %v254_v4 }
  0x12   : > { %1694 = vmatmul.mubr.msk.f32.vlgmr.msra.gmra.mrb[0].mxu0 %vm264_vm3, %v255_v5 }
  0x13   : > { %1821 = vmatpush3.bf16.msk.msra.mxu0 %vm2011_vm2, %v2009_v2 }
  0x14   : > { %1830 = vmatprep.subr.msk.bf16.mxu0 %vm2011_vm2, %v2009_v2 }
  0x8a   : > { %v687_v41 = vpop.permute.xlu0 %686  ;;  %v697_v48 = vpop.permute.xlu1 %696 }
  0x8e   : > { %v692_v42 = vpop.permute.xlu0 %691  ;;  %v702_v58 = vpop.permute.xlu1 %701 }
  0xe5   : > { %v1695_v6 = vpop.f32.mrb[0].mxu0 }
  0xe6   : > { %v341_v7 = vpop.f32.mrb[1].mxu0  ;;  %v351_v9 = vmul.f32 0.5, %v1695_v6 }
  0xe7   : > { %v350_v8 = vmul.f32 0.5, %v341_v7 }
  0xe9   : > { %1700 = vmatprep.mubr.msk.f32.mxu1 %vm264_vm3, %v350_v8  ;;  %v1838_v19 = vpack.c.bf16 %v351_v9, %v350_v8 }
  0xea   : > { %1701 = vmatmul.mubr.msk.f32.vlgmr.msra.gmra.mrb[0].mxu1 %vm264_vm3, %v351_v9 }
  0xeb   : > { %1827 = vmatpush3.bf16.msk.msra.mxu1 %vm2011_vm2, %v2009_v2 }
  0xec   : > { %1835 = vmatprep.subr.bf16.mxu1 %v1834_v14 }
 0x1bd   : > { %v1702_v10 = vpop.f32.mrb[0].mxu1 }
 0x1be   : > { %v424_v11 = vpop.f32.mrb[1].mxu1  ;;  %v434_v13 = vsub.f32 %v1702_v10, %v255_v5 }
 0x1bf   : > { %v433_v12 = vsub.f32 %v424_v11, %v254_v4  ;;  %v875_v4 = vld [vmem:[%s2224_s5 + $0x8] sm:$0xff] }
 0x1c1   : > { %1707 = vmatprep.mubr.msk.f32.mxu0 %vm264_vm3, %v433_v12  ;;  %v1842_v20 = vpack.c.bf16 %v434_v13, %v433_v12 }
 0x1c2   : > { %1708 = vmatmul.mubr.msk.f32.vlgmr.msra.gmra.mrb[2].mxu0 %vm264_vm3, %v434_v13 }
 0x1c3   : > { %1833 = vmatpush3.bf16.msk.msra.mxu0 %vm2011_vm2, %v2009_v2 }
 0x1c4   : > { %1878 = vmatprep.subr.msk.bf16.mxu0 %vm2011_vm2, %v2009_v2 }
 0x295   : > { %v1709_v15 = vpop.f32.mrb[2].mxu0 }
 0x296   : > { %v507_v16 = vpop.f32.mrb[3].mxu0  ;;  %v517_v18 = vsub.f32 %v1709_v15, %v351_v9 }
 0x297   : > { %v516_v17 = vsub.f32 %v507_v16, %v350_v8 }
 0x299   : > { %1714 = vmatprep.mubr.msk.f32.mxu1 %vm264_vm3, %v516_v17  ;;  %v1846_v21 = vpack.c.bf16 %v517_v18, %v516_v17 }
 0x29a   : > { %1715 = vmatmul.mubr.msk.f32.vlgmr.msra.gmra.mrb[2].mxu1 %vm264_vm3, %v517_v18 }
 0x29b   : > { %1837 = vmatpush3.bf16.msra.mxu1 %v1834_v14  ;;  %1748 = vmatprep.mubr.msk.f32.mxu1 %vm704_vm4, %v256_v27 }
 0x29c   : > { %1839 = vmatprep.subr.bf16.mxu1 %v1838_v19 }
 0x29f   : > { %1841 = vmatpush3.bf16.msra.mxu1 %v1838_v19 }
 0x2a0   : > { %1843 = vmatprep.subr.bf16.mxu1 %v1842_v20 }
 0x2a3   : > { %1845 = vmatpush3.bf16.msra.mxu1 %v1842_v20 }
 0x2a4   : > { %1847 = vmatprep.subr.bf16.mxu1 %v1846_v21 }
 0x2a7   : > { %1849 = vmatpush3.bf16.msra.mxu1 %v1846_v21 }
 0x36d   : > { %v1716_v22 = vpop.f32.mrb[2].mxu1 }
 0x36e   : > { %v600_v23 = vsub.f32 %v1716_v22, %v434_v13  ;;  %v590_v24 = vpop.f32.mrb[3].mxu1 }
 0x36f   : > { %v599_v25 = vsub.f32 %v590_v24, %v433_v12 }
 0x371   : > { %v1850_v26 = vpack.c.bf16 %v600_v23, %v599_v25  ;;  %1721 = vmatprep.mubr.msk.f32.mxu0 %vm264_vm3, %v599_v25 }
 0x372   : > { %1722 = vmatmul.mubr.msk.f32.vlgmr.msra.gmra.mrb[4].mxu0 %vm264_vm3, %v600_v23 }
 0x373   : > { %1851 = vmatprep.subr.bf16.mxu1 %v1850_v26  ;;  %1881 = vmatpush3.bf16.msk.msra.mxu0 %vm2011_vm2, %v2009_v2 }
 0x374   : > { %1853 = vmatpush3.bf16.msra.mxu1 %v1850_v26 }
 0x445   : > { %v1723_v33 = vpop.f32.mrb[4].mxu0 }
 0x446   : > { %v683_v34 = vsub.f32 %v1723_v33, %v517_v18  ;;  %v673_v35 = vpop.f32.mrb[5].mxu0 }
 0x447   : > { %v682_v36 = vsub.f32 %v673_v35, %v516_v17 }
 0x449   : > { %v1854_v37 = vpack.c.bf16 %v683_v34, %v682_v36 }
 0x44b   : > { %1855 = vmatprep.subr.bf16.mxu1 %v1854_v37 }
 0x44c   : > { %1857 = vmatpush3.bf16.msra.mxu1 %v1854_v37 }
 0x44d   : > { %1860 = vmatprep.subr.msk.bf16.mxu1 %vm2011_vm2, %v2009_v2 }
 0x44f   : > { %1749 = vmatmul.mubr.msk.f32.vlgmr.msra.gmra.mrb[4].mxu1 %vm704_vm4, %v257_v38 }
 0x450   : > { %1751 = vmatprep.mubr.msk.f32.mxu1 %vm704_vm4, %v258_v39  ;;  %1863 = vmatpush3.bf16.msk.msra.mxu1 %vm2011_vm2, %v2009_v2 }
 0x451   : > { %1866 = vmatprep.subr.msk.bf16.mxu1 %vm2011_vm2, %v2009_v2 }
 0x453   : > { %1752 = vmatmul.mubr.msk.f32.gmra.mrb[6].mxu1 %vm704_vm4, %v259_v40 }
 0x522   : > { %v1750_v43 = vpop.f32.mrb[4].mxu1 }
 0x523   : > { %v2106_v44 = vadd.f32 %v1750_v43, %v692_v42  ;;  %v783_v45 = vpop.f32.mrb[5].mxu1 }
 0x524   : > { %v2108_v46 = vadd.f32 %v783_v45, %v687_v41 }
 0x525   : > { %v805_v47 = vsel %vm264_vm3, %v2106_v44, 0.0  ;;  %v819_v51 = vmul.f32 %v2106_v44, %v2106_v44 }
 0x526   : > { %806 = vadd.xlane.f32.xlu1 %v805_v47  ;;  %v1753_v49 = vpop.f32.mrb[6].mxu1  ;;  %v802_v50 = vsel %vm264_vm3, %v2108_v46, 0.0  ;;  %v818_v57 = vmul.f32 %v2108_v46, %v2108_v46 }
 0x527   : > { %v793_v52 = vpop.f32.mrb[7].mxu1  ;;  %803 = vadd.xlane.f32.xlu0 %v802_v50  ;;  %v825_v55 = vsel %vm264_vm3, %v819_v51, 0.0  ;;  %v2126_v60 = vadd.f32 %v1753_v49, %v702_v58 }
 0x528   : > { %v2116_v53 = vadd.f32 %v793_v52, %v697_v48  ;;  %v822_v61 = vsel %vm264_vm3, %v818_v57, 0.0 }
 0x529   : > { %v811_v62 = vsel %vm264_vm3, %v2126_v60, 0.0  ;;  %v821_v63 = vmul.f32 %v2126_v60, %v2126_v60 }
 0x52a   : > { %v808_v54 = vsel %vm264_vm3, %v2116_v53, 0.0  ;;  %v820_v56 = vmul.f32 %v2116_v53, %v2116_v53 }
 0x52b   : > { %809 = vadd.xlane.f32.xlu1 %v808_v54  ;;  %826 = vadd.xlane.f32.xlu0 %v825_v55  ;;  %v831_v0 = vsel %vm264_vm3, %v821_v63, 0.0 }
 0x52c   : > { %v828_v59 = vsel %vm264_vm3, %v820_v56, 0.0 }
 0x52f   : > { %829 = vadd.xlane.f32.xlu1 %v828_v59  ;;  %823 = vadd.xlane.f32.xlu0 %v822_v61 }
 0x533   : > { %812 = vadd.xlane.f32.xlu0 %v811_v62 }
 0x537   : > { %832 = vadd.xlane.f32.xlu0 %v831_v0 }
 0x540   : > { %1383 = vperm.xlu1 %1936, %v874_v1  }
 0x54d   : > { %1388 = vperm.xlu0 %1935, %v875_v4  }
 0x5b3   : > { %v807_v5 = vpop.xlane.xlu1 %806 }
 0x5b4   : > { %v804_v6 = vpop.xlane.xlu0 %803  ;;  %v815_v7 = vmul.f32 0.083333336, %v807_v5 }
 0x5b5   : > { %v814_v11 = vmul.f32 0.083333336, %v804_v6 }
 0x5b6   : > { %v839_v10 = vmul.f32 %v815_v7, %v815_v7  ;;  %v851_v38 = vsub.f32 %v2106_v44, %v815_v7  ;;  %v1959_v7 = vmov 0.0|0.0  }
 0x5b7   : > { %v838_v18 = vmul.f32 %v814_v11, %v814_v11  ;;  %v850_v40 = vsub.f32 %v2108_v46, %v814_v11  ;;  %1888 = vmatprep.subr.bf16.mxu0 %v1959_v7 }
 0x5b8   : > { %v810_v8 = vpop.xlane.xlu1 %809  ;;  %v827_v9 = vpop.xlane.xlu0 %826 }
 0x5b9   : > { %v816_v12 = vmul.f32 0.083333336, %v810_v8  ;;  %v835_v13 = vmul.f32 0.083333336, %v827_v9 }
 0x5bb   : > { %v840_v14 = vmul.f32 %v816_v12, %v816_v12  ;;  %v843_v15 = vsub.f32 %v835_v13, %v839_v10  ;;  %v852_v41 = vsub.f32 %v2116_v53, %v816_v12 }
 0x5bc   : > { %v830_v16 = vpop.xlane.xlu1 %829  ;;  %v824_v17 = vpop.xlane.xlu0 %823 }
 0x5bd   : > { %v847_v19 = vmax.f32 %v843_v15, 0.0  ;;  %v836_v20 = vmul.f32 0.083333336, %v830_v16  ;;  %v834_v21 = vmul.f32 0.083333336, %v824_v17 }
 0x5bf   : > { %v855_v22 = vadd.f32 1e-05, %v847_v19  ;;  %v844_v23 = vsub.f32 %v836_v20, %v840_v14  ;;  %v842_v24 = vsub.f32 %v834_v21, %v838_v18 }
 0x5c0   : > { %v813_v25 = vpop.xlane.xlu0 %812 }
 0x5c1   : > { %v848_v26 = vmax.f32 %v844_v23, 0.0  ;;  %v846_v27 = vmax.f32 %v842_v24, 0.0  ;;  %v817_v28 = vmul.f32 0.083333336, %v813_v25  ;;  %1937 = vrsqrt.f32 %v855_v22 }
 0x5c3   : > { %v856_v29 = vadd.f32 1e-05, %v848_v26  ;;  %v854_v30 = vadd.f32 1e-05, %v846_v27  ;;  %v841_v32 = vmul.f32 %v817_v28, %v817_v28  ;;  %v853_v51 = vsub.f32 %v2126_v60, %v817_v28 }
 0x5c4   : > { %v833_v31 = vpop.xlane.xlu0 %832 }
 0x5c5   : > { %1939 = vrsqrt.f32 %v856_v29  ;;  %v837_v33 = vmul.f32 0.083333336, %v833_v31 }
 0x5c6   : > { %1941 = vrsqrt.f32 %v854_v30 }
 0x5c7   : > { %v845_v34 = vsub.f32 %v837_v33, %v841_v32  ;;  %v871_v32 = vld [vmem:[%s2223_s4 + $0x8] sm:$0xff] }
 0x5c9   : > { %v849_v35 = vmax.f32 %v845_v34, 0.0 }
 0x5cb   : > { %v857_v36 = vadd.f32 1e-05, %v849_v35  ;;  %v1938_v37 = vpop.eup %1937 }
 0x5cc   : > { %v863_v43 = vmul.f32 %v1938_v37, %v851_v38 }
 0x5cd   : > { %1943 = vrsqrt.f32 %v857_v36 }
 0x5ce   : > { %v867_v49 = vmax.f32 %v863_v43, 0.0  ;;  %v870_v43 = vld [vmem:[%s2223_s4] sm:$0xff] }
 0x5cf   : > { %v1940_v39 = vpop.eup %1939 }
 0x5d0   : > { %v1942_v42 = vpop.eup %1941  ;;  %v864_v47 = vmul.f32 %v1940_v39, %v852_v41 }
 0x5d1   : > { %v862_v45 = vmul.f32 %v1942_v42, %v850_v40 }
 0x5d2   : > { %v868_v50 = vmax.f32 %v864_v47, 0.0  ;;  %v872_v47 = vld [vmem:[%s2223_s4 + $0x10] sm:$0xff] }
 0x5d3   : > { %v866_v48 = vmax.f32 %v862_v45, 0.0  ;;  %v873_v45 = vld [vmem:[%s2223_s4 + $0x18] sm:$0xff] }
 0x5d5   : > { %1758 = vmatprep.mubr.msk.f32.mxu1 %vm264_vm3, %v866_v48  ;;  %v1889_v12 = vpack.c.bf16 %v867_v49, %v866_v48 }
 0x5d6   : > { %1759 = vmatmul.mubr.msk.f32.vlgmr.msra.gmra.mrb[8].mxu1 %vm264_vm3, %v867_v49 }
 0x5d7   : > { %v1944_v52 = vpop.eup %1943  ;;  %1761 = vmatprep.mubr.msk.f32.mxu1 %vm264_vm3, %v868_v50  ;;  %1869 = vmatpush3.bf16.msk.msra.mxu1 %vm2011_vm2, %v2009_v2 }
 0x5d8   : > { %v865_v44 = vmul.f32 %v1944_v52, %v853_v51  ;;  %1872 = vmatprep.subr.msk.bf16.mxu1 %vm2011_vm2, %v2009_v2 }
 0x5da   : > { %v869_v46 = vmax.f32 %v865_v44, 0.0 }
 0x5dc   : > { %1762 = vmatmul.mubr.msk.f32.gmra.mrb[10].mxu1 %vm264_vm3, %v869_v46  ;;  %v1892_v14 = vpack.c.bf16 %v869_v46, %v868_v50 }
 0x6a9   : > { %v1760_v53 = vpop.f32.mrb[8].mxu1 }
 0x6aa   : > { %v954_v54 = vpop.f32.mrb[9].mxu1  ;;  %v974_v56 = vmul.f32 0.5, %v1760_v53 }
 0x6ab   : > { %v973_v55 = vmul.f32 0.5, %v954_v54 }
 0x6ad   : > { %1768 = vmatprep.mubr.msk.f32.mxu1 %vm264_vm3, %v973_v55  ;;  %v1895_v16 = vpack.c.bf16 %v974_v56, %v973_v55 }
 0x6ae   : > { %1769 = vmatmul.mubr.msk.f32.vlgmr.msra.gmra.mrb[12].mxu1 %vm264_vm3, %v974_v56 }
 0x6af   : > { %v1763_v57 = vpop.f32.mrb[10].mxu1  ;;  %1875 = vmatpush3.bf16.msk.msra.mxu1 %vm2011_vm2, %v2009_v2 }
 0x6b0   : > { %v964_v58 = vpop.f32.mrb[11].mxu1  ;;  %1884 = vmatprep.subr.msk.bf16.mxu1 %vm2011_vm2, %v2009_v2  ;;  %v976_v60 = vmul.f32 0.5, %v1763_v57 }
 0x6b1   : > { %v975_v59 = vmul.f32 0.5, %v964_v58 }
 0x6b3   : > { %1771 = vmatprep.mubr.msk.f32.mxu1 %vm264_vm3, %v975_v59  ;;  %v1898_v17 = vpack.c.bf16 %v976_v60, %v975_v59 }
 0x6b4   : > { %1772 = vmatmul.mubr.msk.f32.gmra.mrb[14].mxu1 %vm264_vm3, %v976_v60 }
 0x781   : > { %v1770_v61 = vpop.f32.mrb[12].mxu1 }
 0x782   : > { %v1055_v62 = vpop.f32.mrb[13].mxu1  ;;  %v1075_v0 = vsub.f32 %v1770_v61, %v867_v49 }
 0x783   : > { %v1074_v63 = vsub.f32 %v1055_v62, %v866_v48  ;;  %v1384_v48 = vpop.permute.xlu1 %1383 }
 0x785   : > { %1778 = vmatprep.mubr.msk.f32.mxu1 %vm264_vm3, %v1074_v63  ;;  %v1901_v18 = vpack.c.bf16 %v1075_v0, %v1074_v63 }
 0x786   : > { %1779 = vmatmul.mubr.msk.f32.vlgmr.msra.gmra.mrb[16].mxu1 %vm264_vm3, %v1075_v0 }
 0x787   : > { %v1773_v1 = vpop.f32.mrb[14].mxu1  ;;  %1887 = vmatpush3.bf16.msk.msra.mxu1 %vm2011_vm2, %v2009_v2 }
 0x788   : > { %v1065_v4 = vpop.f32.mrb[15].mxu1  ;;  %v1077_v6 = vsub.f32 %v1773_v1, %v869_v46  ;;  %v1389_v46 = vpop.permute.xlu0 %1388 }
 0x789   : > { %v1076_v5 = vsub.f32 %v1065_v4, %v868_v50 }
 0x78b   : > { %1781 = vmatprep.mubr.msk.f32.mxu1 %vm264_vm3, %v1076_v5  ;;  %v1904_v19 = vpack.c.bf16 %v1077_v6, %v1076_v5 }
 0x78c   : > { %1782 = vmatmul.mubr.msk.f32.gmra.mrb[18].mxu1 %vm264_vm3, %v1077_v6 }
 0x859   : > { %v1780_v8 = vpop.f32.mrb[16].mxu1 }
 0x85a   : > { %v1156_v9 = vpop.f32.mrb[17].mxu1  ;;  %v1176_v11 = vsub.f32 %v1780_v8, %v974_v56 }
 0x85b   : > { %v1175_v10 = vsub.f32 %v1156_v9, %v973_v55 }
 0x85d   : > { %1788 = vmatprep.mubr.msk.f32.mxu0 %vm264_vm3, %v1175_v10  ;;  %v1907_v20 = vpack.c.bf16 %v1176_v11, %v1175_v10 }
 0x85e   : > { %1789 = vmatmul.mubr.msk.f32.vlgmr.msra.gmra.mrb[6].mxu0 %vm264_vm3, %v1176_v11 }
 0x85f   : > { %1890 = vmatpush1.bf16.msra.mxu0 %v1889_v12  ;;  %v1783_v2 = vpop.f32.mrb[18].mxu1 }
 0x860   : > { %v1166_v3 = vpop.f32.mrb[19].mxu1  ;;  %1891 = vmatprep.subr.bf16.mxu0 %v1959_v7  ;;  %v1178_v15 = vsub.f32 %v1783_v2, %v976_v60 }
 0x861   : > { %v1177_v13 = vsub.f32 %v1166_v3, %v975_v59 }
 0x863   : > { %1893 = vmatpush1.bf16.msra.mxu0 %v1892_v14  ;;  %1791 = vmatprep.mubr.msk.f32.mxu0 %vm264_vm3, %v1177_v13  ;;  %v1910_v21 = vpack.c.bf16 %v1178_v15, %v1177_v13 }
 0x864   : > { %1792 = vmatmul.mubr.msk.f32.gmra.mrb[8].mxu0 %vm264_vm3, %v1178_v15  ;;  %1894 = vmatprep.subr.bf16.mxu0 %v1959_v7 }
 0x865   : > { %1617 = vmatprep.mubr.msk.f32.mxu0 %vm1391_vm5, %v871_v32 }
 0x867   : > { %1896 = vmatpush1.bf16.msra.mxu0 %v1895_v16 }
 0x868   : > { %1897 = vmatprep.subr.bf16.mxu0 %v1959_v7 }
 0x86b   : > { %1899 = vmatpush1.bf16.msra.mxu0 %v1898_v17 }
 0x86c   : > { %1900 = vmatprep.subr.bf16.mxu0 %v1959_v7 }
 0x86f   : > { %1902 = vmatpush1.bf16.msra.mxu0 %v1901_v18 }
 0x870   : > { %1903 = vmatprep.subr.bf16.mxu0 %v1959_v7 }
 0x873   : > { %1905 = vmatpush1.bf16.msra.mxu0 %v1904_v19 }
 0x874   : > { %1906 = vmatprep.subr.bf16.mxu0 %v1959_v7 }
 0x877   : > { %1908 = vmatpush1.bf16.msra.mxu0 %v1907_v20 }
 0x878   : > { %1909 = vmatprep.subr.bf16.mxu0 %v1959_v7 }
 0x87b   : > { %1911 = vmatpush1.bf16.msra.mxu0 %v1910_v21 }
 0x87c   : > { %1912 = vmatprep.subr.bf16.mxu0 %v1959_v7 }
 0x931   : > { %v1790_v22 = vpop.f32.mrb[6].mxu0 }
 0x932   : > { %v1277_v23 = vsub.f32 %v1790_v22, %v1075_v0  ;;  %v1257_v24 = vpop.f32.mrb[7].mxu0 }
 0x933   : > { %v1276_v25 = vsub.f32 %v1257_v24, %v1074_v63 }
 0x935   : > { %v1913_v26 = vpack.c.bf16 %v1277_v23, %v1276_v25  ;;  %1798 = vmatprep.mubr.msk.f32.mxu1 %vm264_vm3, %v1276_v25 }
 0x936   : > { %1799 = vmatmul.mubr.msk.f32.vlgmr.msra.gmra.mrb[20].mxu1 %vm264_vm3, %v1277_v23 }
 0x937   : > { %1914 = vmatpush1.bf16.msra.mxu0 %v1913_v26  ;;  %v1793_v27 = vpop.f32.mrb[8].mxu0 }
 0x938   : > { %v1279_v28 = vsub.f32 %v1793_v27, %v1077_v6  ;;  %v1267_v29 = vpop.f32.mrb[9].mxu0  ;;  %1915 = vmatprep.subr.bf16.mxu0 %v1959_v7 }
 0x939   : > { %v1278_v30 = vsub.f32 %v1267_v29, %v1076_v5 }
 0x93b   : > { %v1916_v31 = vpack.c.bf16 %v1279_v28, %v1278_v30  ;;  %1801 = vmatprep.mubr.msk.f32.mxu1 %vm264_vm3, %v1278_v30 }
 0x93c   : > { %1802 = vmatmul.mubr.msk.f32.gmra.mrb[22].mxu1 %vm264_vm3, %v1279_v28 }
 0x93d   : > { %1917 = vmatpush1.bf16.msra.mxu0 %v1916_v31 }
 0x93e   : > { %1918 = vmatprep.subr.bf16.mxu0 %v1959_v7 }
 0xa09   : > { %v1800_v33 = vpop.f32.mrb[20].mxu1 }
 0xa0a   : > { %v1378_v34 = vsub.f32 %v1800_v33, %v1176_v11  ;;  %v1358_v35 = vpop.f32.mrb[21].mxu1 }
 0xa0b   : > { %v1377_v36 = vsub.f32 %v1358_v35, %v1175_v10 }
 0xa0d   : > { %v1919_v37 = vpack.c.bf16 %v1378_v34, %v1377_v36 }
 0xa0f   : > { %1920 = vmatpush1.bf16.msra.mxu0 %v1919_v37  ;;  %v1803_v38 = vpop.f32.mrb[22].mxu1 }
 0xa10   : > { %v1380_v39 = vsub.f32 %v1803_v38, %v1178_v15  ;;  %v1368_v40 = vpop.f32.mrb[23].mxu1  ;;  %1921 = vmatprep.subr.bf16.mxu0 %v1959_v7 }
 0xa11   : > { %v1379_v41 = vsub.f32 %v1368_v40, %v1177_v13 }
 0xa13   : > { %v1922_v42 = vpack.c.bf16 %v1380_v39, %v1379_v41 }
 0xa15   : > { %1923 = vmatpush1.bf16.msra.mxu0 %v1922_v42 }
 0xa18   : > { %1463 = vmatmul.mubr.f32.vlgmr.msra.gmra.mrb[10].mxu0 %v870_v43 }
 0xa19   : > { %1618 = vmatprep.mubr.msk.f32.mxu0 %vm1391_vm5, %v873_v45 }
 0xa1c   : > { %1468 = vmatmul.mubr.f32.gmra.mrb[12].mxu0 %v872_v47 }
 0xaeb   : > { %v1464_v49 = vpop.f32.mrb[10].mxu0 }
 0xaec   : > { %v1465_v50 = vadd.f32 %v1464_v49, %v1384_v48  ;;  %v1466_v51 = vpop.f32.mrb[11].mxu0 }
 0xaee   : > { %v1473_v52 = vsel %vm264_vm3, %v1465_v50, 0.0  ;;  %v1481_v44 = vmul.f32 %v1465_v50, %v1465_v50 }
 0xaef   : > { %v1469_v53 = vpop.f32.mrb[12].mxu0  ;;  %1474 = vadd.xlane.f32.xlu1 %v1473_v52 }
 0xaf0   : > { %v1470_v54 = vadd.f32 %v1469_v53, %v1389_v46  ;;  %v1471_v55 = vpop.f32.mrb[13].mxu0  ;;  %v1483_v56 = vsel %vm264_vm3, %v1481_v44, 0.0 }
 0xaf2   : > { %v1476_v57 = vsel %vm264_vm3, %v1470_v54, 0.0  ;;  %v1482_v58 = vmul.f32 %v1470_v54, %v1470_v54 }
 0xaf3   : > { %1484 = vadd.xlane.f32.xlu1 %v1483_v56  ;;  %1477 = vadd.xlane.f32.xlu0 %v1476_v57 }
 0xaf4   : > { %v1486_v59 = vsel %vm264_vm3, %v1482_v58, 0.0 }
 0xaf7   : > { %1487 = vadd.xlane.f32.xlu0 %v1486_v59 }
 0xb7c   : > { %v1475_v60 = vpop.xlane.xlu1 %1474 }
 0xb7d   : > { %v1479_v61 = vmul.f32 0.083333336, %v1475_v60 }
 0xb7f   : > { %v1491_v0 = vmul.f32 %v1479_v61, %v1479_v61  ;;  %v1497_v3 = vsub.f32 %v1465_v50, %v1479_v61 }
 0xb80   : > { %v1485_v62 = vpop.xlane.xlu1 %1484  ;;  %v1478_v63 = vpop.xlane.xlu0 %1477 }
 0xb81   : > { %v1489_v1 = vmul.f32 0.083333336, %v1485_v62  ;;  %v1480_v4 = vmul.f32 0.083333336, %v1478_v63 }
 0xb83   : > { %v1493_v5 = vsub.f32 %v1489_v1, %v1491_v0  ;;  %v1492_v8 = vmul.f32 %v1480_v4, %v1480_v4  ;;  %v1498_v16 = vsub.f32 %v1470_v54, %v1480_v4 }
 0xb84   : > { %v1488_v6 = vpop.xlane.xlu0 %1487 }
 0xb85   : > { %v1495_v7 = vmax.f32 %v1493_v5, 0.0  ;;  %v1490_v9 = vmul.f32 0.083333336, %v1488_v6 }
 0xb87   : > { %v1499_v10 = vadd.f32 1e-05, %v1495_v7  ;;  %v1494_v11 = vsub.f32 %v1490_v9, %v1492_v8 }
 0xb89   : > { %1945 = vrsqrt.f32 %v1499_v10  ;;  %v1496_v12 = vmax.f32 %v1494_v11, 0.0 }
 0xb8b   : > { %v1500_v2 = vadd.f32 1e-05, %v1496_v12 }
 0xb8d   : > { %1947 = vrsqrt.f32 %v1500_v2 }
 0xb93   : > { %v1946_v13 = vpop.eup %1945 }
 0xb94   : > { %v1503_v14 = vmul.f32 %v1946_v13, %v1497_v3 }
 0xb96   : > { %v1505_v15 = vmax.f32 %v1503_v14, 0.0 }
 0xb97   : > { %v1948_v17 = vpop.eup %1947 }
 0xb98   : > { %1507 = vst.msk [vmem:[%s251_s16] sm:$0xff] %vm264_vm3, %v1505_v15  ;;  %v1504_v18 = vmul.f32 %v1948_v17, %v1498_v16 }
 0xb9a   : > { %v1506_v19 = vmax.f32 %v1504_v18, 0.0 }
 0xb9c   : > { %1508 = vst.msk [vmem:[%s251_s16 + $0x8] sm:$0xff] %vm264_vm3, %v1506_v19 }
 0xb9d PF: > { %s16_s21 = sadd.s32 1, %s1955_s21  }
 0xb9e   : > { %p13_p4 = scmp.ge.s32.totalorder %s16_s21, 4  }
 0xba0   :  { %15 = sbr.rel (!%p13_p4) target bundleno = 1 (0x1), region = 74 }

// kernel: forward.8
= control target key start
LH: loop header
LB: loop body
LE: loop exit
PB: predicated region body
PF: predicated region fallthrough
CT: control target
= control target key end

     0   :  { %s2045_s21 = smov 0   ;;  %s2266_s0 = inlined_call_operand.vmem [shape: f32[2,32,48], index: 0, kind: input, shape index: {}]   ;;  %s2267_s1 = inlined_call_operand.vmem [shape: f32[48,48], index: 1, kind: input, shape index: {}]   ;;  %s2268_s2 = inlined_call_operand.vmem [shape: f32[16,192], index: 2, kind: input, shape index: {}]   ;;  %s2269_s3 = inlined_call_operand.vmem [shape: f32[16,1], index: 3, kind: input, shape index: {}]   ;;  %s2270_s4 = inlined_call_operand.vmem [shape: f32[8,96], index: 4, kind: input, shape index: {}]   ;;  %s2271_s5 = inlined_call_operand.vmem [shape: f32[8,1], index: 5, kind: input, shape index: {}]   ;;  %s2272_s6 = inlined_call_operand.vmem [shape: f32[2,8,48], index: 6, kind: output, shape index: {}]  }
   0x1 LB: > { %s1465_s22 = sadd.s32 4294967295, %s2004_s21   ;;  %p1469_p0 = scmp.ge.s32.totalorder %s2004_s21, 1  ;;  %s2004_s21 = sphi %s2045_s21, %s16_s21  }
   0x2   : > { %p212_p1 = scmp.lt.s32.totalorder %s2004_s21, 3 }
   0x4   : > { %p213_p2 = pnand %p1469_p0, %p212_p1 }
   0x5   : > { %v250_v0 = vld [vmem:[%s2267_s1] sm:$0xff] (!%p213_p2)  ;;  %v251_v1 = vld [vmem:[%s2267_s1 + $0x8] sm:$0xff] (!%p213_p2)  ;;  %v252_v2 = vld [vmem:[%s2267_s1 + $0x10] sm:$0xff] (!%p213_p2)  ;;  %p241_p3 = scmp.lt.s32.totalorder (!%p213_p2), %s1465_s22, 1  ;;  %vm266_vm0 = vcmask (!%p213_p2), 392192   ;;  %v2006_v29 = vmov (!%p213_p2), 0.0|0.0  }
   0x6   : > { %216 = sbr.rel (%p213_p2) target bundleno = 2963 (0xb93), region = 44  ;;  %v2062_v3 = vpack.c.bf16 (!%p213_p2), %v251_v1, %v250_v0  ;;  %v253_v4 = vld [vmem:[%s2267_s1 + $0x18] sm:$0xff] (!%p213_p2)  ;;  %v254_v6 = vld [vmem:[%s2267_s1 + $0x20] sm:$0xff] (!%p213_p2)  ;;  %v255_v7 = vld [vmem:[%s2267_s1 + $0x28] sm:$0xff] (!%p213_p2)  ;;  %vm782_vm1 = vcmask (!%p213_p2), 523264   ;;  %v2007_v58 = vmov (!%p213_p2), 0  }
   0x7   : > { %v2067_v5 = vpack.c.bf16 (!%p213_p2), %v253_v4, %v252_v2  ;;  %v2083_v8 = vpack.c.bf16 (!%p213_p2), %v255_v7, %v254_v6  ;;  %v261_v56 = vld [vmem:[%s2268_s2 + $0x8] sm:$0xff] (!%p213_p2)  ;;  %v264_v57 = vld [vmem:[%s2269_s3] sm:$0xff] (!%p213_p2)  ;;  %1990 = vset.pattern.permute.xlu0 (!%p213_p2), %v2007_v58  ;;  %1991 = vset.pattern.permute.xlu1 (!%p213_p2), %v2007_v58  ;;  %vm2008_vm2 = vmmov (!%p213_p2), 0   ;;  %vm1320_vm3 = vcmask (!%p213_p2), 785408  }
   0x8   : > { %1805 = vmatprep.subr.bf16.mxu1 (!%p213_p2), %v2062_v3  ;;  %1829 = vmatprep.subr.bf16.mxu0 (!%p213_p2), %v2062_v3  ;;  %v265_v59 = vld [vmem:[%s2269_s3 + $0x8] sm:$0xff] (!%p213_p2) }
   0x9   : > { %1807 = vmatpush3.bf16.msra.mxu1 (!%p213_p2), %v2062_v3  ;;  %1831 = vmatpush3.bf16.msra.mxu0 (!%p213_p2), %v2062_v3 }
   0xa   : > { %1809 = vmatprep.subr.bf16.mxu1 (!%p213_p2), %v2067_v5  ;;  %1833 = vmatprep.subr.bf16.mxu0 (!%p213_p2), %v2067_v5 }
   0xb   : > { %774 = vperm.xlu0 (!%p213_p2), %1990, %v264_v57  }
   0xd   : > { %s2274_s22 = smov (!%p241_p3, %s1465_s22), 1  ;;  %1811 = vmatpush3.bf16.msra.mxu1 %v2067_v5  ;;  %1835 = vmatpush3.bf16.msra.mxu0 %v2067_v5 }
   0xe   : > { %s1508_s11 = sshll.u32 %s2274_s22, 5  ;;  %1813 = vmatprep.subr.bf16.mxu1 %v2083_v8  ;;  %1837 = vmatprep.subr.bf16.mxu0 %v2083_v8  ;;  %s1472_s9 = sshll.u32 %s2274_s22, 3 }
   0xf   : > { %s245_s14 = scalar_lea.vmem %s2266_s0, %s1508_s11  ;;  %779 = vperm.xlu0 %1990, %v265_v59   ;;  %s249_s12 = scalar_lea.vmem %s2272_s6, %s1472_s9 }
  0x10   : > { %v2089_v9 = vld [vmem:[%s245_s14] sm:$0xff]  ;;  %v2098_v10 = vld [vmem:[%s245_s14 + $0x8] sm:$0xff]  ;;  %v2101_v11 = vld [vmem:[%s245_s14 + $0x10] sm:$0xff] }
  0x11   : > { %1624 = vmatprep.mubr.msk.f32.mxu1 %vm266_vm0, %v2089_v9  ;;  %1815 = vmatpush3.bf16.msra.mxu1 %v2083_v8  ;;  %v259_v12 = vld [vmem:[%s245_s14 + $0x18] sm:$0xff]  ;;  %v1865_v32 = vpack.c.bf16 %v2098_v10, %v2089_v9 }
  0x12   : > { %1839 = vmatpush3.bf16.msra.mxu0 %v2083_v8  ;;  %1817 = vmatprep.subr.bf16.mxu1 %v2062_v3  ;;  %v1868_v37 = vpack.c.bf16 %v259_v12, %v2101_v11 }
  0x13   : > { %1853 = vmatprep.subr.bf16.mxu0 %v2062_v3 }
  0x14   : > { %1625 = vmatmul.mubr.msk.f32.vlgmr.msra.gmra.mrb[0].mxu1 %vm266_vm0, %v2098_v10 }
  0x15   : > { %1627 = vmatprep.mubr.msk.f32.mxu1 %vm266_vm0, %v2101_v11  ;;  %1819 = vmatpush3.bf16.msra.mxu1 %v2062_v3 }
  0x16   : > { %1821 = vmatprep.subr.bf16.mxu1 %v2067_v5 }
  0x18   : > { %1628 = vmatmul.mubr.msk.f32.gmra.mrb[2].mxu1 %vm266_vm0, %v259_v12 }
  0x19   : > { %1823 = vmatpush3.bf16.msra.mxu1 %v2067_v5 }
  0x1a   : > { %1825 = vmatprep.subr.bf16.mxu1 %v2083_v8 }
  0x1d   : > { %1827 = vmatpush3.bf16.msra.mxu1 %v2083_v8 }
  0x1e   : > { %1841 = vmatprep.subr.bf16.mxu1 %v2062_v3 }
  0xe7   : > { %v1626_v13 = vpop.f32.mrb[0].mxu1 }
  0xe8   : > { %v345_v14 = vpop.f32.mrb[1].mxu1  ;;  %v365_v16 = vmul.f32 0.5, %v1626_v13 }
  0xe9   : > { %v364_v15 = vmul.f32 0.5, %v345_v14 }
  0xeb   : > { %v1629_v17 = vpop.f32.mrb[2].mxu1  ;;  %1642 = vmatprep.mubr.msk.f32.mxu1 %vm266_vm0, %v364_v15  ;;  %v1871_v40 = vpack.c.bf16 %v365_v16, %v364_v15 }
  0xec   : > { %v355_v18 = vpop.f32.mrb[3].mxu1  ;;  %1643 = vmatmul.mubr.msk.f32.vlgmr.msra.gmra.mrb[4].mxu1 %vm266_vm0, %v365_v16  ;;  %v367_v20 = vmul.f32 0.5, %v1629_v17 }
  0xed   : > { %v366_v19 = vmul.f32 0.5, %v355_v18  ;;  %1843 = vmatpush3.bf16.msra.mxu1 %v2062_v3 }
  0xee   : > { %1845 = vmatprep.subr.bf16.mxu1 %v2067_v5 }
  0xef   : > { %1645 = vmatprep.mubr.msk.f32.mxu1 %vm266_vm0, %v366_v19  ;;  %v1874_v41 = vpack.c.bf16 %v367_v20, %v366_v19 }
  0xf0   : > { %1646 = vmatmul.mubr.msk.f32.gmra.mrb[6].mxu1 %vm266_vm0, %v367_v20 }
  0xf1   : > { %1847 = vmatpush3.bf16.msra.mxu1 %v2067_v5 }
  0xf2   : > { %1849 = vmatprep.subr.bf16.mxu1 %v2083_v8 }
  0xf5   : > { %1851 = vmatpush3.bf16.msra.mxu1 %v2083_v8 }
  0xf6   : > { %1864 = vmatprep.subr.bf16.mxu1 %v2006_v29 }
 0x1bf   : > { %v1644_v21 = vpop.f32.mrb[4].mxu1 }
 0x1c0   : > { %v446_v22 = vpop.f32.mrb[5].mxu1  ;;  %v466_v24 = vsub.f32 %v1644_v21, %v2098_v10  ;;  %v263_v10 = vld [vmem:[%s2268_s2 + $0x18] sm:$0xff] }
 0x1c1   : > { %v465_v23 = vsub.f32 %v446_v22, %v2089_v9  ;;  %v260_v9 = vld [vmem:[%s2268_s2] sm:$0xff] }
 0x1c3   : > { %v1647_v25 = vpop.f32.mrb[6].mxu1  ;;  %1660 = vmatprep.mubr.msk.f32.mxu0 %vm266_vm0, %v465_v23  ;;  %v1877_v42 = vpack.c.bf16 %v466_v24, %v465_v23 }
 0x1c4   : > { %v456_v26 = vpop.f32.mrb[7].mxu1  ;;  %1661 = vmatmul.mubr.msk.f32.vlgmr.msra.gmra.mrb[0].mxu0 %vm266_vm0, %v466_v24  ;;  %v468_v28 = vsub.f32 %v1647_v25, %v259_v12  ;;  %v775_v12 = vpop.permute.xlu0 %774 }
 0x1c5   : > { %v467_v27 = vsub.f32 %v456_v26, %v2101_v11  ;;  %1855 = vmatpush3.bf16.msra.mxu0 %v2062_v3  ;;  %v262_v11 = vld [vmem:[%s2268_s2 + $0x10] sm:$0xff] }
 0x1c6   : > { %1857 = vmatprep.subr.bf16.mxu0 %v2067_v5 }
 0x1c7   : > { %1663 = vmatprep.mubr.msk.f32.mxu0 %vm266_vm0, %v467_v27  ;;  %v1880_v43 = vpack.c.bf16 %v468_v28, %v467_v27 }
 0x1c8   : > { %1664 = vmatmul.mubr.msk.f32.gmra.mrb[2].mxu0 %vm266_vm0, %v468_v28  ;;  %v780_v18 = vpop.permute.xlu0 %779 }
 0x1c9   : > { %1859 = vmatpush3.bf16.msra.mxu0 %v2067_v5 }
 0x1ca   : > { %1861 = vmatprep.subr.bf16.mxu0 %v2083_v8 }
 0x1cd   : > { %1863 = vmatpush3.bf16.msra.mxu0 %v2083_v8 }
 0x1ce   : > { %1901 = vmatprep.subr.bf16.mxu0 %v2062_v3 }
 0x297   : > { %v1662_v30 = vpop.f32.mrb[0].mxu0 }
 0x298   : > { %v547_v31 = vpop.f32.mrb[1].mxu0  ;;  %v2143_v34 = vsub.f32 %v1662_v30, %v365_v16 }
 0x299   : > { %v2141_v33 = vsub.f32 %v547_v31, %v364_v15 }
 0x29b   : > { %v1665_v35 = vpop.f32.mrb[2].mxu0  ;;  %1678 = vmatprep.mubr.msk.f32.mxu1 %vm266_vm0, %v2141_v33  ;;  %v1883_v44 = vpack.c.bf16 %v2143_v34, %v2141_v33 }
 0x29c   : > { %v557_v36 = vpop.f32.mrb[3].mxu0  ;;  %1679 = vmatmul.mubr.msk.f32.vlgmr.msra.gmra.mrb[8].mxu1 %vm266_vm0, %v2143_v34  ;;  %v2152_v39 = vsub.f32 %v1665_v35, %v367_v20 }
 0x29d   : > { %v2150_v38 = vsub.f32 %v557_v36, %v366_v19  ;;  %1866 = vmatpush1.bf16.msra.mxu1 %v1865_v32 }
 0x29e   : > { %1867 = vmatprep.subr.bf16.mxu1 %v2006_v29 }
 0x29f   : > { %1681 = vmatprep.mubr.msk.f32.mxu1 %vm266_vm0, %v2150_v38  ;;  %v1886_v45 = vpack.c.bf16 %v2152_v39, %v2150_v38 }
 0x2a0   : > { %1682 = vmatmul.mubr.msk.f32.gmra.mrb[10].mxu1 %vm266_vm0, %v2152_v39 }
 0x2a1   : > { %1869 = vmatpush1.bf16.msra.mxu1 %v1868_v37  ;;  %1493 = vmatprep.mubr.msk.f32.mxu1 %vm782_vm1, %v261_v56 }
 0x2a2   : > { %1870 = vmatprep.subr.bf16.mxu1 %v2006_v29 }
 0x2a5   : > { %1872 = vmatpush1.bf16.msra.mxu1 %v1871_v40 }
 0x2a6   : > { %1873 = vmatprep.subr.bf16.mxu1 %v2006_v29 }
 0x2a9   : > { %1875 = vmatpush1.bf16.msra.mxu1 %v1874_v41 }
 0x2aa   : > { %1876 = vmatprep.subr.bf16.mxu1 %v2006_v29 }
 0x2ad   : > { %1878 = vmatpush1.bf16.msra.mxu1 %v1877_v42 }
 0x2ae   : > { %1879 = vmatprep.subr.bf16.mxu1 %v2006_v29 }
 0x2b1   : > { %1881 = vmatpush1.bf16.msra.mxu1 %v1880_v43 }
 0x2b2   : > { %1882 = vmatprep.subr.bf16.mxu1 %v2006_v29 }
 0x2b5   : > { %1884 = vmatpush1.bf16.msra.mxu1 %v1883_v44 }
 0x2b6   : > { %1885 = vmatprep.subr.bf16.mxu1 %v2006_v29 }
 0x2b9   : > { %1887 = vmatpush1.bf16.msra.mxu1 %v1886_v45 }
 0x2ba   : > { %1888 = vmatprep.subr.bf16.mxu1 %v2006_v29 }
 0x36f   : > { %v1680_v46 = vpop.f32.mrb[8].mxu1 }
 0x370   : > { %v668_v47 = vsub.f32 %v1680_v46, %v466_v24  ;;  %v648_v48 = vpop.f32.mrb[9].mxu1 }
 0x371   : > { %v667_v49 = vsub.f32 %v648_v48, %v465_v23 }
 0x373   : > { %v1889_v50 = vpack.c.bf16 %v668_v47, %v667_v49  ;;  %v1683_v51 = vpop.f32.mrb[10].mxu1  ;;  %1696 = vmatprep.mubr.msk.f32.mxu0 %vm266_vm0, %v667_v49 }
 0x374   : > { %v670_v52 = vsub.f32 %v1683_v51, %v468_v28  ;;  %v658_v53 = vpop.f32.mrb[11].mxu1  ;;  %1697 = vmatmul.mubr.msk.f32.vlgmr.msra.gmra.mrb[4].mxu0 %vm266_vm0, %v668_v47 }
 0x375   : > { %v669_v54 = vsub.f32 %v658_v53, %v467_v27  ;;  %1890 = vmatpush1.bf16.msra.mxu1 %v1889_v50  ;;  %1903 = vmatpush3.bf16.msra.mxu0 %v2062_v3 }
 0x376   : > { %1891 = vmatprep.subr.bf16.mxu1 %v2006_v29  ;;  %1905 = vmatprep.subr.bf16.mxu0 %v2067_v5 }
 0x377   : > { %v1892_v55 = vpack.c.bf16 %v670_v52, %v669_v54  ;;  %1699 = vmatprep.mubr.msk.f32.mxu0 %vm266_vm0, %v669_v54 }
 0x378   : > { %1700 = vmatmul.mubr.msk.f32.gmra.mrb[6].mxu0 %vm266_vm0, %v670_v52 }
 0x379   : > { %1893 = vmatpush1.bf16.msra.mxu1 %v1892_v55  ;;  %1907 = vmatpush3.bf16.msra.mxu0 %v2067_v5 }
 0x37a   : > { %1894 = vmatprep.subr.bf16.mxu1 %v2006_v29  ;;  %1909 = vmatprep.subr.bf16.mxu0 %v2083_v8 }
 0x37d   : > { %1911 = vmatpush3.bf16.msra.mxu0 %v2083_v8 }
 0x37e   : > { %1913 = vmatprep.subr.bf16.mxu0 %v2062_v3 }
 0x447   : > { %v1698_v60 = vpop.f32.mrb[4].mxu0 }
 0x448   : > { %v769_v61 = vsub.f32 %v1698_v60, %v2143_v34  ;;  %v749_v62 = vpop.f32.mrb[5].mxu0 }
 0x449   : > { %v768_v63 = vsub.f32 %v749_v62, %v2141_v33 }
 0x44b   : > { %v1895_v0 = vpack.c.bf16 %v769_v61, %v768_v63  ;;  %v1701_v1 = vpop.f32.mrb[6].mxu0 }
 0x44c   : > { %v771_v2 = vsub.f32 %v1701_v1, %v2152_v39  ;;  %v759_v4 = vpop.f32.mrb[7].mxu0 }
 0x44d   : > { %v770_v6 = vsub.f32 %v759_v4, %v2150_v38  ;;  %1896 = vmatpush1.bf16.msra.mxu1 %v1895_v0 }
 0x44e   : > { %1897 = vmatprep.subr.bf16.mxu1 %v2006_v29 }
 0x44f   : > { %v1898_v7 = vpack.c.bf16 %v771_v2, %v770_v6 }
 0x451   : > { %1899 = vmatpush1.bf16.msra.mxu1 %v1898_v7  ;;  %v2009_v7 = vmov 0.0  }
 0x452   : > { %1949 = vmatprep.subr.bf16.mxu1 %v2062_v3 }
 0x454   : > { %854 = vmatmul.mubr.f32.vlgmr.msra.gmra.mrb[12].mxu1 %v260_v9  ;;  %v899_v9 = vld [vmem:[%s2271_s5] sm:$0xff] }
 0x455   : > { %1494 = vmatprep.mubr.msk.f32.mxu1 %vm782_vm1, %v263_v10  ;;  %1951 = vmatpush3.bf16.msra.mxu1 %v2062_v3 }
 0x456   : > { %1953 = vmatprep.subr.bf16.mxu1 %v2067_v5 }
 0x458   : > { %859 = vmatmul.mubr.f32.gmra.mrb[14].mxu1 %v262_v11 }
 0x459   : > { %1955 = vmatpush3.bf16.msra.mxu1 %v2067_v5 }
 0x45a   : > { %1957 = vmatprep.subr.bf16.mxu1 %v2083_v8 }
 0x45d   : > { %1959 = vmatpush3.bf16.msra.mxu1 %v2083_v8 }
 0x527   : > { %v855_v13 = vpop.f32.mrb[12].mxu1 }
 0x528   : > { %v856_v14 = vadd.f32 %v855_v13, %v775_v12  ;;  %v857_v15 = vpop.f32.mrb[13].mxu1 }
 0x529   : > { %v898_v15 = vld [vmem:[%s2270_s4] sm:$0xff] }
 0x52a   : > { %v864_v16 = vsel %vm266_vm0, %v856_v14, 0.0  ;;  %v872_v17 = vmul.f32 %v856_v14, %v856_v14 }
 0x52b   : > { %v860_v19 = vpop.f32.mrb[14].mxu1  ;;  %865 = vadd.xlane.f32.xlu1 %v864_v16 }
 0x52c   : > { %v861_v20 = vadd.f32 %v860_v19, %v780_v18  ;;  %v862_v21 = vpop.f32.mrb[15].mxu1  ;;  %v874_v22 = vsel %vm266_vm0, %v872_v17, 0.0 }
 0x52d   : > { %875 = vadd.xlane.f32.xlu0 %v874_v22 }
 0x52e   : > { %v867_v23 = vsel %vm266_vm0, %v861_v20, 0.0  ;;  %v873_v24 = vmul.f32 %v861_v20, %v861_v20 }
 0x52f   : > { %868 = vadd.xlane.f32.xlu1 %v867_v23 }
 0x530   : > { %v877_v25 = vsel %vm266_vm0, %v873_v24, 0.0 }
 0x533   : > { %878 = vadd.xlane.f32.xlu1 %v877_v25 }
 0x544   : > { %1317 = vperm.xlu1 %1991, %v899_v9  }
 0x5b8   : > { %v866_v26 = vpop.xlane.xlu1 %865 }
 0x5b9   : > { %v870_v27 = vmul.f32 0.020833334, %v866_v26 }
 0x5ba   : > { %v876_v28 = vpop.xlane.xlu0 %875 }
 0x5bb   : > { %v882_v30 = vmul.f32 %v870_v27, %v870_v27  ;;  %v880_v31 = vmul.f32 0.020833334, %v876_v28  ;;  %v888_v43 = vsub.f32 %v856_v14, %v870_v27 }
 0x5bc   : > { %v869_v32 = vpop.xlane.xlu1 %868 }
 0x5bd   : > { %v884_v33 = vsub.f32 %v880_v31, %v882_v30  ;;  %v871_v34 = vmul.f32 0.020833334, %v869_v32 }
 0x5bf   : > { %v886_v35 = vmax.f32 %v884_v33, 0.0  ;;  %v883_v38 = vmul.f32 %v871_v34, %v871_v34  ;;  %v889_v47 = vsub.f32 %v861_v20, %v871_v34 }
 0x5c0   : > { %v879_v36 = vpop.xlane.xlu1 %878 }
 0x5c1   : > { %v890_v37 = vadd.f32 1e-05, %v886_v35  ;;  %v881_v39 = vmul.f32 0.020833334, %v879_v36 }
 0x5c3   : > { %1992 = vrsqrt.f32 %v890_v37  ;;  %v885_v40 = vsub.f32 %v881_v39, %v883_v38 }
 0x5c5   : > { %v887_v41 = vmax.f32 %v885_v40, 0.0 }
 0x5c7   : > { %v891_v42 = vadd.f32 1e-05, %v887_v41 }
 0x5c9   : > { %1994 = vrsqrt.f32 %v891_v42 }
 0x5cd   : > { %v1993_v44 = vpop.eup %1992 }
 0x5ce   : > { %v894_v45 = vmul.f32 %v1993_v44, %v888_v43 }
 0x5d0   : > { %v896_v46 = vmax.f32 %v894_v45, 0.0 }
 0x5d2   : > { %1714 = vmatprep.mubr.msk.f32.mxu0 %vm266_vm0, %v896_v46 }
 0x5d3   : > { %v1995_v48 = vpop.eup %1994 }
 0x5d4   : > { %v895_v49 = vmul.f32 %v1995_v48, %v889_v47 }
 0x5d6   : > { %v897_v50 = vmax.f32 %v895_v49, 0.0 }
 0x5d8   : > { %1715 = vmatmul.mubr.msk.f32.vlgmr.msra.gmra.mrb[8].mxu0 %vm266_vm0, %v897_v50  ;;  %v1961_v63 = vpack.c.bf16 %v897_v50, %v896_v46 }
 0x5d9   : > { %1915 = vmatpush3.bf16.msra.mxu0 %v2062_v3 }
 0x5da   : > { %1917 = vmatprep.subr.bf16.mxu0 %v2067_v5 }
 0x5dd   : > { %1919 = vmatpush3.bf16.msra.mxu0 %v2067_v5 }
 0x5de   : > { %1921 = vmatprep.subr.bf16.mxu0 %v2083_v8 }
 0x5e1   : > { %1923 = vmatpush3.bf16.msra.mxu0 %v2083_v8 }
 0x5e2   : > { %1925 = vmatprep.subr.bf16.mxu0 %v2062_v3 }
 0x6ab   : > { %v1716_v51 = vpop.f32.mrb[8].mxu0 }
 0x6ac   : > { %v972_v52 = vpop.f32.mrb[9].mxu0  ;;  %v982_v54 = vmul.f32 0.5, %v1716_v51 }
 0x6ad   : > { %v981_v53 = vmul.f32 0.5, %v972_v52 }
 0x6af   : > { %1729 = vmatprep.mubr.msk.f32.mxu0 %vm266_vm0, %v981_v53 }
 0x6b0   : > { %1730 = vmatmul.mubr.msk.f32.vlgmr.msra.gmra.mrb[10].mxu0 %vm266_vm0, %v982_v54 }
 0x6b1   : > { %1927 = vmatpush3.bf16.msra.mxu0 %v2062_v3 }
 0x6b2   : > { %1929 = vmatprep.subr.bf16.mxu0 %v2067_v5 }
 0x6b5   : > { %1931 = vmatpush3.bf16.msra.mxu0 %v2067_v5 }
 0x6b6   : > { %1933 = vmatprep.subr.bf16.mxu0 %v2083_v8 }
 0x6b9   : > { %1935 = vmatpush3.bf16.msra.mxu0 %v2083_v8 }
 0x6ba   : > { %1937 = vmatprep.subr.bf16.mxu0 %v2062_v3 }
 0x783   : > { %v1731_v55 = vpop.f32.mrb[10].mxu0 }
 0x784   : > { %v1055_v56 = vpop.f32.mrb[11].mxu0  ;;  %v1065_v58 = vsub.f32 %v1731_v55, %v897_v50 }
 0x785   : > { %v1064_v57 = vsub.f32 %v1055_v56, %v896_v46 }
 0x787   : > { %1744 = vmatprep.mubr.msk.f32.mxu0 %vm266_vm0, %v1064_v57 }
 0x788   : > { %1745 = vmatmul.mubr.msk.f32.vlgmr.msra.gmra.mrb[12].mxu0 %vm266_vm0, %v1065_v58 }
 0x789   : > { %1939 = vmatpush3.bf16.msra.mxu0 %v2062_v3  ;;  %v1964_v3 = vpack.c.bf16 %v982_v54, %v981_v53 }
 0x78a   : > { %1941 = vmatprep.subr.bf16.mxu0 %v2067_v5 }
 0x78d   : > { %1943 = vmatpush3.bf16.msra.mxu0 %v2067_v5  ;;  %v1967_v5 = vpack.c.bf16 %v1065_v58, %v1064_v57 }
 0x78e   : > { %1945 = vmatprep.subr.bf16.mxu0 %v2083_v8 }
 0x791   : > { %1947 = vmatpush3.bf16.msra.mxu0 %v2083_v8 }
 0x792   : > { %1960 = vmatprep.subr.bf16.mxu0 %v2006_v29 }
 0x85b   : > { %v1746_v59 = vpop.f32.mrb[12].mxu0 }
 0x85c   : > { %v1138_v60 = vpop.f32.mrb[13].mxu0  ;;  %v1148_v62 = vsub.f32 %v1746_v59, %v982_v54 }
 0x85d   : > { %v1147_v61 = vsub.f32 %v1138_v60, %v981_v53 }
 0x85f   : > { %1759 = vmatprep.mubr.msk.f32.mxu0 %vm266_vm0, %v1147_v61  ;;  %v1970_v8 = vpack.c.bf16 %v1148_v62, %v1147_v61 }
 0x860   : > { %1760 = vmatmul.mubr.msk.f32.vlgmr.msra.gmra.mrb[14].mxu0 %vm266_vm0, %v1148_v62 }
 0x861   : > { %1962 = vmatpush3.bf16.msra.mxu0 %v1961_v63  ;;  %1801 = vmatprep.mubr.msk.f32.mxu0 %vm2008_vm2, %v2009_v7 }
 0x862   : > { %1963 = vmatprep.subr.bf16.mxu0 %v2006_v29 }
 0x865   : > { %1965 = vmatpush3.bf16.msra.mxu0 %v1964_v3 }
 0x866   : > { %1966 = vmatprep.subr.bf16.mxu0 %v2006_v29 }
 0x869   : > { %1968 = vmatpush3.bf16.msra.mxu0 %v1967_v5 }
 0x86a   : > { %1969 = vmatprep.subr.bf16.mxu0 %v2006_v29 }
 0x86d   : > { %1971 = vmatpush3.bf16.msra.mxu0 %v1970_v8 }
 0x86e   : > { %1972 = vmatprep.subr.bf16.mxu0 %v2006_v29 }
 0x933   : > { %v1761_v0 = vpop.f32.mrb[14].mxu0 }
 0x934   : > { %v1231_v1 = vsub.f32 %v1761_v0, %v1065_v58  ;;  %v1221_v2 = vpop.f32.mrb[15].mxu0 }
 0x935   : > { %v1230_v4 = vsub.f32 %v1221_v2, %v1064_v57 }
 0x937   : > { %v1973_v6 = vpack.c.bf16 %v1231_v1, %v1230_v4  ;;  %1774 = vmatprep.mubr.msk.f32.mxu1 %vm266_vm0, %v1230_v4 }
 0x938   : > { %1775 = vmatmul.mubr.msk.f32.vlgmr.msra.gmra.mrb[16].mxu1 %vm266_vm0, %v1231_v1 }
 0x939   : > { %1974 = vmatpush3.bf16.msra.mxu0 %v1973_v6 }
 0x93a   : > { %1975 = vmatprep.subr.bf16.mxu0 %v2006_v29  ;;  %v1318_v29 = vpop.permute.xlu1 %1317 }
 0xa0b   : > { %v1776_v10 = vpop.f32.mrb[16].mxu1 }
 0xa0c   : > { %v1314_v11 = vsub.f32 %v1776_v10, %v1148_v62  ;;  %v1304_v12 = vpop.f32.mrb[17].mxu1 }
 0xa0d   : > { %v1313_v13 = vsub.f32 %v1304_v12, %v1147_v61 }
 0xa0f   : > { %v1976_v14 = vpack.c.bf16 %v1314_v11, %v1313_v13 }
 0xa11   : > { %1977 = vmatpush3.bf16.msra.mxu0 %v1976_v14 }
 0xa14   : > { %1802 = vmatmul.mubr.msk.f32.vlgmr.msra.gmra.mrb[16].mxu0 %vm1320_vm3, %v898_v15 }
 0xae7   : > { %v1390_v16 = vpop.f32.mrb[16].mxu0 }
 0xae8   : > { %v1391_v17 = vadd.f32 %v1390_v16, %v1318_v29  ;;  %v1803_v18 = vpop.f32.mrb[17].mxu0 }
 0xaea   : > { %v1394_v19 = vsel %vm266_vm0, %v1391_v17, 0.0  ;;  %v1398_v20 = vmul.f32 %v1391_v17, %v1391_v17 }
 0xaeb   : > { %1395 = vadd.xlane.f32.xlu1 %v1394_v19 }
 0xaec   : > { %v1399_v21 = vsel %vm266_vm0, %v1398_v20, 0.0 }
 0xaed   : > { %1400 = vadd.xlane.f32.xlu0 %v1399_v21 }
 0xb78   : > { %v1396_v22 = vpop.xlane.xlu1 %1395 }
 0xb79   : > { %v1397_v23 = vmul.f32 0.020833334, %v1396_v22 }
 0xb7a   : > { %v1401_v24 = vpop.xlane.xlu0 %1400 }
 0xb7b   : > { %v1403_v25 = vmul.f32 %v1397_v23, %v1397_v23  ;;  %v1402_v26 = vmul.f32 0.020833334, %v1401_v24  ;;  %v1406_v31 = vsub.f32 %v1391_v17, %v1397_v23 }
 0xb7d   : > { %v1404_v27 = vsub.f32 %v1402_v26, %v1403_v25 }
 0xb7f   : > { %v1405_v28 = vmax.f32 %v1404_v27, 0.0 }
 0xb81   : > { %v1407_v30 = vadd.f32 1e-05, %v1405_v28 }
 0xb83   : > { %1996 = vrsqrt.f32 %v1407_v30 }
 0xb8d   : > { %v1997_v32 = vpop.eup %1996 }
 0xb8e   : > { %v1409_v33 = vmul.f32 %v1997_v32, %v1406_v31 }
 0xb90   : > { %v1410_v34 = vmax.f32 %v1409_v33, 0.0 }
 0xb92   : > { %1411 = vst.msk [vmem:[%s249_s12] sm:$0xff] %vm266_vm0, %v1410_v34 }
 0xb93 PF: > { %s16_s21 = sadd.s32 1, %s2004_s21  }
 0xb94   : > { %p13_p4 = scmp.ge.s32.totalorder %s16_s21, 4  }
 0xb96   :  { %15 = sbr.rel (!%p13_p4) target bundleno = 1 (0x1), region = 74 }

// kernel: forward.9
= control target key start
LH: loop header
LB: loop body
LE: loop exit
PB: predicated region body
PF: predicated region fallthrough
CT: control target
= control target key end

     0   :  { %11 = vsyncpa [#allocation3], 0  ;;  %s2777_s0 = inlined_call_operand.vmem [shape: f32[2,16,192], index: 0, kind: input, shape index: {}]   ;;  %s2778_s1 = inlined_call_operand.vmem [shape: f32[192,192], index: 1, kind: input, shape index: {}]   ;;  %s2779_s2 = inlined_call_operand.vmem [shape: f32[8,96], index: 2, kind: input, shape index: {}]   ;;  %s2780_s3 = inlined_call_operand.vmem [shape: f32[8,1], index: 3, kind: input, shape index: {}]   ;;  %s2781_s4 = inlined_call_operand.vmem [shape: f32[2,48], index: 4, kind: input, shape index: {}]   ;;  %s2782_s5 = inlined_call_operand.vmem [shape: f32[2,1], index: 5, kind: input, shape index: {}]   ;;  %s2783_s6 = inlined_call_operand.hbm [shape: f32[2,2,192], index: 6, kind: output, shape index: {}]  }
   0x1   :  { %13 = vsyncpa [#allocation3 + $0x1], 0  ;;  %s2118_s21 = smov 0   ;;  %s2120_s22 = smov 0  }
   0x2   :  { %s2122_s23 = smov 0   ;;  %s2124_s24 = smov 0  }
   0x3 LB: > { %s2139_s25 = sadd.s32 4294967295, %s2077_s24   ;;  %s1420_s26 = sadd.s32 4294967294, %s2077_s24   ;;  %s2077_s24 = sphi %s2124_s24, %s2789_s24   ;;  %s2073_s23 = sphi %s2122_s23, %s2788_s23   ;;  %s2069_s22 = sphi %s2120_s22, %s2787_s22   ;;  %s2065_s21 = sphi %s2118_s21, %s2786_s21  }
   0x4   : > { %s2143_s27 = sadd.s32 1, %s2077_s24   ;;  %s157_s28 = sadd.s32 1, %s2073_s23 }
   0x5   : > { %s154_s29 = ssub.s32 %s2077_s24, %s2143_s27  ;;  %p167_p0 = scmp.ne.s32.totalorder %s2073_s23, %s2069_s22 }
   0x6   : > { %p155_p1 = scmp.eq.s32.totalorder %s154_s29, 0  ;;  %p168_p2 = scmp.eq.s32.totalorder %s2139_s25, 1 }
   0x7   : > { %p173_p3 = scmp.ne.s32.totalorder %s2069_s22, %s2065_s21  ;;  %p174_p4 = scmp.eq.s32.totalorder %s1420_s26, 1 }
   0x8   : > { %s2154_s30 = scalar_select %p155_p1, %s2073_s23, %s157_s28  }
   0x9   : > { %p2156_p5 = por %p168_p2, %p167_p0  ;;  %p2160_p6 = por %p174_p4, %p173_p3 }
   0xa   : > { %p1423_p7 = scmp.ge.s32.totalorder %s2077_s24, 1  ;;  %p215_p8 = scmp.lt.s32.totalorder %s2077_s24, 3 }
   0xc   : > { %p216_p9 = pnand %p1423_p7, %p215_p8 }
   0xd   : > { %v251_v0 = vld [vmem:[%s2778_s1 + $0x8] sm:$0xff] (!%p216_p9)  ;;  %v253_v1 = vld [vmem:[%s2778_s1 + $0x18] sm:$0xff] (!%p216_p9)  ;;  %v250_v2 = vld [vmem:[%s2778_s1] sm:$0xff] (!%p216_p9)  ;;  %p245_p10 = scmp.lt.s32.totalorder (!%p216_p9), %s2139_s25, 1  ;;  %vm304_vm0 = vcmask (!%p216_p9), 523264   ;;  %vm745_vm1 = vcmask (!%p216_p9), 785408  }
   0xe   : > { %219 = sbr.rel (%p216_p9) target bundleno = 3027 (0xbd3), region = 44  ;;  %v2175_v3 = vpack.c.bf16 (!%p216_p9), %v253_v1, %v251_v0  ;;  %v252_v4 = vld [vmem:[%s2778_s1 + $0x10] sm:$0xff] (!%p216_p9)  ;;  %v255_v5 = vld [vmem:[%s2778_s1 + $0x28] sm:$0xff] (!%p216_p9)  ;;  %v257_v6 = vld [vmem:[%s2778_s1 + $0x38] sm:$0xff] (!%p216_p9)  ;;  %vm1230_vm2 = vcmask (!%p216_p9), 392192   ;;  %vm1305_vm3 = vcmask (!%p216_p9), 1041408  }
   0xf   : > { %v2186_v7 = vpack.c.bf16 (!%p216_p9), %v252_v4, %v250_v2  ;;  %v2188_v8 = vpack.c.bf16 (!%p216_p9), %v257_v6, %v255_v5  ;;  %v254_v9 = vld [vmem:[%s2778_s1 + $0x20] sm:$0xff] (!%p216_p9)  ;;  %v256_v10 = vld [vmem:[%s2778_s1 + $0x30] sm:$0xff] (!%p216_p9)  ;;  %v259_v11 = vld [vmem:[%s2778_s1 + $0x48] sm:$0xff] (!%p216_p9)  ;;  %vm1307_vm4 = vcmask (!%p216_p9), 517120   ;;  %vm1343_vm5 = vcmask (!%p216_p9), 519170   ;;  %s1450_s18 = sshll.u32 (!%p216_p9), %s2139_s25, 6 }
  0x10   : > { %1452 = vmatprep.subr.bf16.mxu0 (!%p216_p9), %v2175_v3  ;;  %v261_v12 = vld [vmem:[%s2778_s1 + $0x58] sm:$0xff] (!%p216_p9)  ;;  %1500 = vmatprep.subr.bf16.mxu1 (!%p216_p9), %v2175_v3  ;;  %v2206_v13 = vpack.c.bf16 (!%p216_p9), %v256_v10, %v254_v9  ;;  %v258_v15 = vld [vmem:[%s2778_s1 + $0x40] sm:$0xff] (!%p216_p9)  ;;  %v260_v16 = vld [vmem:[%s2778_s1 + $0x50] sm:$0xff] (!%p216_p9) }
  0x11   : > { %1454 = vmatpush1.bf16.msra.mxu0 (!%p216_p9), %v2186_v7  ;;  %1502 = vmatpush1.bf16.msra.mxu1 (!%p216_p9), %v2186_v7  ;;  %v2210_v14 = vpack.c.bf16 (!%p216_p9), %v261_v12, %v259_v11  ;;  %v263_v17 = vld [vmem:[%s2778_s1 + $0x68] sm:$0xff] (!%p216_p9)  ;;  %v265_v18 = vld [vmem:[%s2778_s1 + $0x78] sm:$0xff] (!%p216_p9)  ;;  %v2229_v19 = vpack.c.bf16 (!%p216_p9), %v260_v16, %v258_v15  ;;  %v262_v21 = vld [vmem:[%s2778_s1 + $0x60] sm:$0xff] (!%p216_p9) }
  0x12   : > { %1456 = vmatprep.subr.bf16.mxu0 (!%p216_p9), %v2188_v8  ;;  %1504 = vmatprep.subr.bf16.mxu1 (!%p216_p9), %v2188_v8  ;;  %v2233_v20 = vpack.c.bf16 (!%p216_p9), %v265_v18, %v263_v17  ;;  %v264_v22 = vld [vmem:[%s2778_s1 + $0x70] sm:$0xff] (!%p216_p9)  ;;  %v267_v23 = vld [vmem:[%s2778_s1 + $0x88] sm:$0xff] (!%p216_p9)  ;;  %v269_v24 = vld [vmem:[%s2778_s1 + $0x98] sm:$0xff] (!%p216_p9) }
  0x13   : > { %v2249_v25 = vpack.c.bf16 (!%p216_p9), %v264_v22, %v262_v21  ;;  %v2253_v26 = vpack.c.bf16 (!%p216_p9), %v269_v24, %v267_v23  ;;  %v266_v27 = vld [vmem:[%s2778_s1 + $0x80] sm:$0xff] (!%p216_p9)  ;;  %v268_v28 = vld [vmem:[%s2778_s1 + $0x90] sm:$0xff] (!%p216_p9)  ;;  %v271_v29 = vld [vmem:[%s2778_s1 + $0xa8] sm:$0xff] (!%p216_p9) }
  0x14   : > { %v273_v30 = vld [vmem:[%s2778_s1 + $0xb8] sm:$0xff] (!%p216_p9)  ;;  %v2274_v31 = vpack.c.bf16 (!%p216_p9), %v268_v28, %v266_v27  ;;  %v270_v34 = vld [vmem:[%s2778_s1 + $0xa0] sm:$0xff] (!%p216_p9)  ;;  %v272_v35 = vld [vmem:[%s2778_s1 + $0xb0] sm:$0xff] (!%p216_p9) }
  0x15   : > { %s246_s28 = scalar_select %p245_p10, %s2139_s25, 1  ;;  %1458 = vmatpush1.bf16.msra.mxu0 %v2206_v13  ;;  %1506 = vmatpush1.bf16.msra.mxu1 %v2206_v13  ;;  %v2281_v33 = vpack.c.bf16 %v273_v30, %v271_v29  ;;  %v275_v36 = vld [vmem:[%s2778_s1 + $0xc8] sm:$0xff]  ;;  %v277_v37 = vld [vmem:[%s2778_s1 + $0xd8] sm:$0xff]  ;;  %v2299_v38 = vpack.c.bf16 %v272_v35, %v270_v34  ;;  %v274_v40 = vld [vmem:[%s2778_s1 + $0xc0] sm:$0xff] }
  0x16   : > { %1460 = vmatprep.subr.bf16.mxu0 %v2210_v14  ;;  %1508 = vmatprep.subr.bf16.mxu1 %v2210_v14  ;;  %v2303_v39 = vpack.c.bf16 %v277_v37, %v275_v36  ;;  %v276_v41 = vld [vmem:[%s2778_s1 + $0xd0] sm:$0xff]  ;;  %v279_v42 = vld [vmem:[%s2778_s1 + $0xe8] sm:$0xff]  ;;  %v281_v43 = vld [vmem:[%s2778_s1 + $0xf8] sm:$0xff]  ;;  %s2082_s25 = smov [#allocation2]  }
  0x17   : > { %s1449_s16 = sshll.u32 %s246_s28, 5  ;;  %v2319_v44 = vpack.c.bf16 %v276_v41, %v274_v40  ;;  %v2323_v45 = vpack.c.bf16 %v281_v43, %v279_v42  ;;  %v278_v46 = vld [vmem:[%s2778_s1 + $0xe0] sm:$0xff]  ;;  %v280_v47 = vld [vmem:[%s2778_s1 + $0xf0] sm:$0xff]  ;;  %v283_v48 = vld [vmem:[%s2778_s1 + $0x108] sm:$0xff]  ;;  %s2019_s11 = sshll.u32 %s2082_s25, 4  ;;  %s2020_s11 = int_to_ptr.vmem [resolvable:$false] %s2019_s11 }
  0x18   : > { %s2264_s29 = scalar_lea.vmem %s2777_s0, %s1449_s16  ;;  %v285_v49 = vld [vmem:[%s2778_s1 + $0x118] sm:$0xff]  ;;  %v2339_v50 = vpack.c.bf16 %v280_v47, %v278_v46  ;;  %v282_v52 = vld [vmem:[%s2778_s1 + $0x100] sm:$0xff]  ;;  %v284_v53 = vld [vmem:[%s2778_s1 + $0x110] sm:$0xff]  ;;  %s242_s16 = sand.u32 1, %s2069_s22  }
  0x19   : > { %1462 = vmatpush1.bf16.msra.mxu0 %v2229_v19  ;;  %1510 = vmatpush1.bf16.msra.mxu1 %v2229_v19  ;;  %v2277_v32 = vld [vmem:[%s2264_s29 + $0x8] sm:$0xff]  ;;  %v2343_v51 = vpack.c.bf16 %v285_v49, %v283_v48  ;;  %v289_v55 = vld [vmem:[%s2778_s1 + $0x138] sm:$0xff]  ;;  %v2359_v56 = vpack.c.bf16 %v284_v53, %v282_v52  ;;  %v286_v58 = vld [vmem:[%s2778_s1 + $0x120] sm:$0xff]  ;;  %s1424_s17 = sshll.u32 %s242_s16, 2  ;;  %s1347_s9 = scalar_lea.sflag [#allocation3], %s242_s16 }
  0x1a   : > { %1464 = vmatprep.subr.bf16.mxu0 %v2233_v20  ;;  %1512 = vmatprep.subr.bf16.mxu1 %v2233_v20  ;;  %v287_v54 = vld [vmem:[%s2778_s1 + $0x128] sm:$0xff]  ;;  %v288_v59 = vld [vmem:[%s2778_s1 + $0x130] sm:$0xff]  ;;  %v293_v61 = vld [vmem:[%s2778_s1 + $0x158] sm:$0xff]  ;;  %s244_s19 = scalar_lea.vmem [#allocation2], %s1424_s17  ;;  %s2021_s12 = scalar_lea.vmem %s2020_s11, 128 }
  0x1b   : > { %1427 = vmatprep.mubr.msk.f32.mxu0 %vm304_vm0, %v2277_v32  ;;  %v2363_v57 = vpack.c.bf16 %v289_v55, %v287_v54  ;;  %v291_v60 = vld [vmem:[%s2778_s1 + $0x148] sm:$0xff]  ;;  %v2379_v62 = vpack.c.bf16 %v288_v59, %v286_v58  ;;  %v290_v0 = vld [vmem:[%s2778_s1 + $0x140] sm:$0xff]  ;;  %v292_v1 = vld [vmem:[%s2778_s1 + $0x150] sm:$0xff]  ;;  %s1361_s20 = sshll.u32 %s244_s19, 4  ;;  %s2737_s20 = int_to_ptr.vmem [resolvable:$true] %s1361_s20 }
  0x1c   : > { %v2383_v63 = vpack.c.bf16 %v293_v61, %v291_v60  ;;  %v295_v2 = vld [vmem:[%s2778_s1 + $0x168] sm:$0xff]  ;;  %v297_v4 = vld [vmem:[%s2778_s1 + $0x178] sm:$0xff]  ;;  %v2399_v5 = vpack.c.bf16 %v292_v1, %v290_v0  ;;  %v294_v9 = vld [vmem:[%s2778_s1 + $0x160] sm:$0xff]  ;;  %s2015_s10 = scalar_lea.vmem %s2737_s20, 64  ;;  %p2022_p0 = scmp.lt.s32.totalorder %s2737_s20, %s2020_s11 }
  0x1d   : > { %1466 = vmatpush1.bf16.msra.mxu0 %v2249_v25  ;;  %1514 = vmatpush1.bf16.msra.mxu1 %v2249_v25  ;;  %v2403_v6 = vpack.c.bf16 %v297_v4, %v295_v2  ;;  %v296_v10 = vld [vmem:[%s2778_s1 + $0x170] sm:$0xff]  ;;  %v2420_v12 = vld [vmem:[%s2264_s29] sm:$0xff]  ;;  %v2424_v15 = vld [vmem:[%s2264_s29 + $0x18] sm:$0xff]  ;;  %p2016_p11 = scmp.ne.s32.totalorder %s2737_s20, %s2015_s10  ;;  %p2023_p1 = scmp.lt.s32.totalorder %s2021_s12, %s2015_s10 }
  0x1e   : > { %1468 = vmatprep.subr.bf16.mxu0 %v2253_v26  ;;  %1516 = vmatprep.subr.bf16.mxu1 %v2253_v26  ;;  %v2413_v11 = vpack.c.bf16 %v296_v10, %v294_v9  ;;  %v2432_v16 = vld [vmem:[%s2264_s29 + $0x10] sm:$0xff]  ;;  %v1691_v42 = vpack.c.bf16 %v2424_v15, %v2277_v32  ;;  %vm1344_vm6 = vmor %vm1343_vm5, %vm1305_vm3  ;;  %s2735_s29 = scalar_lea.hbm %s2783_s6, %s1450_s18 }
  0x1f   : > { %v1693_v47 = vpack.c.bf16 %v2432_v16, %v2420_v12  ;;  %p2017_p12 = pnand %p2016_p11, %p2156_p5  ;;  %p2024_p2 = por %p2023_p1, %p2022_p0 }
  0x21   : > { %1470 = vmatpush1.bf16.msra.mxu0 %v2274_v31  ;;  %1518 = vmatpush1.bf16.msra.mxu1 %v2274_v31  ;;  %p2018_p13 = pneg %p2017_p12 }
  0x22   : > { %1472 = vmatprep.subr.bf16.mxu0 %v2281_v33  ;;  %1520 = vmatprep.subr.bf16.mxu1 %v2281_v33 }
  0x23   : > { %p2025_p3 = pnand %p2024_p2, %p2018_p13 }
  0x25   : > { %1474 = vmatpush1.bf16.msra.mxu0 %v2299_v38  ;;  %1522 = vmatpush1.bf16.msra.mxu1 %v2299_v38 }
  0x26   : > { %1476 = vmatprep.subr.bf16.mxu0 %v2303_v39  ;;  %1524 = vmatprep.subr.bf16.mxu1 %v2303_v39 }
  0x29   : > { %1478 = vmatpush1.bf16.msra.mxu0 %v2319_v44  ;;  %1526 = vmatpush1.bf16.msra.mxu1 %v2319_v44 }
  0x2a   : > { %1480 = vmatprep.subr.bf16.mxu0 %v2323_v45  ;;  %1528 = vmatprep.subr.bf16.mxu1 %v2323_v45 }
  0x2d   : > { %1482 = vmatpush1.bf16.msra.mxu0 %v2339_v50  ;;  %1530 = vmatpush1.bf16.msra.mxu1 %v2339_v50 }
  0x2e   : > { %1484 = vmatprep.subr.bf16.mxu0 %v2343_v51  ;;  %1532 = vmatprep.subr.bf16.mxu1 %v2343_v51 }
  0x31   : > { %1486 = vmatpush1.bf16.msra.mxu0 %v2359_v56  ;;  %1534 = vmatpush1.bf16.msra.mxu1 %v2359_v56 }
  0x32   : > { %1488 = vmatprep.subr.bf16.mxu0 %v2363_v57  ;;  %1536 = vmatprep.subr.bf16.mxu1 %v2363_v57 }
  0x35   : > { %1490 = vmatpush1.bf16.msra.mxu0 %v2379_v62  ;;  %1538 = vmatpush1.bf16.msra.mxu1 %v2379_v62 }
  0x36   : > { %1492 = vmatprep.subr.bf16.mxu0 %v2383_v63  ;;  %1540 = vmatprep.subr.bf16.mxu1 %v2383_v63 }
  0x39   : > { %1494 = vmatpush1.bf16.msra.mxu0 %v2399_v5  ;;  %1542 = vmatpush1.bf16.msra.mxu1 %v2399_v5 }
  0x3a   : > { %1496 = vmatprep.subr.bf16.mxu0 %v2403_v6  ;;  %1544 = vmatprep.subr.bf16.mxu1 %v2403_v6 }
  0x3d   : > { %1498 = vmatpush1.bf16.msra.mxu0 %v2413_v11  ;;  %1546 = vmatpush1.bf16.msra.mxu1 %v2413_v11 }
  0x3e   : > { %1548 = vmatprep.subr.bf16.mxu0 %v2175_v3  ;;  %1596 = vmatprep.subr.bf16.mxu1 %v2175_v3 }
  0x40   : > { %376 = vmatmul.mubr.f32.vlgmr.msra.gmra.mrb[0].mxu0 %v2420_v12 }
  0x41   : > { %1428 = vmatprep.mubr.msk.f32.mxu0 %vm304_vm0, %v2424_v15  ;;  %1550 = vmatpush1.bf16.msra.mxu0 %v2186_v7 }
  0x42   : > { %1552 = vmatprep.subr.bf16.mxu0 %v2188_v8 }
  0x44   : > { %382 = vmatmul.mubr.f32.gmra.mrb[2].mxu0 %v2432_v16 }
  0x45   : > { %1554 = vmatpush1.bf16.msra.mxu0 %v2206_v13 }
  0x46   : > { %1556 = vmatprep.subr.bf16.mxu0 %v2210_v14 }
  0x49   : > { %1558 = vmatpush1.bf16.msra.mxu0 %v2229_v19 }
  0x4a   : > { %1560 = vmatprep.subr.bf16.mxu0 %v2233_v20 }
  0x4d   : > { %1562 = vmatpush1.bf16.msra.mxu0 %v2249_v25 }
  0x4e   : > { %1564 = vmatprep.subr.bf16.mxu0 %v2253_v26 }
  0x51   : > { %1566 = vmatpush1.bf16.msra.mxu0 %v2274_v31 }
  0x52   : > { %1568 = vmatprep.subr.bf16.mxu0 %v2281_v33 }
  0x55   : > { %1570 = vmatpush1.bf16.msra.mxu0 %v2299_v38 }
  0x56   : > { %1572 = vmatprep.subr.bf16.mxu0 %v2303_v39 }
  0x59   : > { %1574 = vmatpush1.bf16.msra.mxu0 %v2319_v44 }
  0x5a   : > { %1576 = vmatprep.subr.bf16.mxu0 %v2323_v45 }
  0x5d   : > { %1578 = vmatpush1.bf16.msra.mxu0 %v2339_v50 }
  0x5e   : > { %1580 = vmatprep.subr.bf16.mxu0 %v2343_v51 }
  0x61   : > { %1582 = vmatpush1.bf16.msra.mxu0 %v2359_v56 }
  0x62   : > { %1584 = vmatprep.subr.bf16.mxu0 %v2363_v57 }
  0x65   : > { %1586 = vmatpush1.bf16.msra.mxu0 %v2379_v62 }
  0x66   : > { %1588 = vmatprep.subr.bf16.mxu0 %v2383_v63 }
  0x69   : > { %1590 = vmatpush1.bf16.msra.mxu0 %v2399_v5 }
  0x6a   : > { %1592 = vmatprep.subr.bf16.mxu0 %v2403_v6 }
  0x6d   : > { %1594 = vmatpush1.bf16.msra.mxu0 %v2413_v11 }
  0x6e   : > { %1644 = vmatprep.subr.bf16.mxu0 %v2175_v3 }
 0x113   : > { %v377_v17 = vpop.f32.mrb[0].mxu0 }
 0x114   : > { %v379_v18 = vpop.f32.mrb[1].mxu0  ;;  %v2461_v22 = vmul.f32 0.5, %v377_v17 }
 0x115   : > { %v2459_v21 = vmul.f32 0.5, %v379_v18 }
 0x117   : > { %v383_v23 = vpop.f32.mrb[2].mxu0  ;;  %1429 = vmatprep.mubr.msk.f32.mxu1 %vm304_vm0, %v2459_v21 }
 0x118   : > { %v385_v24 = vpop.f32.mrb[3].mxu0  ;;  %463 = vmatmul.mubr.f32.vlgmr.msra.gmra.mrb[0].mxu1 %v2461_v22  ;;  %v2469_v28 = vmul.f32 0.5, %v383_v23  ;;  %v2080_v23 = vmov 0  }
 0x119   : > { %v2466_v27 = vmul.f32 0.5, %v385_v24  ;;  %1598 = vmatpush1.bf16.msra.mxu1 %v2186_v7  ;;  %2009 = vset.pattern.permute.xlu0 %v2080_v23 }
 0x11a   : > { %1600 = vmatprep.subr.bf16.mxu1 %v2188_v8  ;;  %v1697_v58 = vpack.c.bf16 %v2469_v28, %v2461_v22  ;;  %2010 = vset.pattern.permute.xlu1 %v2080_v23 }
 0x11b   : > { %1430 = vmatprep.mubr.msk.f32.mxu1 %vm304_vm0, %v2466_v27 }
 0x11c   : > { %469 = vmatmul.mubr.f32.gmra.mrb[2].mxu1 %v2469_v28 }
 0x11d   : > { %1602 = vmatpush1.bf16.msra.mxu1 %v2206_v13 }
 0x11e   : > { %1604 = vmatprep.subr.bf16.mxu1 %v2210_v14 }
 0x121   : > { %1606 = vmatpush1.bf16.msra.mxu1 %v2229_v19 }
 0x122   : > { %1608 = vmatprep.subr.bf16.mxu1 %v2233_v20 }
 0x125   : > { %1610 = vmatpush1.bf16.msra.mxu1 %v2249_v25 }
 0x126   : > { %1612 = vmatprep.subr.bf16.mxu1 %v2253_v26 }
 0x129   : > { %1614 = vmatpush1.bf16.msra.mxu1 %v2274_v31 }
 0x12a   : > { %1616 = vmatprep.subr.bf16.mxu1 %v2281_v33 }
 0x12d   : > { %1618 = vmatpush1.bf16.msra.mxu1 %v2299_v38 }
 0x12e   : > { %1620 = vmatprep.subr.bf16.mxu1 %v2303_v39 }
 0x131   : > { %1622 = vmatpush1.bf16.msra.mxu1 %v2319_v44 }
 0x132   : > { %1624 = vmatprep.subr.bf16.mxu1 %v2323_v45 }
 0x135   : > { %1626 = vmatpush1.bf16.msra.mxu1 %v2339_v50 }
 0x136   : > { %1628 = vmatprep.subr.bf16.mxu1 %v2343_v51 }
 0x139   : > { %1630 = vmatpush1.bf16.msra.mxu1 %v2359_v56 }
 0x13a   : > { %1632 = vmatprep.subr.bf16.mxu1 %v2363_v57 }
 0x13d   : > { %1634 = vmatpush1.bf16.msra.mxu1 %v2379_v62 }
 0x13e   : > { %1636 = vmatprep.subr.bf16.mxu1 %v2383_v63 }
 0x141   : > { %1638 = vmatpush1.bf16.msra.mxu1 %v2399_v5 }
 0x142   : > { %1640 = vmatprep.subr.bf16.mxu1 %v2403_v6 }
 0x145   : > { %1642 = vmatpush1.bf16.msra.mxu1 %v2413_v11 }
 0x146   : > { %1692 = vmatprep.subr.bf16.mxu1 %v1691_v42 }
 0x1eb   : > { %v464_v29 = vpop.f32.mrb[0].mxu1 }
 0x1ec   : > { %v466_v30 = vpop.f32.mrb[1].mxu1  ;;  %v2500_v35 = vsub.f32 %v464_v29, %v2420_v12 }
 0x1ed   : > { %v2497_v34 = vsub.f32 %v466_v30, %v2277_v32  ;;  %v1695_v32 = vpack.c.bf16 %v2466_v27, %v2459_v21 }
 0x1ef   : > { %v470_v36 = vpop.f32.mrb[2].mxu1  ;;  %1431 = vmatprep.mubr.msk.f32.mxu0 %vm304_vm0, %v2497_v34 }
 0x1f0   : > { %v472_v37 = vpop.f32.mrb[3].mxu1  ;;  %550 = vmatmul.mubr.f32.vlgmr.msra.gmra.mrb[4].mxu0 %v2500_v35  ;;  %v477_v41 = vsub.f32 %v470_v36, %v2432_v16 }
 0x1f1   : > { %v2506_v40 = vsub.f32 %v472_v37, %v2424_v15  ;;  %1646 = vmatpush1.bf16.msra.mxu0 %v2186_v7 }
 0x1f2   : > { %1648 = vmatprep.subr.bf16.mxu0 %v2188_v8  ;;  %v1701_v60 = vpack.c.bf16 %v477_v41, %v2500_v35 }
 0x1f3   : > { %1432 = vmatprep.mubr.msk.f32.mxu0 %vm304_vm0, %v2506_v40  ;;  %v1699_v59 = vpack.c.bf16 %v2506_v40, %v2497_v34 }
 0x1f4   : > { %556 = vmatmul.mubr.f32.gmra.mrb[6].mxu0 %v477_v41 }
 0x1f5   : > { %1650 = vmatpush1.bf16.msra.mxu0 %v2206_v13 }
 0x1f6   : > { %1652 = vmatprep.subr.bf16.mxu0 %v2210_v14 }
 0x1f9   : > { %1654 = vmatpush1.bf16.msra.mxu0 %v2229_v19 }
 0x1fa   : > { %1656 = vmatprep.subr.bf16.mxu0 %v2233_v20 }
 0x1fd   : > { %1658 = vmatpush1.bf16.msra.mxu0 %v2249_v25 }
 0x1fe   : > { %1660 = vmatprep.subr.bf16.mxu0 %v2253_v26 }
 0x201   : > { %1662 = vmatpush1.bf16.msra.mxu0 %v2274_v31 }
 0x202   : > { %1664 = vmatprep.subr.bf16.mxu0 %v2281_v33 }
 0x205   : > { %1666 = vmatpush1.bf16.msra.mxu0 %v2299_v38 }
 0x206   : > { %1668 = vmatprep.subr.bf16.mxu0 %v2303_v39 }
 0x209   : > { %1670 = vmatpush1.bf16.msra.mxu0 %v2319_v44 }
 0x20a   : > { %1672 = vmatprep.subr.bf16.mxu0 %v2323_v45 }
 0x20d   : > { %1674 = vmatpush1.bf16.msra.mxu0 %v2339_v50 }
 0x20e   : > { %1676 = vmatprep.subr.bf16.mxu0 %v2343_v51 }
 0x211   : > { %1678 = vmatpush1.bf16.msra.mxu0 %v2359_v56 }
 0x212   : > { %1680 = vmatprep.subr.bf16.mxu0 %v2363_v57 }
 0x215   : > { %1682 = vmatpush1.bf16.msra.mxu0 %v2379_v62 }
 0x216   : > { %1684 = vmatprep.subr.bf16.mxu0 %v2383_v63 }
 0x219   : > { %1686 = vmatpush1.bf16.msra.mxu0 %v2399_v5 }
 0x21a   : > { %1688 = vmatprep.subr.bf16.mxu0 %v2403_v6 }
 0x21d   : > { %1690 = vmatpush1.bf16.msra.mxu0 %v2413_v11 }
 0x21e   : > { %1764 = vmatprep.subr.bf16.mxu0 %v2175_v3 }
 0x2c3   : > { %v551_v43 = vpop.f32.mrb[4].mxu0 }
 0x2c4   : > { %v553_v46 = vpop.f32.mrb[5].mxu0  ;;  %v2543_v49 = vsub.f32 %v551_v43, %v2461_v22  ;;  %v303_v22 = vld [vmem:[%s2780_s3] sm:$0xff] }
 0x2c5   : > { %v2540_v48 = vsub.f32 %v553_v46, %v2459_v21  ;;  %v2079_v21 = vmov 0.0   ;;  %742 = vperm.xlu0 %2009, %v303_v22  }
 0x2c7   : > { %v557_v52 = vpop.f32.mrb[6].mxu0  ;;  %1433 = vmatprep.mubr.msk.f32.mxu1 %vm304_vm0, %v2540_v48 }
 0x2c8   : > { %v559_v53 = vpop.f32.mrb[7].mxu0  ;;  %637 = vmatmul.mubr.f32.vlgmr.msra.gmra.mrb[4].mxu1 %v2543_v49  ;;  %v2554_v55 = vsub.f32 %v557_v52, %v2469_v28 }
 0x2c9   : > { %v2551_v54 = vsub.f32 %v559_v53, %v2466_v27  ;;  %1694 = vmatpush1.bf16.msra.mxu1 %v1693_v47 }
 0x2ca   : > { %1696 = vmatprep.subr.bf16.mxu1 %v1695_v32  ;;  %v1705_v0 = vpack.c.bf16 %v2554_v55, %v2543_v49 }
 0x2cb   : > { %1434 = vmatprep.mubr.msk.f32.mxu1 %vm304_vm0, %v2551_v54  ;;  %v1703_v61 = vpack.c.bf16 %v2551_v54, %v2540_v48 }
 0x2cc   : > { %643 = vmatmul.mubr.f32.gmra.mrb[6].mxu1 %v2554_v55 }
 0x2cd   : > { %1698 = vmatpush1.bf16.msra.mxu1 %v1697_v58  ;;  %813 = vmatprep.mubr.f32.mxu1 %v2079_v21 }
 0x2ce   : > { %1700 = vmatprep.subr.bf16.mxu1 %v1699_v59 }
 0x2d1   : > { %1702 = vmatpush1.bf16.msra.mxu1 %v1701_v60 }
 0x2d2   : > { %1704 = vmatprep.subr.bf16.mxu1 %v1703_v61 }
 0x2d5   : > { %1706 = vmatpush1.bf16.msra.mxu1 %v1705_v0 }
 0x344   : > { %v743_v42 = vpop.permute.xlu0 %742 }
 0x39b   : > { %v638_v1 = vpop.f32.mrb[4].mxu1 }
 0x39c   : > { %v640_v2 = vpop.f32.mrb[5].mxu1  ;;  %v649_v9 = vsub.f32 %v638_v1, %v2500_v35 }
 0x39d   : > { %v650_v4 = vsub.f32 %v640_v2, %v2497_v34 }
 0x39f   : > { %v644_v10 = vpop.f32.mrb[6].mxu1  ;;  %1435 = vmatprep.mubr.msk.f32.mxu0 %vm304_vm0, %v650_v4 }
 0x3a0   : > { %v651_v12 = vsub.f32 %v644_v10, %v477_v41  ;;  %v646_v15 = vpop.f32.mrb[7].mxu1  ;;  %724 = vmatmul.mubr.f32.vlgmr.msra.gmra.mrb[8].mxu0 %v649_v9  ;;  %v302_v41 = vld [vmem:[%s2779_s2] sm:$0xff] }
 0x3a1   : > { %v652_v16 = vsub.f32 %v646_v15, %v2506_v40  ;;  %1766 = vmatpush1.bf16.msra.mxu0 %v2186_v7 }
 0x3a2   : > { %v1709_v17 = vpack.c.bf16 %v651_v12, %v649_v9  ;;  %1768 = vmatprep.subr.bf16.mxu0 %v2188_v8 }
 0x3a3   : > { %v1707_v18 = vpack.c.bf16 %v652_v16, %v650_v4  ;;  %1436 = vmatprep.mubr.msk.f32.mxu0 %vm304_vm0, %v652_v16 }
 0x3a4   : > { %730 = vmatmul.mubr.f32.gmra.mrb[10].mxu0 %v651_v12 }
 0x3a5   : > { %1708 = vmatprep.subr.bf16.mxu1 %v1707_v18  ;;  %1770 = vmatpush1.bf16.msra.mxu0 %v2206_v13 }
 0x3a6   : > { %1710 = vmatpush1.bf16.msra.mxu1 %v1709_v17  ;;  %1772 = vmatprep.subr.bf16.mxu0 %v2210_v14 }
 0x3a9   : > { %1774 = vmatpush1.bf16.msra.mxu0 %v2229_v19 }
 0x3aa   : > { %1776 = vmatprep.subr.bf16.mxu0 %v2233_v20 }
 0x3ad   : > { %1778 = vmatpush1.bf16.msra.mxu0 %v2249_v25 }
 0x3ae   : > { %1780 = vmatprep.subr.bf16.mxu0 %v2253_v26 }
 0x3b1   : > { %1782 = vmatpush1.bf16.msra.mxu0 %v2274_v31 }
 0x3b2   : > { %1784 = vmatprep.subr.bf16.mxu0 %v2281_v33 }
 0x3b5   : > { %1786 = vmatpush1.bf16.msra.mxu0 %v2299_v38 }
 0x3b6   : > { %1788 = vmatprep.subr.bf16.mxu0 %v2303_v39 }
 0x3b9   : > { %1790 = vmatpush1.bf16.msra.mxu0 %v2319_v44 }
 0x3ba   : > { %1792 = vmatprep.subr.bf16.mxu0 %v2323_v45 }
 0x3bd   : > { %1794 = vmatpush1.bf16.msra.mxu0 %v2339_v50 }
 0x3be   : > { %1796 = vmatprep.subr.bf16.mxu0 %v2343_v51 }
 0x3c1   : > { %1798 = vmatpush1.bf16.msra.mxu0 %v2359_v56 }
 0x3c2   : > { %1800 = vmatprep.subr.bf16.mxu0 %v2363_v57 }
 0x3c5   : > { %1802 = vmatpush1.bf16.msra.mxu0 %v2379_v62 }
 0x3c6   : > { %1804 = vmatprep.subr.bf16.mxu0 %v2383_v63 }
 0x3c9   : > { %1806 = vmatpush1.bf16.msra.mxu0 %v2399_v5 }
 0x3ca   : > { %1808 = vmatprep.subr.bf16.mxu0 %v2403_v6 }
 0x3cd   : > { %1810 = vmatpush1.bf16.msra.mxu0 %v2413_v11 }
 0x3ce   : > { %1860 = vmatprep.subr.bf16.mxu0 %v2175_v3 }
 0x473   : > { %v725_v24 = vpop.f32.mrb[8].mxu0 }
 0x474   : > { %v727_v27 = vpop.f32.mrb[9].mxu0  ;;  %v736_v29 = vsub.f32 %v725_v24, %v2543_v49 }
 0x475   : > { %v737_v35 = vsub.f32 %v727_v27, %v2540_v48 }
 0x477   : > { %v731_v28 = vpop.f32.mrb[10].mxu0 }
 0x478   : > { %v738_v30 = vsub.f32 %v731_v28, %v2554_v55  ;;  %v733_v34 = vpop.f32.mrb[11].mxu0 }
 0x479   : > { %v739_v36 = vsub.f32 %v733_v34, %v2551_v54 }
 0x47a   : > { %v1713_v37 = vpack.c.bf16 %v738_v30, %v736_v29 }
 0x47b   : > { %v1711_v40 = vpack.c.bf16 %v739_v36, %v737_v35 }
 0x47d   : > { %1712 = vmatprep.subr.bf16.mxu1 %v1711_v40 }
 0x47e   : > { %1714 = vmatpush1.bf16.msra.mxu1 %v1713_v37 }
 0x47f   : > { %1716 = vmatprep.subr.bf16.mxu1 %v2175_v3 }
 0x481   : > { %1437 = vmatmul.mubr.msk.f32.vlgmr.msra.gmra.mrb[8].mxu1 %vm745_vm1, %v302_v41 }
 0x482   : > { %1718 = vmatpush1.bf16.msra.mxu1 %v2186_v7 }
 0x483   : > { %1720 = vmatprep.subr.bf16.mxu1 %v2188_v8 }
 0x486   : > { %1722 = vmatpush1.bf16.msra.mxu1 %v2206_v13 }
 0x487   : > { %1724 = vmatprep.subr.bf16.mxu1 %v2210_v14 }
 0x48a   : > { %1726 = vmatpush1.bf16.msra.mxu1 %v2229_v19 }
 0x48b   : > { %1728 = vmatprep.subr.bf16.mxu1 %v2233_v20 }
 0x48e   : > { %1730 = vmatpush1.bf16.msra.mxu1 %v2249_v25 }
 0x48f   : > { %1732 = vmatprep.subr.bf16.mxu1 %v2253_v26 }
 0x492   : > { %1734 = vmatpush1.bf16.msra.mxu1 %v2274_v31 }
 0x493   : > { %1736 = vmatprep.subr.bf16.mxu1 %v2281_v33 }
 0x496   : > { %1738 = vmatpush1.bf16.msra.mxu1 %v2299_v38 }
 0x497   : > { %1740 = vmatprep.subr.bf16.mxu1 %v2303_v39 }
 0x49a   : > { %1742 = vmatpush1.bf16.msra.mxu1 %v2319_v44 }
 0x49b   : > { %1744 = vmatprep.subr.bf16.mxu1 %v2323_v45 }
 0x49e   : > { %1746 = vmatpush1.bf16.msra.mxu1 %v2339_v50 }
 0x49f   : > { %1748 = vmatprep.subr.bf16.mxu1 %v2343_v51 }
 0x4a2   : > { %1750 = vmatpush1.bf16.msra.mxu1 %v2359_v56 }
 0x4a3   : > { %1752 = vmatprep.subr.bf16.mxu1 %v2363_v57 }
 0x4a6   : > { %1754 = vmatpush1.bf16.msra.mxu1 %v2379_v62 }
 0x4a7   : > { %1756 = vmatprep.subr.bf16.mxu1 %v2383_v63 }
 0x4aa   : > { %1758 = vmatpush1.bf16.msra.mxu1 %v2399_v5 }
 0x4ab   : > { %1760 = vmatprep.subr.bf16.mxu1 %v2403_v6 }
 0x4ae   : > { %1762 = vmatpush1.bf16.msra.mxu1 %v2413_v11 }
 0x4af   : > { %1812 = vmatprep.subr.bf16.mxu1 %v2175_v3 }
 0x554   : > { %v815_v43 = vpop.f32.mrb[8].mxu1 }
 0x555   : > { %v816_v46 = vadd.f32 %v815_v43, %v743_v42  ;;  %v817_v47 = vpop.f32.mrb[9].mxu1 }
 0x556   : > { %v818_v48 = vadd.f32 %v817_v47, %v743_v42 }
 0x557   : > { %v825_v32 = vmul.f32 %v816_v46, %v816_v46 }
 0x558   : > { %v820_v49 = vsel %vm304_vm0, %v818_v48, 0.0  ;;  %v826_v52 = vmul.f32 %v818_v48, %v818_v48 }
 0x559   : > { %v821_v53 = vadd.f32 %v820_v49, %v816_v46 }
 0x55a   : > { %v827_v54 = vsel %vm304_vm0, %v826_v52, 0.0 }
 0x55b   : > { %822 = vadd.xlane.f32.xlu0 %v821_v53  ;;  %v828_v55 = vadd.f32 %v827_v54, %v825_v32 }
 0x55d   : > { %829 = vadd.xlane.f32.xlu1 %v828_v55 }
 0x5e8   : > { %v823_v58 = vpop.xlane.xlu0 %822 }
 0x5e9   : > { %v824_v59 = vmul.f32 0.0052083335, %v823_v58  ;;  %v2081_v58 = vmov 1983009808  }
 0x5ea   : > { %v830_v60 = vpop.xlane.xlu1 %829 }
 0x5eb   : > { %v831_v61 = vmul.f32 0.0052083335, %v830_v60  ;;  %v832_v0 = vmul.f32 %v824_v59, %v824_v59  ;;  %v835_v9 = vsub.f32 %v816_v46, %v824_v59  ;;  %v836_v10 = vsub.f32 %v818_v48, %v824_v59 }
 0x5ec   : > { %v1336_v59 = vunpack.c.l.s4 %v2081_v58  ;;  %v1338_v60 = vlaneseq }
 0x5ed   : > { %v833_v1 = vsub.f32 %v831_v61, %v832_v0 }
 0x5ef   : > { %v834_v2 = vmax.f32 %v833_v1, 0.0  ;;  %v1337_v1 = vunpack.c.0.s8 %v1336_v59 }
 0x5f1   : > { %v837_v4 = vadd.f32 1e-05, %v834_v2  ;;  %v1339_v2 = vshrl.u32 %v1338_v60, 7 }
 0x5f3   : > { %2011 = vrsqrt.f32 %v837_v4 }
 0x5fd   : > { %v2012_v12 = vpop.eup %2011 }
 0x5fe   : > { %v840_v15 = vmul.f32 %v2012_v12, %v836_v10  ;;  %v839_v16 = vmul.f32 %v2012_v12, %v835_v9 }
 0x600   : > { %v842_v17 = vmax.f32 %v840_v15, 0.0  ;;  %v2635_v18 = vmax.f32 %v839_v16, 0.0  ;;  %v1340_v16 = vsub.s32 %v1337_v1, %v1339_v2 }
 0x602   : > { %1438 = vmatprep.mubr.msk.f32.mxu1 %vm304_vm0, %v842_v17 }
 0x603   : > { %913 = vmatmul.mubr.f32.vlgmr.msra.gmra.mrb[10].mxu1 %v2635_v18 }
 0x604   : > { %1814 = vmatpush1.bf16.msra.mxu1 %v2186_v7 }
 0x605   : > { %1816 = vmatprep.subr.bf16.mxu1 %v2188_v8 }
 0x608   : > { %1818 = vmatpush1.bf16.msra.mxu1 %v2206_v13 }
 0x609   : > { %1820 = vmatprep.subr.bf16.mxu1 %v2210_v14 }
 0x60c   : > { %1822 = vmatpush1.bf16.msra.mxu1 %v2229_v19 }
 0x60d   : > { %1824 = vmatprep.subr.bf16.mxu1 %v2233_v20 }
 0x610   : > { %1826 = vmatpush1.bf16.msra.mxu1 %v2249_v25 }
 0x611   : > { %1828 = vmatprep.subr.bf16.mxu1 %v2253_v26 }
 0x614   : > { %1830 = vmatpush1.bf16.msra.mxu1 %v2274_v31 }
 0x615   : > { %1832 = vmatprep.subr.bf16.mxu1 %v2281_v33 }
 0x618   : > { %1834 = vmatpush1.bf16.msra.mxu1 %v2299_v38 }
 0x619   : > { %1836 = vmatprep.subr.bf16.mxu1 %v2303_v39 }
 0x61c   : > { %1838 = vmatpush1.bf16.msra.mxu1 %v2319_v44 }
 0x61d   : > { %1840 = vmatprep.subr.bf16.mxu1 %v2323_v45 }
 0x620   : > { %1842 = vmatpush1.bf16.msra.mxu1 %v2339_v50 }
 0x621   : > { %1844 = vmatprep.subr.bf16.mxu1 %v2343_v51 }
 0x624   : > { %1846 = vmatpush1.bf16.msra.mxu1 %v2359_v56 }
 0x625   : > { %1848 = vmatprep.subr.bf16.mxu1 %v2363_v57 }
 0x628   : > { %1850 = vmatpush1.bf16.msra.mxu1 %v2379_v62 }
 0x629   : > { %1852 = vmatprep.subr.bf16.mxu1 %v2383_v63 }
 0x62c   : > { %1854 = vmatpush1.bf16.msra.mxu1 %v2399_v5 }
 0x62d   : > { %1856 = vmatprep.subr.bf16.mxu1 %v2403_v6 }
 0x630   : > { %1858 = vmatpush1.bf16.msra.mxu1 %v2413_v11 }
 0x631   : > { %1908 = vmatprep.subr.bf16.mxu1 %v2175_v3 }
 0x6d6   : > { %v914_v22 = vpop.f32.mrb[10].mxu1 }
 0x6d7   : > { %v916_v23 = vpop.f32.mrb[11].mxu1  ;;  %v2663_v27 = vmul.f32 0.5, %v914_v22 }
 0x6d8   : > { %v920_v24 = vmul.f32 0.5, %v916_v23 }
 0x6da   : > { %1439 = vmatprep.mubr.msk.f32.mxu0 %vm304_vm0, %v920_v24  ;;  %v1955_v3 = vpack.c.bf16 %v920_v24, %v842_v17 }
 0x6db   : > { %989 = vmatmul.mubr.f32.vlgmr.msra.gmra.mrb[12].mxu0 %v2663_v27 }
 0x6dc   : > { %1862 = vmatpush1.bf16.msra.mxu0 %v2186_v7 }
 0x6dd   : > { %1864 = vmatprep.subr.bf16.mxu0 %v2188_v8 }
 0x6e0   : > { %1866 = vmatpush1.bf16.msra.mxu0 %v2206_v13 }
 0x6e1   : > { %1868 = vmatprep.subr.bf16.mxu0 %v2210_v14 }
 0x6e4   : > { %1870 = vmatpush1.bf16.msra.mxu0 %v2229_v19 }
 0x6e5   : > { %1872 = vmatprep.subr.bf16.mxu0 %v2233_v20 }
 0x6e8   : > { %1874 = vmatpush1.bf16.msra.mxu0 %v2249_v25 }
 0x6e9   : > { %1876 = vmatprep.subr.bf16.mxu0 %v2253_v26 }
 0x6ec   : > { %1878 = vmatpush1.bf16.msra.mxu0 %v2274_v31 }
 0x6ed   : > { %1880 = vmatprep.subr.bf16.mxu0 %v2281_v33 }
 0x6f0   : > { %1882 = vmatpush1.bf16.msra.mxu0 %v2299_v38 }
 0x6f1   : > { %1884 = vmatprep.subr.bf16.mxu0 %v2303_v39 }
 0x6f4   : > { %1886 = vmatpush1.bf16.msra.mxu0 %v2319_v44 }
 0x6f5   : > { %1888 = vmatprep.subr.bf16.mxu0 %v2323_v45 }
 0x6f8   : > { %1890 = vmatpush1.bf16.msra.mxu0 %v2339_v50 }
 0x6f9   : > { %1892 = vmatprep.subr.bf16.mxu0 %v2343_v51 }
 0x6fc   : > { %1894 = vmatpush1.bf16.msra.mxu0 %v2359_v56 }
 0x6fd   : > { %1896 = vmatprep.subr.bf16.mxu0 %v2363_v57 }
 0x700   : > { %1898 = vmatpush1.bf16.msra.mxu0 %v2379_v62 }
 0x701   : > { %1900 = vmatprep.subr.bf16.mxu0 %v2383_v63 }
 0x704   : > { %1902 = vmatpush1.bf16.msra.mxu0 %v2399_v5 }
 0x705   : > { %1904 = vmatprep.subr.bf16.mxu0 %v2403_v6 }
 0x708   : > { %1906 = vmatpush1.bf16.msra.mxu0 %v2413_v11 }
 0x709   : > { %1956 = vmatprep.subr.bf16.mxu0 %v1955_v3 }
 0x7ae   : > { %v990_v28 = vpop.f32.mrb[12].mxu0 }
 0x7af   : > { %v992_v29 = vpop.f32.mrb[13].mxu0  ;;  %v995_v34 = vsub.f32 %v990_v28, %v2635_v18 }
 0x7b0   : > { %v996_v30 = vsub.f32 %v992_v29, %v842_v17 }
 0x7b2   : > { %1440 = vmatprep.mubr.msk.f32.mxu1 %vm304_vm0, %v996_v30 }
 0x7b3   : > { %1065 = vmatmul.mubr.f32.vlgmr.msra.gmra.mrb[12].mxu1 %v995_v34 }
 0x7b4   : > { %1910 = vmatpush1.bf16.msra.mxu1 %v2186_v7 }
 0x7b5   : > { %1912 = vmatprep.subr.bf16.mxu1 %v2188_v8 }
 0x7b8   : > { %1914 = vmatpush1.bf16.msra.mxu1 %v2206_v13 }
 0x7b9   : > { %1916 = vmatprep.subr.bf16.mxu1 %v2210_v14 }
 0x7bc   : > { %1918 = vmatpush1.bf16.msra.mxu1 %v2229_v19  ;;  %v1957_v19 = vpack.c.bf16 %v2663_v27, %v2635_v18 }
 0x7bd   : > { %1920 = vmatprep.subr.bf16.mxu1 %v2233_v20 }
 0x7c0   : > { %1922 = vmatpush1.bf16.msra.mxu1 %v2249_v25 }
 0x7c1   : > { %1924 = vmatprep.subr.bf16.mxu1 %v2253_v26 }
 0x7c4   : > { %1926 = vmatpush1.bf16.msra.mxu1 %v2274_v31 }
 0x7c5   : > { %1928 = vmatprep.subr.bf16.mxu1 %v2281_v33 }
 0x7c8   : > { %1930 = vmatpush1.bf16.msra.mxu1 %v2299_v38 }
 0x7c9   : > { %1932 = vmatprep.subr.bf16.mxu1 %v2303_v39  ;;  %v844_v39 = vld [vmem:[%s2782_s5] sm:$0x3] }
 0x7ca   : > { %1227 = vperm.xlu1 %2010, %v844_v39  }
 0x7cc   : > { %1934 = vmatpush1.bf16.msra.mxu1 %v2319_v44 }
 0x7cd   : > { %1936 = vmatprep.subr.bf16.mxu1 %v2323_v45 }
 0x7d0   : > { %1938 = vmatpush1.bf16.msra.mxu1 %v2339_v50 }
 0x7d1   : > { %1940 = vmatprep.subr.bf16.mxu1 %v2343_v51 }
 0x7d4   : > { %1942 = vmatpush1.bf16.msra.mxu1 %v2359_v56 }
 0x7d5   : > { %1944 = vmatprep.subr.bf16.mxu1 %v2363_v57 }
 0x7d8   : > { %1946 = vmatpush1.bf16.msra.mxu1 %v2379_v62  ;;  %v843_v62 = vld [vmem:[%s2781_s4] sm:$0x3] }
 0x7d9   : > { %1948 = vmatprep.subr.bf16.mxu1 %v2383_v63 }
 0x7dc   : > { %1950 = vmatpush1.bf16.msra.mxu1 %v2399_v5 }
 0x7dd   : > { %1952 = vmatprep.subr.bf16.mxu1 %v2403_v6 }
 0x7e0   : > { %1954 = vmatpush1.bf16.msra.mxu1 %v2413_v11 }
 0x849   : > { %v1228_v63 = vpop.permute.xlu1 %1227 }
 0x886   : > { %v1066_v7 = vpop.f32.mrb[12].mxu1 }
 0x887   : > { %v1068_v8 = vpop.f32.mrb[13].mxu1  ;;  %v1071_v14 = vsub.f32 %v1066_v7, %v2663_v27 }
 0x888   : > { %v1072_v13 = vsub.f32 %v1068_v8, %v920_v24 }
 0x889   : > { %v1961_v25 = vpack.c.bf16 %v1071_v14, %v995_v34 }
 0x88a   : > { %1441 = vmatprep.mubr.msk.f32.mxu0 %vm304_vm0, %v1072_v13  ;;  %v1959_v20 = vpack.c.bf16 %v1072_v13, %v996_v30 }
 0x88b   : > { %1141 = vmatmul.mubr.f32.vlgmr.msra.gmra.mrb[14].mxu0 %v1071_v14 }
 0x88c   : > { %1958 = vmatpush1.bf16.msra.mxu0 %v1957_v19  ;;  %1298 = vmatprep.mubr.f32.mxu0 %v2079_v21 }
 0x88d   : > { %1960 = vmatprep.subr.bf16.mxu0 %v1959_v20 }
 0x890   : > { %1962 = vmatpush1.bf16.msra.mxu0 %v1961_v25 }
 0x95e   : > { %v1142_v26 = vpop.f32.mrb[14].mxu0 }
 0x95f   : > { %v1144_v31 = vpop.f32.mrb[15].mxu0  ;;  %v1147_v38 = vsub.f32 %v1142_v26, %v995_v34 }
 0x960   : > { %v1148_v33 = vsub.f32 %v1144_v31, %v996_v30 }
 0x962   : > { %1442 = vmatprep.mubr.msk.f32.mxu1 %vm304_vm0, %v1148_v33 }
 0x963   : > { %1217 = vmatmul.mubr.f32.vlgmr.msra.gmra.mrb[14].mxu1 %v1147_v38 }
 0xa36   : > { %v1218_v44 = vpop.f32.mrb[14].mxu1 }
 0xa37   : > { %v1223_v45 = vsub.f32 %v1218_v44, %v1071_v14  ;;  %v1220_v50 = vpop.f32.mrb[15].mxu1 }
 0xa38   : > { %v1224_v51 = vsub.f32 %v1220_v50, %v1072_v13 }
 0xa39   : > { %v1965_v57 = vpack.c.bf16 %v1223_v45, %v1147_v38 }
 0xa3a   : > { %v1963_v56 = vpack.c.bf16 %v1224_v51, %v1148_v33 }
 0xa3c   : > { %1964 = vmatprep.subr.bf16.mxu0 %v1963_v56 }
 0xa3d   : > { %1966 = vmatpush1.bf16.msra.mxu0 %v1965_v57 }
 0xa40   : > { %1443 = vmatmul.mubr.msk.f32.vlgmr.msra.gmra.mrb[16].mxu0 %vm1230_vm2, %v843_v62 }
 0xb13   : > { %v1300_v5 = vpop.f32.mrb[16].mxu0 }
 0xb14   : > { %v1301_v6 = vadd.f32 %v1300_v5, %v1228_v63  ;;  %v1302_v11 = vpop.f32.mrb[17].mxu0 }
 0xb15   : > { %v1303_v21 = vadd.f32 %v1302_v11, %v1228_v63 }
 0xb16   : > { %v1306_v35 = vsel %vm1305_vm3, %v1301_v6, 0.0  ;;  %v1313_v36 = vmul.f32 %v1301_v6, %v1301_v6 }
 0xb17   : > { %v1308_v37 = vsel %vm1307_vm4, %v1303_v21, 0.0  ;;  %v1314_v40 = vmul.f32 %v1303_v21, %v1303_v21 }
 0xb18   : > { %v1309_v41 = vadd.f32 %v1308_v37, %v1306_v35  ;;  %v1315_v42 = vsel %vm1305_vm3, %v1313_v36, 0.0 }
 0xb19   : > { %v1316_v43 = vsel %vm1307_vm4, %v1314_v40, 0.0 }
 0xb1a   : > { %1310 = vadd.xlane.f32.xlu1 %v1309_v41  ;;  %v1317_v46 = vadd.f32 %v1316_v43, %v1315_v42 }
 0xb1c   : > { %1318 = vadd.xlane.f32.xlu0 %v1317_v46 }
 0xba7   : > { %v1311_v47 = vpop.xlane.xlu1 %1310 }
 0xba8   : > { %v1312_v48 = vmul.f32 0.0052083335, %v1311_v47 }
 0xba9   : > { %v1319_v49 = vpop.xlane.xlu0 %1318 }
 0xbaa   : > { %v1320_v52 = vmul.f32 0.0052083335, %v1319_v49  ;;  %v1321_v53 = vmul.f32 %v1312_v48, %v1312_v48  ;;  %v1324_v61 = vsub.f32 %v1301_v6, %v1312_v48  ;;  %v1325_v0 = vsub.f32 %v1303_v21, %v1312_v48 }
 0xbac   : > { %v1322_v32 = vsub.f32 %v1320_v52, %v1321_v53 }
 0xbae   : > { %v1323_v54 = vmax.f32 %v1322_v32, 0.0 }
 0xbb0   : > { %v1326_v55 = vadd.f32 1e-05, %v1323_v54 }
 0xbb2   : > { %2013 = vrsqrt.f32 %v1326_v55 }
 0xbbc   : > { %v2014_v4 = vpop.eup %2013 }
 0xbbd   : > { %v1328_v9 = vmul.f32 %v2014_v4, %v1324_v61  ;;  %v1329_v10 = vmul.f32 %v2014_v4, %v1325_v0 }
 0xbbf   : > { %v1330_v12 = vmax.f32 %v1328_v9, 0.0  ;;  %v1331_v15 = vmax.f32 %v1329_v10, 0.0 }
 0xbc1   : > { %v1334_v17 = vcombine.low %v1330_v12, %v1331_v15 }
 0xbc3   : > { %v1341_v18 = vrot.slane %v1334_v17, %v1340_v16 }
 0xbc5   : > { %1345 = vst.msk [vmem:[%s244_s19] sm:$0xf] %vm1344_vm6, %v1341_v18 }
 0xbc6   : > { %2028 = shalt.err (!%p2025_p3)
}
 0xbc7   : > { %s2029_s13 = scalar_lea.hbm %s2735_s29, 64  ;;  %s2033_s16 = scalar_lea.hbm %s2783_s6, 128 }
 0xbc8   : > { %p2030_p4 = scmp.ne.s32.totalorder %s2735_s29, %s2029_s13  ;;  %p2034_p9 = scmp.lt.u32.totalorder %s2735_s29, %s2783_s6 }
 0xbc9   : > { %p2035_p10 = scmp.lt.u32.totalorder %s2033_s16, %s2029_s13  ;;  %p2037_p12 = scmp.lt.u32.totalorder %s2029_s13, %s2735_s29 }
 0xbca   : > { %p2031_p7 = pnand %p2030_p4, %p2156_p5 }
 0xbcb   : > { %p2036_p11 = por %p2035_p10, %p2034_p9 }
 0xbcc   : > { %p2032_p8 = pneg %p2031_p7 }
 0xbcd   : > { %p2038_p13 = por %p2037_p12, %p2036_p11 }
 0xbcf   : > { %p2039_p0 = pnand %p2038_p13, %p2032_p8 }
 0xbd1   : > { %2042 = shalt.err (!%p2039_p0)
}
 0xbd2   : > { %1967 = dma.vmem_to_hbm [thread:$0]  (%p2156_p5), %s2737_s20, 64, %s2735_s29, %s1347_s9  }
 0xbd3 PF: > { %p1973_p1 = scmp.ge.s32.totalorder %s2077_s24, 2  ;;  %s1373_s19 = sand.u32 1, %s2065_s21  }
 0xbd4   : > { %s1374_s26 = scalar_lea.sflag [#allocation3], %s1373_s19 }
 0xbd5   : > { %p1970_p2 = pnand %p1973_p1, %p2160_p6 }
 0xbd7   : > { %2060 = dma.done.wait (!%p1970_p2), %s1374_s26, 64  }
 0xbd8   : > { %2062 = vsyncadd (!%p1970_p2), %s1374_s26, 4294967232  ;;  %p16_p3 = scmp.ge.s32.totalorder %s2143_s27, 4   ;;  %s2786_s21 = smov %s2069_s22 }
 0xbd9   : > { %s2787_s22 = smov %s2073_s23  ;;  %s2788_s23 = smov %s2154_s30 }
 0xbda   : > { %s2789_s24 = smov %s2143_s27  ;;  %18 = sbr.rel (!%p16_p3) target bundleno = 3 (0x3), region = 79 }
 0xbe1   :  { %1379 = vsyncpa [#allocation3], 1 }
 0xbe2   :  { %1381 = vsyncpa [#allocation3 + $0x1], 1 }

</bundles_post_ra>
